<compile_context>
chip_gen: v7x
topology: tpu7x:2x2x1
jax: 0.10.0
libtpu: 0.0.40
codegen_flags: <defaults>
</compile_context>

<pallas_src>
import jax
import jax.numpy as jnp
from jax import lax
from jax.experimental import pallas as pl
from jax.experimental.pallas import tpu as pltpu

EPS = 1e-5


def _affine_prelu_conv3x3_kernel(x_ref,      # VMEM (1, H*W, Cp) f32   input activation tile (one image)
                                 p_ref,      # VMEM (3, Cp)      f32   rows = [scale, shift, prelu_alpha]
                                 w_ref,      # VMEM (9, Cp, Cp)  bf16  conv weight, one (Cin,Cout) slice per 3x3 tap
                                 y_ref,      # VMEM (1, H*W, Cp) f32   raw conv output tile
                                 stats_ref,  # VMEM (1, 2, Cp)   f32   per-tile [sum, sum_of_squares]
                                 pad_ref):   # VMEM scratch (H+2, W+2, Cp) bf16  per-image halo-padded conv input
    Hp, Wp, Cp = pad_ref.shape
    H, W = Hp - 2, Wp - 2
    HW = H * W

    scale = p_ref[0:1, :]                       # (1, Cp) broadcast over rows
    shift = p_ref[1:2, :]
    alpha = p_ref[2:3, :]

    # Fused preamble: affine (previous BN, or identity on the first pass) + PReLU, all in f32.
    a = x_ref[0] * scale + shift
    a = jnp.where(a >= 0, a, alpha * a)

    # Build the padded conv input in bf16: zero ONLY the 1-pixel halo, write the interior once.
    zero_row = jnp.zeros((1, Wp, Cp), jnp.bfloat16)
    zero_col = jnp.zeros((Hp, 1, Cp), jnp.bfloat16)
    pad_ref[0:1, :, :] = zero_row
    pad_ref[Hp - 1:Hp, :, :] = zero_row
    pad_ref[:, 0:1, :] = zero_col
    pad_ref[:, Wp - 1:Wp, :] = zero_col
    pad_ref[1:H + 1, 1:W + 1, :] = a.reshape(H, W, Cp).astype(jnp.bfloat16)

    # 3x3 conv as 9 accumulating MXU dots (no materialized im2col / concatenate).
    acc = jnp.zeros((HW, Cp), jnp.float32)
    for k in range(9):
        dy, dx = divmod(k, 3)
        patch = pad_ref[dy:dy + H, dx:dx + W, :].reshape(HW, Cp)            # bf16
        acc = acc + jnp.dot(patch, w_ref[k], preferred_element_type=jnp.float32)

    y_ref[0] = acc

    # Partial batch-norm statistics from the still-live f32 accumulator (single traversal).
    s = jnp.sum(acc, axis=0, keepdims=True)
    ss = jnp.sum(acc * acc, axis=0, keepdims=True)
    stats_ref[0] = jnp.concatenate([s, ss], axis=0)


def _bn_residual_prelu_kernel(y_ref,   # VMEM (1, H*W, Cp) f32  conv2 raw output tile
                              x_ref,   # VMEM (1, H*W, Cp) f32  residual (original input) tile
                              p_ref,   # VMEM (3, Cp)      f32  rows = [scale2, shift2, prelu_alpha]
                              o_ref):  # VMEM (1, H*W, Cp) f32  block output tile
    scale = p_ref[0:1, :]
    shift = p_ref[1:2, :]
    alpha = p_ref[2:3, :]
    v = y_ref[0] * scale + shift + x_ref[0]
    o_ref[0] = jnp.where(v >= 0, v, alpha * v)


def _bn_affine_params(stats, gamma, beta, alpha_vec, nhw, Cp, C):
    """Finalize training-mode BN from per-tile partial sums: tiny (2, Cp) math in plain JAX."""
    s = jnp.sum(stats, axis=0)                               # (2, Cp)
    mean = s[0] / nhw
    var = jnp.maximum(s[1] / nhw - mean * mean, 0.0)         # clamp: guards E[x^2]-E[x]^2 cancellation
    g = jnp.pad(gamma.astype(jnp.float32), (0, Cp - C))
    b = jnp.pad(beta.astype(jnp.float32), (0, Cp - C))
    scale = g * lax.rsqrt(var + EPS)
    shift = b - mean * scale
    return jnp.stack([scale, shift, alpha_vec])              # (3, Cp)


@jax.jit
def basic_block_forward(x_nchw, w1_oihw, g1, b1, w2_oihw, g2, b2, alpha):
    N, C, H, W = x_nchw.shape
    Cp = ((C + 127) // 128) * 128        # lane-pad channels -> unmasked stores, full MXU columns
    HW = H * W
    nhw = N * H * W

    # NCHW -> NHWC, zero-pad channels, flatten spatial: lane-dense (N, H*W, Cp) f32 slab.
    x_slab = jnp.pad(jnp.transpose(x_nchw, (0, 2, 3, 1)).astype(jnp.float32),
                     ((0, 0), (0, 0), (0, 0), (0, Cp - C))).reshape(N, HW, Cp)

    def prep_w(w):  # OIHW -> HWIO, zero-pad Cin/Cout, bf16, one (Cp, Cp) slice per 3x3 tap.
        w = jnp.transpose(w, (2, 3, 1, 0)).astype(jnp.bfloat16)
        return jnp.pad(w, ((0, 0), (0, 0), (0, Cp - C), (0, Cp - C))).reshape(9, Cp, Cp)

    w1p, w2p = prep_w(w1_oihw), prep_w(w2_oihw)

    alpha_vec = jnp.broadcast_to(alpha.astype(jnp.float32), (Cp,))
    ones = jnp.ones((Cp,), jnp.float32)
    zeros = jnp.zeros((Cp,), jnp.float32)
    identity_params = jnp.stack([ones, zeros, ones])   # scale=1, shift=0, alpha=1 -> identity preamble

    act_spec = pl.BlockSpec((1, HW, Cp), lambda n: (n, 0, 0))          # streamed per-image tiles
    par_spec = pl.BlockSpec((3, Cp), lambda n: (0, 0))                 # grid-resident params
    w_spec = pl.BlockSpec((9, Cp, Cp), lambda n: (0, 0, 0))            # grid-resident weights
    stats_spec = pl.BlockSpec((1, 2, Cp), lambda n: (n, 0, 0))         # per-tile partial stats

    cparams = pltpu.CompilerParams(
        dimension_semantics=("parallel",),          # shard batch tiles across cores (v7x megacore)
        vmem_limit_bytes=48 * 1024 * 1024,          # portable across v5e/v6e/v7x; tune per gen at real shapes
    )

    conv_pass = pl.pallas_call(
        _affine_prelu_conv3x3_kernel,
        out_shape=(jax.ShapeDtypeStruct((N, HW, Cp), jnp.float32),
                   jax.ShapeDtypeStruct((N, 2, Cp), jnp.float32)),
        grid=(N,),
        in_specs=(act_spec, par_spec, w_spec),
        out_specs=(act_spec, stats_spec),
        scratch_shapes=[pltpu.VMEM((H + 2, W + 2, Cp), jnp.bfloat16)],
        compiler_params=cparams,
    )

    # Pass 1: conv1 + partial batch stats (identity affine/PReLU preamble).
    y1, st1 = conv_pass(x_slab, identity_params, w1p)
    p1 = _bn_affine_params(st1, g1, b1, alpha_vec, nhw, Cp, C)

    # Pass 2: bn1-normalize + PReLU + conv2 + partial batch stats.
    y2, st2 = conv_pass(y1, p1, w2p)
    p2 = _bn_affine_params(st2, g2, b2, alpha_vec, nhw, Cp, C)

    # Pass 3: bn2-normalize + residual add + PReLU.
    out_slab = pl.pallas_call(
        _bn_residual_prelu_kernel,
        out_shape=jax.ShapeDtypeStruct((N, HW, Cp), jnp.float32),
        grid=(N,),
        in_specs=(act_spec, act_spec, par_spec),
        out_specs=act_spec,
        compiler_params=cparams,
    )(y2, x_slab, p2)

    out = out_slab.reshape(N, H, W, Cp)[..., :C]
    return jnp.transpose(out, (0, 3, 1, 2))                 # back to NCHW


# ------------------------- pure-JAX reference (for verification) -------------------------
def _ref_forward(x, w1, g1, b1, w2, g2, b2, alpha):
    def conv3x3(inp, w):
        dn = lax.conv_dimension_numbers(inp.shape, w.shape, ("NCHW", "OIHW", "NCHW"))
        return lax.conv_general_dilated(inp, w, (1, 1), ((1, 1), (1, 1)),
                                        dimension_numbers=dn)

    def bn(inp, g, b):
        mean = jnp.mean(inp, axis=(0, 2, 3), keepdims=True)
        var = jnp.mean((inp - mean) ** 2, axis=(0, 2, 3), keepdims=True)
        return (inp - mean) * (g.reshape(1, -1, 1, 1) * lax.rsqrt(var + EPS)) \
            + b.reshape(1, -1, 1, 1)

    def prelu(inp):
        return jnp.where(inp >= 0, inp, alpha * inp)

    out = prelu(bn(conv3x3(x, w1), g1, b1))
    out = bn(conv3x3(out, w2), g2, b2)
    out = out + x
    return prelu(out)


if __name__ == "__main__":
    N, C, H, W = 2, 4, 16, 16          # inplanes = planes = 4, stride = 1, downsample = None
    key = jax.random.PRNGKey(0)
    kx, k1, k2, kg1, kb1, kg2, kb2 = jax.random.split(key, 7)

    x = jax.random.normal(kx, (N, C, H, W), jnp.float32)
    w1 = 0.1 * jax.random.normal(k1, (C, C, 3, 3), jnp.float32)   # conv1.weight (OIHW)
    w2 = 0.1 * jax.random.normal(k2, (C, C, 3, 3), jnp.float32)   # conv2.weight (OIHW)
    g1 = 1.0 + 0.1 * jax.random.normal(kg1, (C,), jnp.float32)    # bn1.weight
    b1 = 0.1 * jax.random.normal(kb1, (C,), jnp.float32)          # bn1.bias
    g2 = 1.0 + 0.1 * jax.random.normal(kg2, (C,), jnp.float32)    # bn2.weight
    b2 = 0.1 * jax.random.normal(kb2, (C,), jnp.float32)          # bn2.bias
    alpha = jnp.array(0.25, jnp.float32)                          # PReLU default init

    out = basic_block_forward(x, w1, g1, b1, w2, g2, b2, alpha)
    out = jax.block_until_ready(out)

    ref = _ref_forward(x, w1, g1, b1, w2, g2, b2, alpha)
    assert out.shape == (N, C, H, W)
    # bf16 MXU operands -> tolerance appropriate for bf16 quantization of conv inputs/weights.
    assert jnp.allclose(out, ref, rtol=3e-2, atol=3e-2), \
        f"max err {jnp.max(jnp.abs(out - ref))}"

    print("KERNEL_OK")
</pallas_src>

<mosaic_0001>
module attributes {stable_mosaic.version = 11 : i64} {
  func.func @_affine_prelu_conv3x3_kernel(%arg0: i32, %arg1: memref<1x256x128xf32, #tpu.memory_space<vmem>>, %arg2: memref<3x128xf32, #tpu.memory_space<vmem>>, %arg3: memref<9x128x128xbf16, #tpu.memory_space<vmem>>, %arg4: memref<1x256x128xf32, #tpu.memory_space<vmem>>, %arg5: memref<1x2x128xf32, #tpu.memory_space<vmem>>, %arg6: memref<18x18x128xbf16, #tpu.memory_space<vmem>>) attributes {dimension_semantics = [#tpu.dimension_semantics<parallel>], iteration_bounds = array<i64: 2>, scalar_prefetch = 0 : i64, scratch_operands = 1 : i64, tpu.core_type = #tpu.core_type<tc>, window_params = [{transform_indices = @transform_0, window_bounds = array<i64: 1, 256, 128>}, {pipeline_mode = #tpu.pipeline_mode<synchronous>, transform_indices = @transform_1, window_bounds = array<i64: 3, 128>}, {pipeline_mode = #tpu.pipeline_mode<synchronous>, transform_indices = @transform_2, window_bounds = array<i64: 9, 128, 128>}, {transform_indices = @transform_3, window_bounds = array<i64: 1, 256, 128>}, {transform_indices = @transform_4, window_bounds = array<i64: 1, 2, 128>}]} {
    %c0 = arith.constant 0 : index
    %c0_0 = arith.constant 0 : index
    %0 = vector.load %arg2[%c0, %c0_0] : memref<3x128xf32, #tpu.memory_space<vmem>>, vector<1x128xf32>
    %c1 = arith.constant 1 : index
    %c0_1 = arith.constant 0 : index
    %1 = vector.load %arg2[%c1, %c0_1] : memref<3x128xf32, #tpu.memory_space<vmem>>, vector<1x128xf32>
    %c2 = arith.constant 2 : index
    %c0_2 = arith.constant 0 : index
    %2 = vector.load %arg2[%c2, %c0_2] : memref<3x128xf32, #tpu.memory_space<vmem>>, vector<1x128xf32>
    %c0_3 = arith.constant 0 : index
    %c0_4 = arith.constant 0 : index
    %c0_5 = arith.constant 0 : index
    %3 = vector.load %arg1[%c0_3, %c0_4, %c0_5] : memref<1x256x128xf32, #tpu.memory_space<vmem>>, vector<1x256x128xf32>
    %4 = vector.shape_cast %3 : vector<1x256x128xf32> to vector<256x128xf32>
    %5 = vector.broadcast %0 : vector<1x128xf32> to vector<256x128xf32>
    %6 = arith.mulf %4, %5 : vector<256x128xf32>
    %7 = vector.broadcast %1 : vector<1x128xf32> to vector<256x128xf32>
    %8 = arith.addf %6, %7 : vector<256x128xf32>
    %cst = arith.constant 0.000000e+00 : f32
    %9 = vector.broadcast %cst : f32 to vector<256x128xf32>
    %10 = arith.cmpf oge, %8, %9 : vector<256x128xf32>
    %11 = vector.broadcast %2 : vector<1x128xf32> to vector<256x128xf32>
    %12 = arith.mulf %11, %8 : vector<256x128xf32>
    %13 = arith.select %10, %8, %12 : vector<256x128xi1>, vector<256x128xf32>
    %cst_6 = arith.constant 0.000000e+00 : bf16
    %14 = vector.broadcast %cst_6 : bf16 to vector<1x18x128xbf16>
    %cst_7 = arith.constant 0.000000e+00 : bf16
    %15 = vector.broadcast %cst_7 : bf16 to vector<18x1x128xbf16>
    %c0_8 = arith.constant 0 : index
    %c0_9 = arith.constant 0 : index
    %c0_10 = arith.constant 0 : index
    %16 = vector.load %arg6[%c0_8, %c0_9, %c0_10] : memref<18x18x128xbf16, #tpu.memory_space<vmem>>, vector<1x18x128xbf16>
    tpu.vector_store %arg6[%c0_8, %c0_9, %c0_10], %14 {strides = array<i32>} : memref<18x18x128xbf16, #tpu.memory_space<vmem>>, vector<1x18x128xbf16>,
    %c17 = arith.constant 17 : index
    %c0_11 = arith.constant 0 : index
    %c0_12 = arith.constant 0 : index
    %17 = vector.load %arg6[%c17, %c0_11, %c0_12] : memref<18x18x128xbf16, #tpu.memory_space<vmem>>, vector<1x18x128xbf16>
    tpu.vector_store %arg6[%c17, %c0_11, %c0_12], %14 {strides = array<i32>} : memref<18x18x128xbf16, #tpu.memory_space<vmem>>, vector<1x18x128xbf16>,
    %c0_13 = arith.constant 0 : index
    %c0_14 = arith.constant 0 : index
    %c0_15 = arith.constant 0 : index
    %18 = vector.load %arg6[%c0_13, %c0_14, %c0_15] : memref<18x18x128xbf16, #tpu.memory_space<vmem>>, vector<18x1x128xbf16>
    tpu.vector_store %arg6[%c0_13, %c0_14, %c0_15], %15 {strides = array<i32>} : memref<18x18x128xbf16, #tpu.memory_space<vmem>>, vector<18x1x128xbf16>,
    %c0_16 = arith.constant 0 : index
    %c17_17 = arith.constant 17 : index
    %c0_18 = arith.constant 0 : index
    %19 = vector.load %arg6[%c0_16, %c17_17, %c0_18] : memref<18x18x128xbf16, #tpu.memory_space<vmem>>, vector<18x1x128xbf16>
    tpu.vector_store %arg6[%c0_16, %c17_17, %c0_18], %15 {strides = array<i32>} : memref<18x18x128xbf16, #tpu.memory_space<vmem>>, vector<18x1x128xbf16>,
    %20 = vector.shape_cast %13 : vector<256x128xf32> to vector<16x16x128xf32>
    %21 = arith.truncf %20 : vector<16x16x128xf32> to vector<16x16x128xbf16>
    %c1_19 = arith.constant 1 : index
    %c1_20 = arith.constant 1 : index
    %c0_21 = arith.constant 0 : index
    %22 = vector.load %arg6[%c1_19, %c1_20, %c0_21] : memref<18x18x128xbf16, #tpu.memory_space<vmem>>, vector<16x16x128xbf16>
    tpu.vector_store %arg6[%c1_19, %c1_20, %c0_21], %21 {strides = array<i32>} : memref<18x18x128xbf16, #tpu.memory_space<vmem>>, vector<16x16x128xbf16>,
    %cst_22 = arith.constant 0.000000e+00 : f32
    %23 = vector.broadcast %cst_22 : f32 to vector<256x128xf32>
    %c0_23 = arith.constant 0 : index
    %c0_24 = arith.constant 0 : index
    %c0_25 = arith.constant 0 : index
    %24 = vector.load %arg6[%c0_23, %c0_24, %c0_25] : memref<18x18x128xbf16, #tpu.memory_space<vmem>>, vector<16x16x128xbf16>
    %25 = vector.shape_cast %24 : vector<16x16x128xbf16> to vector<256x128xbf16>
    %c0_26 = arith.constant 0 : index
    %c0_27 = arith.constant 0 : index
    %c0_28 = arith.constant 0 : index
    %26 = vector.load %arg3[%c0_26, %c0_27, %c0_28] : memref<9x128x128xbf16, #tpu.memory_space<vmem>>, vector<1x128x128xbf16>
    %27 = vector.shape_cast %26 : vector<1x128x128xbf16> to vector<128x128xbf16>
    %cst_29 = arith.constant dense<0.000000e+00> : vector<256x128xf32>
    %28 = tpu.matmul %25, %27, %cst_29 {dimension_numbers = #tpu.dot_dimension_numbers<[1], [0], [0], [1], [0, 0, 1, 1], [], []>} : vector<256x128xbf16>, vector<128x128xbf16>, vector<256x128xf32> -> vector<256x128xf32>
    %29 = arith.addf %23, %28 : vector<256x128xf32>
    %c0_30 = arith.constant 0 : index
    %c1_31 = arith.constant 1 : index
    %c0_32 = arith.constant 0 : index
    %30 = vector.load %arg6[%c0_30, %c1_31, %c0_32] : memref<18x18x128xbf16, #tpu.memory_space<vmem>>, vector<16x16x128xbf16>
    %31 = vector.shape_cast %30 : vector<16x16x128xbf16> to vector<256x128xbf16>
    %c1_33 = arith.constant 1 : index
    %c0_34 = arith.constant 0 : index
    %c0_35 = arith.constant 0 : index
    %32 = vector.load %arg3[%c1_33, %c0_34, %c0_35] : memref<9x128x128xbf16, #tpu.memory_space<vmem>>, vector<1x128x128xbf16>
    %33 = vector.shape_cast %32 : vector<1x128x128xbf16> to vector<128x128xbf16>
    %cst_36 = arith.constant dense<0.000000e+00> : vector<256x128xf32>
    %34 = tpu.matmul %31, %33, %cst_36 {dimension_numbers = #tpu.dot_dimension_numbers<[1], [0], [0], [1], [0, 0, 1, 1], [], []>} : vector<256x128xbf16>, vector<128x128xbf16>, vector<256x128xf32> -> vector<256x128xf32>
    %35 = arith.addf %29, %34 : vector<256x128xf32>
    %c0_37 = arith.constant 0 : index
    %c2_38 = arith.constant 2 : index
    %c0_39 = arith.constant 0 : index
    %36 = vector.load %arg6[%c0_37, %c2_38, %c0_39] : memref<18x18x128xbf16, #tpu.memory_space<vmem>>, vector<16x16x128xbf16>
    %37 = vector.shape_cast %36 : vector<16x16x128xbf16> to vector<256x128xbf16>
    %c2_40 = arith.constant 2 : index
    %c0_41 = arith.constant 0 : index
    %c0_42 = arith.constant 0 : index
    %38 = vector.load %arg3[%c2_40, %c0_41, %c0_42] : memref<9x128x128xbf16, #tpu.memory_space<vmem>>, vector<1x128x128xbf16>
    %39 = vector.shape_cast %38 : vector<1x128x128xbf16> to vector<128x128xbf16>
    %cst_43 = arith.constant dense<0.000000e+00> : vector<256x128xf32>
    %40 = tpu.matmul %37, %39, %cst_43 {dimension_numbers = #tpu.dot_dimension_numbers<[1], [0], [0], [1], [0, 0, 1, 1], [], []>} : vector<256x128xbf16>, vector<128x128xbf16>, vector<256x128xf32> -> vector<256x128xf32>
    %41 = arith.addf %35, %40 : vector<256x128xf32>
    %c1_44 = arith.constant 1 : index
    %c0_45 = arith.constant 0 : index
    %c0_46 = arith.constant 0 : index
    %42 = vector.load %arg6[%c1_44, %c0_45, %c0_46] : memref<18x18x128xbf16, #tpu.memory_space<vmem>>, vector<16x16x128xbf16>
    %43 = vector.shape_cast %42 : vector<16x16x128xbf16> to vector<256x128xbf16>
    %c3 = arith.constant 3 : index
    %c0_47 = arith.constant 0 : index
    %c0_48 = arith.constant 0 : index
    %44 = vector.load %arg3[%c3, %c0_47, %c0_48] : memref<9x128x128xbf16, #tpu.memory_space<vmem>>, vector<1x128x128xbf16>
    %45 = vector.shape_cast %44 : vector<1x128x128xbf16> to vector<128x128xbf16>
    %cst_49 = arith.constant dense<0.000000e+00> : vector<256x128xf32>
    %46 = tpu.matmul %43, %45, %cst_49 {dimension_numbers = #tpu.dot_dimension_numbers<[1], [0], [0], [1], [0, 0, 1, 1], [], []>} : vector<256x128xbf16>, vector<128x128xbf16>, vector<256x128xf32> -> vector<256x128xf32>
    %47 = arith.addf %41, %46 : vector<256x128xf32>
    %c1_50 = arith.constant 1 : index
    %c1_51 = arith.constant 1 : index
    %c0_52 = arith.constant 0 : index
    %48 = vector.load %arg6[%c1_50, %c1_51, %c0_52] : memref<18x18x128xbf16, #tpu.memory_space<vmem>>, vector<16x16x128xbf16>
    %49 = vector.shape_cast %48 : vector<16x16x128xbf16> to vector<256x128xbf16>
    %c4 = arith.constant 4 : index
    %c0_53 = arith.constant 0 : index
    %c0_54 = arith.constant 0 : index
    %50 = vector.load %arg3[%c4, %c0_53, %c0_54] : memref<9x128x128xbf16, #tpu.memory_space<vmem>>, vector<1x128x128xbf16>
    %51 = vector.shape_cast %50 : vector<1x128x128xbf16> to vector<128x128xbf16>
    %cst_55 = arith.constant dense<0.000000e+00> : vector<256x128xf32>
    %52 = tpu.matmul %49, %51, %cst_55 {dimension_numbers = #tpu.dot_dimension_numbers<[1], [0], [0], [1], [0, 0, 1, 1], [], []>} : vector<256x128xbf16>, vector<128x128xbf16>, vector<256x128xf32> -> vector<256x128xf32>
    %53 = arith.addf %47, %52 : vector<256x128xf32>
    %c1_56 = arith.constant 1 : index
    %c2_57 = arith.constant 2 : index
    %c0_58 = arith.constant 0 : index
    %54 = vector.load %arg6[%c1_56, %c2_57, %c0_58] : memref<18x18x128xbf16, #tpu.memory_space<vmem>>, vector<16x16x128xbf16>
    %55 = vector.shape_cast %54 : vector<16x16x128xbf16> to vector<256x128xbf16>
    %c5 = arith.constant 5 : index
    %c0_59 = arith.constant 0 : index
    %c0_60 = arith.constant 0 : index
    %56 = vector.load %arg3[%c5, %c0_59, %c0_60] : memref<9x128x128xbf16, #tpu.memory_space<vmem>>, vector<1x128x128xbf16>
    %57 = vector.shape_cast %56 : vector<1x128x128xbf16> to vector<128x128xbf16>
    %cst_61 = arith.constant dense<0.000000e+00> : vector<256x128xf32>
    %58 = tpu.matmul %55, %57, %cst_61 {dimension_numbers = #tpu.dot_dimension_numbers<[1], [0], [0], [1], [0, 0, 1, 1], [], []>} : vector<256x128xbf16>, vector<128x128xbf16>, vector<256x128xf32> -> vector<256x128xf32>
    %59 = arith.addf %53, %58 : vector<256x128xf32>
    %c2_62 = arith.constant 2 : index
    %c0_63 = arith.constant 0 : index
    %c0_64 = arith.constant 0 : index
    %60 = vector.load %arg6[%c2_62, %c0_63, %c0_64] : memref<18x18x128xbf16, #tpu.memory_space<vmem>>, vector<16x16x128xbf16>
    %61 = vector.shape_cast %60 : vector<16x16x128xbf16> to vector<256x128xbf16>
    %c6 = arith.constant 6 : index
    %c0_65 = arith.constant 0 : index
    %c0_66 = arith.constant 0 : index
    %62 = vector.load %arg3[%c6, %c0_65, %c0_66] : memref<9x128x128xbf16, #tpu.memory_space<vmem>>, vector<1x128x128xbf16>
    %63 = vector.shape_cast %62 : vector<1x128x128xbf16> to vector<128x128xbf16>
    %cst_67 = arith.constant dense<0.000000e+00> : vector<256x128xf32>
    %64 = tpu.matmul %61, %63, %cst_67 {dimension_numbers = #tpu.dot_dimension_numbers<[1], [0], [0], [1], [0, 0, 1, 1], [], []>} : vector<256x128xbf16>, vector<128x128xbf16>, vector<256x128xf32> -> vector<256x128xf32>
    %65 = arith.addf %59, %64 : vector<256x128xf32>
    %c2_68 = arith.constant 2 : index
    %c1_69 = arith.constant 1 : index
    %c0_70 = arith.constant 0 : index
    %66 = vector.load %arg6[%c2_68, %c1_69, %c0_70] : memref<18x18x128xbf16, #tpu.memory_space<vmem>>, vector<16x16x128xbf16>
    %67 = vector.shape_cast %66 : vector<16x16x128xbf16> to vector<256x128xbf16>
    %c7 = arith.constant 7 : index
    %c0_71 = arith.constant 0 : index
    %c0_72 = arith.constant 0 : index
    %68 = vector.load %arg3[%c7, %c0_71, %c0_72] : memref<9x128x128xbf16, #tpu.memory_space<vmem>>, vector<1x128x128xbf16>
    %69 = vector.shape_cast %68 : vector<1x128x128xbf16> to vector<128x128xbf16>
    %cst_73 = arith.constant dense<0.000000e+00> : vector<256x128xf32>
    %70 = tpu.matmul %67, %69, %cst_73 {dimension_numbers = #tpu.dot_dimension_numbers<[1], [0], [0], [1], [0, 0, 1, 1], [], []>} : vector<256x128xbf16>, vector<128x128xbf16>, vector<256x128xf32> -> vector<256x128xf32>
    %71 = arith.addf %65, %70 : vector<256x128xf32>
    %c2_74 = arith.constant 2 : index
    %c2_75 = arith.constant 2 : index
    %c0_76 = arith.constant 0 : index
    %72 = vector.load %arg6[%c2_74, %c2_75, %c0_76] : memref<18x18x128xbf16, #tpu.memory_space<vmem>>, vector<16x16x128xbf16>
    %73 = vector.shape_cast %72 : vector<16x16x128xbf16> to vector<256x128xbf16>
    %c8 = arith.constant 8 : index
    %c0_77 = arith.constant 0 : index
    %c0_78 = arith.constant 0 : index
    %74 = vector.load %arg3[%c8, %c0_77, %c0_78] : memref<9x128x128xbf16, #tpu.memory_space<vmem>>, vector<1x128x128xbf16>
    %75 = vector.shape_cast %74 : vector<1x128x128xbf16> to vector<128x128xbf16>
    %cst_79 = arith.constant dense<0.000000e+00> : vector<256x128xf32>
    %76 = tpu.matmul %73, %75, %cst_79 {dimension_numbers = #tpu.dot_dimension_numbers<[1], [0], [0], [1], [0, 0, 1, 1], [], []>} : vector<256x128xbf16>, vector<128x128xbf16>, vector<256x128xf32> -> vector<256x128xf32>
    %77 = arith.addf %71, %76 : vector<256x128xf32>
    %c0_80 = arith.constant 0 : index
    %c0_81 = arith.constant 0 : index
    %c0_82 = arith.constant 0 : index
    %78 = vector.load %arg4[%c0_80, %c0_81, %c0_82] : memref<1x256x128xf32, #tpu.memory_space<vmem>>, vector<1x256x128xf32>
    %79 = vector.shape_cast %78 : vector<1x256x128xf32> to vector<256x128xf32>
    %80 = vector.shape_cast %77 : vector<256x128xf32> to vector<1x256x128xf32>
    tpu.vector_store %arg4[%c0_80, %c0_81, %c0_82], %80 {strides = array<i32>} : memref<1x256x128xf32, #tpu.memory_space<vmem>>, vector<1x256x128xf32>,
    %cst_83 = arith.constant dense<0.000000e+00> : vector<128xf32>
    %81 = vector.multi_reduction <add>, %77, %cst_83 [0] : vector<256x128xf32> to vector<128xf32>
    %82 = vector.shape_cast %81 : vector<128xf32> to vector<1x128xf32>
    %83 = arith.mulf %77, %77 : vector<256x128xf32>
    %cst_84 = arith.constant dense<0.000000e+00> : vector<128xf32>
    %84 = vector.multi_reduction <add>, %83, %cst_84 [0] : vector<256x128xf32> to vector<128xf32>
    %85 = vector.shape_cast %84 : vector<128xf32> to vector<1x128xf32>
    %86 = tpu.concatenate %82, %85 in 0 : vector<1x128xf32>, vector<1x128xf32> -> vector<2x128xf32>
    %c0_85 = arith.constant 0 : index
    %c0_86 = arith.constant 0 : index
    %c0_87 = arith.constant 0 : index
    %87 = vector.load %arg5[%c0_85, %c0_86, %c0_87] : memref<1x2x128xf32, #tpu.memory_space<vmem>>, vector<1x2x128xf32>
    %88 = vector.shape_cast %87 : vector<1x2x128xf32> to vector<2x128xf32>
    %89 = vector.shape_cast %86 : vector<2x128xf32> to vector<1x2x128xf32>
    tpu.vector_store %arg5[%c0_85, %c0_86, %c0_87], %89 {strides = array<i32>} : memref<1x2x128xf32, #tpu.memory_space<vmem>>, vector<1x2x128xf32>,
    return
  }
  func.func @transform_0(%arg0: i32) -> (i32, i32, i32) {
    %c0_i32 = arith.constant 0 : i32
    %c0_i32_0 = arith.constant 0 : i32
    %c0_i32_1 = arith.constant 0 : i32
    return %arg0, %c0_i32, %c0_i32_0 : i32, i32, i32
  }
  func.func @transform_1(%arg0: i32) -> (i32, i32) {
    %c0_i32 = arith.constant 0 : i32
    %c0_i32_0 = arith.constant 0 : i32
    %c0_i32_1 = arith.constant 0 : i32
    return %c0_i32, %c0_i32_0 : i32, i32
  }
  func.func @transform_2(%arg0: i32) -> (i32, i32, i32) {
    %c0_i32 = arith.constant 0 : i32
    %c0_i32_0 = arith.constant 0 : i32
    %c0_i32_1 = arith.constant 0 : i32
    %c0_i32_2 = arith.constant 0 : i32
    return %c0_i32, %c0_i32_0, %c0_i32_1 : i32, i32, i32
  }
  func.func @transform_3(%arg0: i32) -> (i32, i32, i32) {
    %c0_i32 = arith.constant 0 : i32
    %c0_i32_0 = arith.constant 0 : i32
    %c0_i32_1 = arith.constant 0 : i32
    return %arg0, %c0_i32, %c0_i32_0 : i32, i32, i32
  }
  func.func @transform_4(%arg0: i32) -> (i32, i32, i32) {
    %c0_i32 = arith.constant 0 : i32
    %c0_i32_0 = arith.constant 0 : i32
    %c0_i32_1 = arith.constant 0 : i32
    return %arg0, %c0_i32, %c0_i32_0 : i32, i32, i32
  }
}

module attributes {stable_mosaic.version = 11 : i64} {
  func.func @_bn_residual_prelu_kernel(%arg0: i32, %arg1: memref<1x256x128xf32, #tpu.memory_space<vmem>>, %arg2: memref<1x256x128xf32, #tpu.memory_space<vmem>>, %arg3: memref<3x128xf32, #tpu.memory_space<vmem>>, %arg4: memref<1x256x128xf32, #tpu.memory_space<vmem>>) attributes {dimension_semantics = [#tpu.dimension_semantics<parallel>], iteration_bounds = array<i64: 2>, scalar_prefetch = 0 : i64, scratch_operands = 0 : i64, tpu.core_type = #tpu.core_type<tc>, window_params = [{transform_indices = @transform_0, window_bounds = array<i64: 1, 256, 128>}, {transform_indices = @transform_1, window_bounds = array<i64: 1, 256, 128>}, {pipeline_mode = #tpu.pipeline_mode<synchronous>, transform_indices = @transform_2, window_bounds = array<i64: 3, 128>}, {transform_indices = @transform_3, window_bounds = array<i64: 1, 256, 128>}]} {
    %c0 = arith.constant 0 : index
    %c0_0 = arith.constant 0 : index
    %0 = vector.load %arg3[%c0, %c0_0] : memref<3x128xf32, #tpu.memory_space<vmem>>, vector<1x128xf32>
    %c1 = arith.constant 1 : index
    %c0_1 = arith.constant 0 : index
    %1 = vector.load %arg3[%c1, %c0_1] : memref<3x128xf32, #tpu.memory_space<vmem>>, vector<1x128xf32>
    %c2 = arith.constant 2 : index
    %c0_2 = arith.constant 0 : index
    %2 = vector.load %arg3[%c2, %c0_2] : memref<3x128xf32, #tpu.memory_space<vmem>>, vector<1x128xf32>
    %c0_3 = arith.constant 0 : index
    %c0_4 = arith.constant 0 : index
    %c0_5 = arith.constant 0 : index
    %3 = vector.load %arg1[%c0_3, %c0_4, %c0_5] : memref<1x256x128xf32, #tpu.memory_space<vmem>>, vector<1x256x128xf32>
    %4 = vector.shape_cast %3 : vector<1x256x128xf32> to vector<256x128xf32>
    %5 = vector.broadcast %0 : vector<1x128xf32> to vector<256x128xf32>
    %6 = arith.mulf %4, %5 : vector<256x128xf32>
    %7 = vector.broadcast %1 : vector<1x128xf32> to vector<256x128xf32>
    %8 = arith.addf %6, %7 : vector<256x128xf32>
    %c0_6 = arith.constant 0 : index
    %c0_7 = arith.constant 0 : index
    %c0_8 = arith.constant 0 : index
    %9 = vector.load %arg2[%c0_6, %c0_7, %c0_8] : memref<1x256x128xf32, #tpu.memory_space<vmem>>, vector<1x256x128xf32>
    %10 = vector.shape_cast %9 : vector<1x256x128xf32> to vector<256x128xf32>
    %11 = arith.addf %8, %10 : vector<256x128xf32>
    %cst = arith.constant 0.000000e+00 : f32
    %12 = vector.broadcast %cst : f32 to vector<256x128xf32>
    %13 = arith.cmpf oge, %11, %12 : vector<256x128xf32>
    %14 = vector.broadcast %2 : vector<1x128xf32> to vector<256x128xf32>
    %15 = arith.mulf %14, %11 : vector<256x128xf32>
    %16 = arith.select %13, %11, %15 : vector<256x128xi1>, vector<256x128xf32>
    %c0_9 = arith.constant 0 : index
    %c0_10 = arith.constant 0 : index
    %c0_11 = arith.constant 0 : index
    %17 = vector.load %arg4[%c0_9, %c0_10, %c0_11] : memref<1x256x128xf32, #tpu.memory_space<vmem>>, vector<1x256x128xf32>
    %18 = vector.shape_cast %17 : vector<1x256x128xf32> to vector<256x128xf32>
    %19 = vector.shape_cast %16 : vector<256x128xf32> to vector<1x256x128xf32>
    tpu.vector_store %arg4[%c0_9, %c0_10, %c0_11], %19 {strides = array<i32>} : memref<1x256x128xf32, #tpu.memory_space<vmem>>, vector<1x256x128xf32>,
    return
  }
  func.func @transform_0(%arg0: i32) -> (i32, i32, i32) {
    %c0_i32 = arith.constant 0 : i32
    %c0_i32_0 = arith.constant 0 : i32
    %c0_i32_1 = arith.constant 0 : i32
    return %arg0, %c0_i32, %c0_i32_0 : i32, i32, i32
  }
  func.func @transform_1(%arg0: i32) -> (i32, i32, i32) {
    %c0_i32 = arith.constant 0 : i32
    %c0_i32_0 = arith.constant 0 : i32
    %c0_i32_1 = arith.constant 0 : i32
    return %arg0, %c0_i32, %c0_i32_0 : i32, i32, i32
  }
  func.func @transform_2(%arg0: i32) -> (i32, i32) {
    %c0_i32 = arith.constant 0 : i32
    %c0_i32_0 = arith.constant 0 : i32
    %c0_i32_1 = arith.constant 0 : i32
    return %c0_i32, %c0_i32_0 : i32, i32
  }
  func.func @transform_3(%arg0: i32) -> (i32, i32, i32) {
    %c0_i32 = arith.constant 0 : i32
    %c0_i32_0 = arith.constant 0 : i32
    %c0_i32_1 = arith.constant 0 : i32
    return %arg0, %c0_i32, %c0_i32_0 : i32, i32, i32
  }
}

</mosaic_0001>

<bundles_post_ra>
// kernel: basic_block_forward.5
= control target key start
LH: loop header
LB: loop body
LE: loop exit
PB: predicated region body
PF: predicated region fallthrough
CT: control target
= control target key end

     0   :  { %s616_s12 = smov 0   ;;  %s857_s0 = inlined_call_operand.vmem [shape: f32[2,256,128], index: 0, kind: input, shape index: {}]   ;;  %s858_s1 = inlined_call_operand.vmem [shape: f32[2,256,128], index: 1, kind: input, shape index: {}]   ;;  %s859_s2 = inlined_call_operand.vmem [shape: f32[3,128], index: 2, kind: input, shape index: {}]   ;;  %s860_s3 = inlined_call_operand.vmem [shape: f32[2,256,128], index: 3, kind: output, shape index: {}]  }
   0x1 LB: > { %s561_s13 = sadd.s32 4294967295, %s594_s12   ;;  %p565_p0 = scmp.ge.s32.totalorder %s594_s12, 1  ;;  %s594_s12 = sphi %s616_s12, %s13_s12  }
   0x2   : > { %p147_p1 = scmp.lt.s32.totalorder %s594_s12, 3 }
   0x4   : > { %p148_p2 = pnand %p565_p0, %p147_p1 }
   0x5   : > { %p176_p3 = scmp.lt.s32.totalorder (!%p148_p2), %s561_s13, 1  ;;  %v629_v0 = vld [vmem:[%s859_s2] ss:$0 sm:$0xff] (!%p148_p2)  ;;  %v646_v1 = vld [vmem:[%s859_s2 + $0x1] ss:$0 sm:$0xff] (!%p148_p2) }
   0x6   : > { %151 = sbr.rel (%p148_p2) target bundleno = 72 (0x48), region = 32  ;;  %v667_v18 = vld [vmem:[%s859_s2 + $0x2] ss:$0 sm:$0xff] (!%p148_p2) }
   0xd   : > { %s862_s13 = smov (!%p176_p3, %s561_s13), 1 }
   0xe   : > { %s624_s14 = sshll.u32 %s862_s13, 8 }
   0xf   : > { %s635_s19 = scalar_lea.vmem %s857_s0, %s624_s14  ;;  %s641_s22 = scalar_lea.vmem %s858_s1, %s624_s14 }
  0x10   : > { %v194_v2 = vld [vmem:[%s635_s19] sm:$0xff]  ;;  %v195_v3 = vld [vmem:[%s635_s19 + $0x8] sm:$0xff]  ;;  %v196_v7 = vld [vmem:[%s635_s19 + $0x10] sm:$0xff]  ;;  %s685_s29 = scalar_lea.vmem %s860_s3, %s624_s14 }
  0x11   : > { %v230_v4 = vmul.f32 %v629_v0, %v194_v2  ;;  %v298_v5 = vld [vmem:[%s641_s22] sm:$0xff]  ;;  %v231_v6 = vmul.f32 %v629_v0, %v195_v3  ;;  %v299_v8 = vld [vmem:[%s641_s22 + $0x8] sm:$0xff]  ;;  %v232_v9 = vmul.f32 %v629_v0, %v196_v7  ;;  %v197_v10 = vld [vmem:[%s635_s19 + $0x18] sm:$0xff] }
  0x12   : > { %v198_v11 = vld [vmem:[%s635_s19 + $0x20] sm:$0xff]  ;;  %v300_v14 = vld [vmem:[%s641_s22 + $0x10] sm:$0xff]  ;;  %v233_v15 = vmul.f32 %v629_v0, %v197_v10  ;;  %v199_v17 = vld [vmem:[%s635_s19 + $0x28] sm:$0xff] }
  0x13   : > { %v266_v12 = vadd.f32 %v646_v1, %v230_v4  ;;  %v267_v13 = vadd.f32 %v646_v1, %v231_v6  ;;  %v234_v16 = vmul.f32 %v629_v0, %v198_v11  ;;  %v268_v19 = vadd.f32 %v646_v1, %v232_v9  ;;  %v200_v21 = vld [vmem:[%s635_s19 + $0x30] sm:$0xff]  ;;  %v201_v22 = vld [vmem:[%s635_s19 + $0x38] sm:$0xff]  ;;  %v302_v28 = vld [vmem:[%s641_s22 + $0x20] sm:$0xff] }
  0x14   : > { %v235_v20 = vmul.f32 %v629_v0, %v199_v17  ;;  %v269_v25 = vadd.f32 %v646_v1, %v233_v15  ;;  %v301_v26 = vld [vmem:[%s641_s22 + $0x18] sm:$0xff]  ;;  %v303_v31 = vld [vmem:[%s641_s22 + $0x28] sm:$0xff]  ;;  %v236_v32 = vmul.f32 %v629_v0, %v200_v21  ;;  %v237_v33 = vmul.f32 %v629_v0, %v201_v22  ;;  %v304_v39 = vld [vmem:[%s641_s22 + $0x30] sm:$0xff] }
  0x15   : > { %v330_v23 = vadd.f32 %v298_v5, %v266_v12  ;;  %v331_v24 = vadd.f32 %v299_v8, %v267_v13  ;;  %v270_v27 = vadd.f32 %v646_v1, %v234_v16  ;;  %v332_v29 = vadd.f32 %v300_v14, %v268_v19  ;;  %v202_v44 = vld [vmem:[%s635_s19 + $0x40] sm:$0xff]  ;;  %v203_v45 = vld [vmem:[%s635_s19 + $0x48] sm:$0xff]  ;;  %v305_v51 = vld [vmem:[%s641_s22 + $0x38] sm:$0xff] }
  0x16   : > { %v271_v30 = vadd.f32 %v646_v1, %v235_v20  ;;  %v333_v37 = vadd.f32 %v301_v26, %v269_v25  ;;  %v272_v43 = vadd.f32 %v646_v1, %v236_v32  ;;  %v204_v52 = vld [vmem:[%s635_s19 + $0x50] sm:$0xff]  ;;  %v273_v54 = vadd.f32 %v646_v1, %v237_v33  ;;  %v205_v57 = vld [vmem:[%s635_s19 + $0x58] sm:$0xff]  ;;  %v206_v58 = vld [vmem:[%s635_s19 + $0x60] sm:$0xff] }
  0x17   : > { %vm362_vm0 = vcmp.ge.f32.partialorder %v330_v23, 0.0  ;;  %v398_v34 = vmul.f32 %v667_v18, %v330_v23  ;;  %vm363_vm1 = vcmp.ge.f32.partialorder %v331_v24, 0.0  ;;  %v399_v35 = vmul.f32 %v667_v18, %v331_v24  ;;  %v207_v59 = vld [vmem:[%s635_s19 + $0x68] sm:$0xff]  ;;  %v306_v63 = vld [vmem:[%s641_s22 + $0x40] sm:$0xff]  ;;  %v308_v14 = vld [vmem:[%s641_s22 + $0x50] sm:$0xff] }
  0x18   : > { %vm364_vm2 = vcmp.ge.f32.partialorder %v332_v29, 0.0  ;;  %v400_v36 = vmul.f32 %v667_v18, %v332_v29  ;;  %v334_v38 = vadd.f32 %v302_v28, %v270_v27  ;;  %v335_v42 = vadd.f32 %v303_v31, %v271_v30  ;;  %v307_v2 = vld [vmem:[%s641_s22 + $0x48] sm:$0xff]  ;;  %v309_v15 = vld [vmem:[%s641_s22 + $0x58] sm:$0xff]  ;;  %v310_v16 = vld [vmem:[%s641_s22 + $0x60] sm:$0xff] }
  0x19   : > { %v430_v40 = vsel %vm362_vm0, %v330_v23, %v398_v34  ;;  %v431_v41 = vsel %vm363_vm1, %v331_v24, %v399_v35  ;;  %vm365_vm3 = vcmp.ge.f32.partialorder %v333_v37, 0.0  ;;  %v401_v47 = vmul.f32 %v667_v18, %v333_v37  ;;  %v311_v22 = vld [vmem:[%s641_s22 + $0x68] sm:$0xff]  ;;  %v208_v23 = vld [vmem:[%s635_s19 + $0x70] sm:$0xff]  ;;  %v209_v24 = vld [vmem:[%s635_s19 + $0x78] sm:$0xff] }
  0x1a   : > { %462 = vst [vmem:[%s685_s29] sm:$0xff] %v430_v40  ;;  %463 = vst [vmem:[%s685_s29 + $0x8] sm:$0xff] %v431_v41  ;;  %v432_v46 = vsel %vm364_vm2, %v332_v29, %v400_v36  ;;  %vm366_vm4 = vcmp.ge.f32.partialorder %v334_v38, 0.0  ;;  %v402_v48 = vmul.f32 %v667_v18, %v334_v38  ;;  %vm367_vm5 = vcmp.ge.f32.partialorder %v335_v42, 0.0  ;;  %v312_v41 = vld [vmem:[%s641_s22 + $0x70] sm:$0xff] }
  0x1b   : > { %464 = vst [vmem:[%s685_s29 + $0x10] sm:$0xff] %v432_v46  ;;  %v403_v49 = vmul.f32 %v667_v18, %v335_v42  ;;  %v336_v50 = vadd.f32 %v304_v39, %v272_v43  ;;  %v433_v53 = vsel %vm365_vm3, %v333_v37, %v401_v47  ;;  %v238_v55 = vmul.f32 %v629_v0, %v202_v44  ;;  %v210_v37 = vld [vmem:[%s635_s19 + $0x80] sm:$0xff]  ;;  %v212_v43 = vld [vmem:[%s635_s19 + $0x90] sm:$0xff] }
  0x1c   : > { %v239_v56 = vmul.f32 %v629_v0, %v203_v45  ;;  %465 = vst [vmem:[%s685_s29 + $0x18] sm:$0xff] %v433_v53  ;;  %v434_v60 = vsel %vm366_vm4, %v334_v38, %v402_v48  ;;  %v337_v3 = vadd.f32 %v305_v51, %v273_v54  ;;  %v240_v6 = vmul.f32 %v629_v0, %v204_v52  ;;  %v211_v38 = vld [vmem:[%s635_s19 + $0x88] sm:$0xff]  ;;  %v213_v48 = vld [vmem:[%s635_s19 + $0x98] sm:$0xff] }
  0x1d   : > { %v435_v61 = vsel %vm367_vm5, %v335_v42, %v403_v49  ;;  %vm368_vm6 = vcmp.ge.f32.partialorder %v336_v50, 0.0  ;;  %v404_v62 = vmul.f32 %v667_v18, %v336_v50  ;;  %466 = vst [vmem:[%s685_s29 + $0x20] sm:$0xff] %v434_v60  ;;  %v274_v4 = vadd.f32 %v646_v1, %v238_v55  ;;  %v313_v42 = vld [vmem:[%s641_s22 + $0x78] sm:$0xff]  ;;  %v214_v49 = vld [vmem:[%s635_s19 + $0xa0] sm:$0xff] }
  0x1e   : > { %467 = vst [vmem:[%s685_s29 + $0x28] sm:$0xff] %v435_v61  ;;  %v275_v5 = vadd.f32 %v646_v1, %v239_v56  ;;  %v241_v8 = vmul.f32 %v629_v0, %v205_v57  ;;  %v242_v9 = vmul.f32 %v629_v0, %v206_v58  ;;  %v243_v10 = vmul.f32 %v629_v0, %v207_v59  ;;  %v314_v57 = vld [vmem:[%s641_s22 + $0x80] sm:$0xff]  ;;  %v315_v58 = vld [vmem:[%s641_s22 + $0x88] sm:$0xff] }
  0x1f   : > { %v436_v7 = vsel %vm368_vm6, %v336_v50, %v404_v62  ;;  %vm369_vm7 = vcmp.ge.f32.partialorder %v337_v3, 0.0  ;;  %v405_v11 = vmul.f32 %v667_v18, %v337_v3  ;;  %v338_v12 = vadd.f32 %v306_v63, %v274_v4 }
  0x20   : > { %468 = vst [vmem:[%s685_s29 + $0x30] sm:$0xff] %v436_v7  ;;  %v339_v13 = vadd.f32 %v307_v2, %v275_v5  ;;  %v276_v17 = vadd.f32 %v646_v1, %v240_v6  ;;  %v277_v19 = vadd.f32 %v646_v1, %v241_v8  ;;  %v278_v20 = vadd.f32 %v646_v1, %v242_v9  ;;  %v215_v2 = vld [vmem:[%s635_s19 + $0xa8] sm:$0xff]  ;;  %v316_v8 = vld [vmem:[%s641_s22 + $0x90] sm:$0xff] }
  0x21   : > { %v279_v21 = vadd.f32 %v646_v1, %v243_v10  ;;  %v437_v25 = vsel %vm369_vm7, %v337_v3, %v405_v11  ;;  %vm370_vm8 = vcmp.ge.f32.partialorder %v338_v12, 0.0  ;;  %v406_v26 = vmul.f32 %v667_v18, %v338_v12  ;;  %v317_v10 = vld [vmem:[%s641_s22 + $0x98] sm:$0xff]  ;;  %v318_v11 = vld [vmem:[%s641_s22 + $0xa0] sm:$0xff] }
  0x22   : > { %vm371_vm9 = vcmp.ge.f32.partialorder %v339_v13, 0.0  ;;  %469 = vst [vmem:[%s685_s29 + $0x38] sm:$0xff] %v437_v25  ;;  %v407_v27 = vmul.f32 %v667_v18, %v339_v13  ;;  %v340_v28 = vadd.f32 %v308_v14, %v276_v17  ;;  %v341_v29 = vadd.f32 %v309_v15, %v277_v19  ;;  %v217_v17 = vld [vmem:[%s635_s19 + $0xb8] sm:$0xff]  ;;  %v319_v25 = vld [vmem:[%s641_s22 + $0xa8] sm:$0xff] }
  0x23   : > { %v342_v30 = vadd.f32 %v310_v16, %v278_v20  ;;  %v438_v31 = vsel %vm370_vm8, %v338_v12, %v406_v26  ;;  %v343_v32 = vadd.f32 %v311_v22, %v279_v21  ;;  %v244_v33 = vmul.f32 %v629_v0, %v208_v23  ;;  %v216_v16 = vld [vmem:[%s635_s19 + $0xb0] sm:$0xff] }
  0x24   : > { %v245_v34 = vmul.f32 %v629_v0, %v209_v24  ;;  %470 = vst [vmem:[%s685_s29 + $0x40] sm:$0xff] %v438_v31  ;;  %v439_v35 = vsel %vm371_vm9, %v339_v13, %v407_v27  ;;  %vm372_vm10 = vcmp.ge.f32.partialorder %v340_v28, 0.0  ;;  %v408_v36 = vmul.f32 %v667_v18, %v340_v28 }
  0x25   : > { %vm373_vm11 = vcmp.ge.f32.partialorder %v341_v29, 0.0  ;;  %471 = vst [vmem:[%s685_s29 + $0x48] sm:$0xff] %v439_v35  ;;  %v409_v39 = vmul.f32 %v667_v18, %v341_v29  ;;  %vm374_vm12 = vcmp.ge.f32.partialorder %v342_v30, 0.0  ;;  %v410_v40 = vmul.f32 %v667_v18, %v342_v30 }
  0x26   : > { %vm375_vm13 = vcmp.ge.f32.partialorder %v343_v32, 0.0  ;;  %v440_v44 = vsel %vm372_vm10, %v340_v28, %v408_v36  ;;  %v411_v45 = vmul.f32 %v667_v18, %v343_v32  ;;  %v280_v46 = vadd.f32 %v646_v1, %v244_v33  ;;  %v320_v33 = vld [vmem:[%s641_s22 + $0xb0] sm:$0xff] }
  0x27   : > { %v281_v47 = vadd.f32 %v646_v1, %v245_v34  ;;  %472 = vst [vmem:[%s685_s29 + $0x50] sm:$0xff] %v440_v44  ;;  %v441_v50 = vsel %vm373_vm11, %v341_v29, %v409_v39  ;;  %v442_v51 = vsel %vm374_vm12, %v342_v30, %v410_v40  ;;  %v246_v52 = vmul.f32 %v629_v0, %v210_v37  ;;  %v218_v30 = vld [vmem:[%s635_s19 + $0xc0] sm:$0xff]  ;;  %v321_v37 = vld [vmem:[%s641_s22 + $0xb8] sm:$0xff]  ;;  %v220_v39 = vld [vmem:[%s635_s19 + $0xd0] sm:$0xff] }
  0x28   : > { %v247_v53 = vmul.f32 %v629_v0, %v211_v38  ;;  %473 = vst [vmem:[%s685_s29 + $0x58] sm:$0xff] %v441_v50  ;;  %474 = vst [vmem:[%s685_s29 + $0x60] sm:$0xff] %v442_v51  ;;  %v443_v54 = vsel %vm375_vm13, %v343_v32, %v411_v45  ;;  %v344_v55 = vadd.f32 %v312_v41, %v280_v46  ;;  %v219_v38 = vld [vmem:[%s635_s19 + $0xc8] sm:$0xff]  ;;  %v221_v44 = vld [vmem:[%s635_s19 + $0xd8] sm:$0xff] }
  0x29   : > { %v345_v56 = vadd.f32 %v313_v42, %v281_v47  ;;  %v248_v59 = vmul.f32 %v629_v0, %v212_v43  ;;  %475 = vst [vmem:[%s685_s29 + $0x68] sm:$0xff] %v443_v54  ;;  %v282_v60 = vadd.f32 %v646_v1, %v246_v52  ;;  %v249_v62 = vmul.f32 %v629_v0, %v213_v48  ;;  %v322_v48 = vld [vmem:[%s641_s22 + $0xc0] sm:$0xff] }
  0x2a   : > { %v283_v61 = vadd.f32 %v646_v1, %v247_v53  ;;  %v250_v63 = vmul.f32 %v629_v0, %v214_v49  ;;  %vm376_vm14 = vcmp.ge.f32.partialorder %v344_v55, 0.0  ;;  %v412_v3 = vmul.f32 %v667_v18, %v344_v55  ;;  %v222_v53 = vld [vmem:[%s635_s19 + $0xe0] sm:$0xff] }
  0x2b   : > { %vm377_vm15 = vcmp.ge.f32.partialorder %v345_v56, 0.0  ;;  %v413_v4 = vmul.f32 %v667_v18, %v345_v56  ;;  %v346_v5 = vadd.f32 %v314_v57, %v282_v60  ;;  %v284_v7 = vadd.f32 %v646_v1, %v248_v59 }
  0x2c   : > { %v347_v6 = vadd.f32 %v315_v58, %v283_v61  ;;  %v285_v9 = vadd.f32 %v646_v1, %v249_v62  ;;  %v444_v12 = vsel %vm376_vm14, %v344_v55, %v412_v3  ;;  %v286_v14 = vadd.f32 %v646_v1, %v250_v63  ;;  %v324_v61 = vld [vmem:[%s641_s22 + $0xd0] sm:$0xff]  ;;  %v325_v62 = vld [vmem:[%s641_s22 + $0xd8] sm:$0xff]  ;;  %v223_v63 = vld [vmem:[%s635_s19 + $0xe8] sm:$0xff] }
  0x2d   : > { %v445_v13 = vsel %vm377_vm15, %v345_v56, %v413_v4  ;;  %v251_v15 = vmul.f32 %v629_v0, %v215_v2  ;;  %476 = vst [vmem:[%s685_s29 + $0x70] sm:$0xff] %v444_v12  ;;  %vm378_vm0 = vcmp.ge.f32.partialorder %v346_v5, 0.0  ;;  %v414_v19 = vmul.f32 %v667_v18, %v346_v5  ;;  %v323_v56 = vld [vmem:[%s641_s22 + $0xc8] sm:$0xff] }
  0x2e   : > { %477 = vst [vmem:[%s685_s29 + $0x78] sm:$0xff] %v445_v13  ;;  %vm379_vm1 = vcmp.ge.f32.partialorder %v347_v6, 0.0  ;;  %v415_v20 = vmul.f32 %v667_v18, %v347_v6  ;;  %v348_v21 = vadd.f32 %v316_v8, %v284_v7  ;;  %v349_v22 = vadd.f32 %v317_v10, %v285_v9  ;;  %v326_v13 = vld [vmem:[%s641_s22 + $0xe0] sm:$0xff] }
  0x2f   : > { %v350_v23 = vadd.f32 %v318_v11, %v286_v14  ;;  %v287_v24 = vadd.f32 %v646_v1, %v251_v15  ;;  %v446_v26 = vsel %vm378_vm0, %v346_v5, %v414_v19  ;;  %v252_v28 = vmul.f32 %v629_v0, %v216_v16  ;;  %v225_v19 = vld [vmem:[%s635_s19 + $0xf8] sm:$0xff] }
  0x30   : > { %v447_v27 = vsel %vm379_vm1, %v347_v6, %v415_v20  ;;  %v253_v29 = vmul.f32 %v629_v0, %v217_v17  ;;  %478 = vst [vmem:[%s685_s29 + $0x80] sm:$0xff] %v446_v26  ;;  %vm380_vm2 = vcmp.ge.f32.partialorder %v348_v21, 0.0  ;;  %v416_v31 = vmul.f32 %v667_v18, %v348_v21  ;;  %v224_v6 = vld [vmem:[%s635_s19 + $0xf0] sm:$0xff] }
  0x31   : > { %479 = vst [vmem:[%s685_s29 + $0x88] sm:$0xff] %v447_v27  ;;  %vm381_vm3 = vcmp.ge.f32.partialorder %v349_v22, 0.0  ;;  %v417_v32 = vmul.f32 %v667_v18, %v349_v22  ;;  %vm382_vm4 = vcmp.ge.f32.partialorder %v350_v23, 0.0  ;;  %v418_v34 = vmul.f32 %v667_v18, %v350_v23 }
  0x32   : > { %v351_v35 = vadd.f32 %v319_v25, %v287_v24  ;;  %v288_v36 = vadd.f32 %v646_v1, %v252_v28  ;;  %v448_v40 = vsel %vm380_vm2, %v348_v21, %v416_v31  ;;  %v289_v42 = vadd.f32 %v646_v1, %v253_v29 }
  0x33   : > { %v449_v41 = vsel %vm381_vm3, %v349_v22, %v417_v32  ;;  %v254_v43 = vmul.f32 %v629_v0, %v218_v30  ;;  %480 = vst [vmem:[%s685_s29 + $0x90] sm:$0xff] %v448_v40  ;;  %v450_v45 = vsel %vm382_vm4, %v350_v23, %v418_v34  ;;  %v255_v51 = vmul.f32 %v629_v0, %v219_v38  ;;  %v327_v22 = vld [vmem:[%s641_s22 + $0xe8] sm:$0xff]  ;;  %v328_v23 = vld [vmem:[%s641_s22 + $0xf0] sm:$0xff]  ;;  %v329_v34 = vld [vmem:[%s641_s22 + $0xf8] sm:$0xff] }
  0x34   : > { %481 = vst [vmem:[%s685_s29 + $0x98] sm:$0xff] %v449_v41  ;;  %vm383_vm5 = vcmp.ge.f32.partialorder %v351_v35, 0.0  ;;  %v419_v46 = vmul.f32 %v667_v18, %v351_v35  ;;  %v352_v47 = vadd.f32 %v320_v33, %v288_v36  ;;  %482 = vst [vmem:[%s685_s29 + $0xa0] sm:$0xff] %v450_v45  ;;  %v353_v49 = vadd.f32 %v321_v37, %v289_v42 }
  0x35   : > { %v290_v50 = vadd.f32 %v646_v1, %v254_v43  ;;  %v256_v52 = vmul.f32 %v629_v0, %v220_v39  ;;  %v257_v57 = vmul.f32 %v629_v0, %v221_v44  ;;  %v291_v60 = vadd.f32 %v646_v1, %v255_v51 }
  0x36   : > { %v451_v54 = vsel %vm383_vm5, %v351_v35, %v419_v46  ;;  %vm384_vm6 = vcmp.ge.f32.partialorder %v352_v47, 0.0  ;;  %v420_v55 = vmul.f32 %v667_v18, %v352_v47  ;;  %vm385_vm7 = vcmp.ge.f32.partialorder %v353_v49, 0.0 }
  0x37   : > { %483 = vst [vmem:[%s685_s29 + $0xa8] sm:$0xff] %v451_v54  ;;  %v421_v58 = vmul.f32 %v667_v18, %v353_v49  ;;  %v354_v59 = vadd.f32 %v322_v48, %v290_v50  ;;  %v292_v3 = vadd.f32 %v646_v1, %v256_v52  ;;  %v293_v4 = vadd.f32 %v646_v1, %v257_v57 }
  0x38   : > { %v452_v2 = vsel %vm384_vm6, %v352_v47, %v420_v55  ;;  %v258_v5 = vmul.f32 %v629_v0, %v222_v53  ;;  %v355_v9 = vadd.f32 %v323_v56, %v291_v60  ;;  %v259_v14 = vmul.f32 %v629_v0, %v223_v63 }
  0x39   : > { %484 = vst [vmem:[%s685_s29 + $0xb0] sm:$0xff] %v452_v2  ;;  %v453_v7 = vsel %vm385_vm7, %v353_v49, %v421_v58  ;;  %vm386_vm8 = vcmp.ge.f32.partialorder %v354_v59, 0.0  ;;  %v422_v8 = vmul.f32 %v667_v18, %v354_v59  ;;  %v356_v10 = vadd.f32 %v324_v61, %v292_v3 }
  0x3a   : > { %485 = vst [vmem:[%s685_s29 + $0xb8] sm:$0xff] %v453_v7  ;;  %v357_v11 = vadd.f32 %v325_v62, %v293_v4  ;;  %v294_v12 = vadd.f32 %v646_v1, %v258_v5  ;;  %vm387_vm9 = vcmp.ge.f32.partialorder %v355_v9, 0.0  ;;  %v423_v16 = vmul.f32 %v667_v18, %v355_v9 }
  0x3b   : > { %v454_v15 = vsel %vm386_vm8, %v354_v59, %v422_v8  ;;  %v260_v17 = vmul.f32 %v629_v0, %v224_v6  ;;  %vm388_vm10 = vcmp.ge.f32.partialorder %v356_v10, 0.0  ;;  %v424_v20 = vmul.f32 %v667_v18, %v356_v10 }
  0x3c   : > { %486 = vst [vmem:[%s685_s29 + $0xc0] sm:$0xff] %v454_v15  ;;  %vm389_vm11 = vcmp.ge.f32.partialorder %v357_v11, 0.0  ;;  %v425_v21 = vmul.f32 %v667_v18, %v357_v11  ;;  %v455_v24 = vsel %vm387_vm9, %v355_v9, %v423_v16  ;;  %v358_v25 = vadd.f32 %v326_v13, %v294_v12 }
  0x3d   : > { %v295_v26 = vadd.f32 %v646_v1, %v259_v14  ;;  %v296_v27 = vadd.f32 %v646_v1, %v260_v17  ;;  %487 = vst [vmem:[%s685_s29 + $0xc8] sm:$0xff] %v455_v24  ;;  %v456_v28 = vsel %vm388_vm10, %v356_v10, %v424_v20  ;;  %v261_v30 = vmul.f32 %v629_v0, %v225_v19 }
  0x3e   : > { %v457_v29 = vsel %vm389_vm11, %v357_v11, %v425_v21  ;;  %488 = vst [vmem:[%s685_s29 + $0xd0] sm:$0xff] %v456_v28  ;;  %vm390_vm12 = vcmp.ge.f32.partialorder %v358_v25, 0.0  ;;  %v426_v31 = vmul.f32 %v667_v18, %v358_v25 }
  0x3f   : > { %489 = vst [vmem:[%s685_s29 + $0xd8] sm:$0xff] %v457_v29  ;;  %v359_v32 = vadd.f32 %v327_v22, %v295_v26  ;;  %v360_v33 = vadd.f32 %v328_v23, %v296_v27  ;;  %v297_v35 = vadd.f32 %v646_v1, %v261_v30 }
  0x40   : > { %v458_v36 = vsel %vm390_vm12, %v358_v25, %v426_v31 }
  0x41   : > { %vm391_vm13 = vcmp.ge.f32.partialorder %v359_v32, 0.0  ;;  %v427_v37 = vmul.f32 %v667_v18, %v359_v32  ;;  %vm392_vm14 = vcmp.ge.f32.partialorder %v360_v33, 0.0  ;;  %490 = vst [vmem:[%s685_s29 + $0xe0] sm:$0xff] %v458_v36  ;;  %v428_v0 = vmul.f32 %v667_v18, %v360_v33 }
  0x42   : > { %v361_v38 = vadd.f32 %v329_v34, %v297_v35 }
  0x43   : > { %v459_v39 = vsel %vm391_vm13, %v359_v32, %v427_v37  ;;  %v460_v40 = vsel %vm392_vm14, %v360_v33, %v428_v0 }
  0x44   : > { %491 = vst [vmem:[%s685_s29 + $0xe8] sm:$0xff] %v459_v39  ;;  %vm393_vm15 = vcmp.ge.f32.partialorder %v361_v38, 0.0  ;;  %v429_v41 = vmul.f32 %v667_v18, %v361_v38  ;;  %492 = vst [vmem:[%s685_s29 + $0xf0] sm:$0xff] %v460_v40 }
  0x46   : > { %v461_v42 = vsel %vm393_vm15, %v361_v38, %v429_v41 }
  0x47   : > { %493 = vst [vmem:[%s685_s29 + $0xf8] sm:$0xff] %v461_v42 }
  0x48 PF: > { %s13_s12 = sadd.s32 1, %s594_s12  }
  0x49   : > { %p10_p4 = scmp.ge.s32.totalorder %s13_s12, 4  }
  0x4b   :  { %12 = sbr.rel (!%p10_p4) target bundleno = 1 (0x1), region = 65 }

// kernel: basic_block_forward.3
= control target key start
LH: loop header
LB: loop body
LE: loop exit
PB: predicated region body
PF: predicated region fallthrough
CT: control target
= control target key end

     0   :  { %s7753_s15 = smov 0   ;;  %s9687_s0 = inlined_call_operand.vmem [shape: f32[2,256,128], index: 0, kind: input, shape index: {}]   ;;  %s9688_s1 = inlined_call_operand.vmem [shape: f32[3,128], index: 1, kind: input, shape index: {}]   ;;  %s9689_s2 = inlined_call_operand.vmem [shape: bf16[9,128,128], index: 2, kind: input, shape index: {}]   ;;  %s9690_s3 = inlined_call_operand.vmem [shape: f32[2,256,128], index: 3, kind: output, shape index: {0}]   ;;  %s9691_s4 = inlined_call_operand.vmem [shape: f32[2,2,128], index: 4, kind: output, shape index: {1}]  }
   0x1 LB: > { %s6105_s16 = sadd.s32 4294967295, %s7725_s15   ;;  %p6109_p0 = scmp.ge.s32.totalorder %s7725_s15, 1  ;;  %s7725_s15 = sphi %s7753_s15, %s15_s15  }
   0x2   : > { %p165_p1 = scmp.lt.s32.totalorder %s7725_s15, 3 }
   0x4   : > { %p166_p2 = pnand %p6109_p0, %p165_p1 }
   0x6   : > { %169 = sbr.rel (%p166_p2) target bundleno = 721 (0x2d1), region = 32 }
   0xd   : > { %v7507_v0 = vld [vmem:[%s9689_s2 + $0x40] sm:$0xff]   ;;  %v7727_v2 = vmov 0   ;;  %v7509_v3 = vld [vmem:[%s9689_s2 + $0x48] sm:$0xff]   ;;  %v7511_v5 = vld [vmem:[%s9689_s2 + $0x50] sm:$0xff]   ;;  %p195_p3 = scmp.lt.s32.totalorder %s6105_s16, 1  ;;  %vm424_vm0 = vcmask 1040384  }
   0xe   : > { %v7508_v1 = vld [vmem:[%s9689_s2 + $0x100] sm:$0xff]   ;;  %417 = vst [vmem:[#allocation2] sm:$0xf] %v7727_v2  ;;  %418 = vst [vmem:[#allocation2 + $0x4] sm:$0xf] %v7727_v2  ;;  %6794 = vmatprep.subr.bf16.mxu1 %v7507_v0  ;;  %v7510_v4 = vld [vmem:[%s9689_s2 + $0x108] sm:$0xff]  }
   0xf   : > { %419 = vst [vmem:[#allocation2 + $0x8] sm:$0x1] %v7727_v2  ;;  %421 = vst [vmem:[#allocation2 + $0xcc] sm:$0xf] %v7727_v2  ;;  %6986 = vmatprep.subr.bf16.mxu0 %v7508_v1  ;;  %6795 = vmatpush3.bf16.msra.mxu1 %v7507_v0  ;;  %v7512_v6 = vld [vmem:[%s9689_s2 + $0x110] sm:$0xff]   ;;  %v7513_v7 = vld [vmem:[%s9689_s2 + $0x58] sm:$0xff]  }
  0x10   : > { %422 = vst [vmem:[#allocation2 + $0xd0] sm:$0xf] %v7727_v2  ;;  %423 = vst [vmem:[#allocation2 + $0xd4] sm:$0x1] %v7727_v2  ;;  %6987 = vmatpush3.bf16.msra.mxu0 %v7508_v1  ;;  %6796 = vmatprep.subr.bf16.mxu1 %v7509_v3  ;;  %s9745_s16 = smov (!%p195_p3, %s6105_s16), 1  ;;  %v7514_v8 = vld [vmem:[%s9689_s2 + $0x118] sm:$0xff]  }
  0x11   : > { %6988 = vmatprep.subr.bf16.mxu0 %v7510_v4  ;;  %v7515_v9 = vld [vmem:[%s9689_s2 + $0x60] sm:$0xff]   ;;  %s6544_s9 = sshll.u32 %s9745_s16, 8  ;;  %v7517_v11 = vld [vmem:[%s9689_s2 + $0x68] sm:$0xff]   ;;  %vm425_vm1 = vsmask.f32 256  ;;  %v7519_v22 = vld [vmem:[%s9689_s2 + $0x70] sm:$0xff]  }
  0x12   : > { %v7516_v10 = vld [vmem:[%s9689_s2 + $0x120] sm:$0xff]   ;;  %v7518_v12 = vld [vmem:[%s9689_s2 + $0x128] sm:$0xff]   ;;  %s7805_s20 = scalar_lea.vmem %s9687_s0, %s6544_s9  ;;  %vm481_vm2 = vsmask.f32 7938  ;;  %vm7809_vm3 = vmand %vm424_vm0, %vm425_vm1  ;;  %vm1134_vm5 = vsmask.f32 3328  ;;  %s9640_s23 = scalar_lea.vmem %s9690_s3, %s6544_s9 }
  0x13   : > { %6797 = vmatpush3.bf16.msra.mxu1 %v7509_v3  ;;  %vm7817_vm4 = vmand %vm424_vm0, %vm481_vm2  ;;  %v213_v21 = vld [vmem:[%s7805_s20] sm:$0xff]  ;;  %v7520_v26 = vld [vmem:[%s9689_s2 + $0x130] sm:$0xff]   ;;  %vm956_vm6 = vcmask 1043456   ;;  %vm1135_vm7 = vsmask.f32 7440  ;;  %s6114_s9 = sshll.u32 %s9745_s16, 1 }
  0x14   : > { %6989 = vmatpush3.bf16.msra.mxu0 %v7510_v4  ;;  %6798 = vmatprep.subr.bf16.mxu1 %v7511_v5  ;;  %v7830_v24 = vld [vmem:[%s9688_s1] ss:$0 sm:$0xff]  ;;  %v7835_v25 = vld [vmem:[%s9688_s1 + $0x1] ss:$0 sm:$0xff]  ;;  %v214_v29 = vld [vmem:[%s7805_s20 + $0x8] sm:$0xff]  ;;  %s208_s26 = scalar_lea.vmem %s9691_s4, %s6114_s9 }
  0x15   : > { %6990 = vmatprep.subr.bf16.mxu0 %v7512_v6  ;;  %v427_v13 = vld [vmem:[#allocation2] sm:$0x1]  ;;  %v1071_v16 = vld [vmem:[#allocation2 + $0x4] sm:$0xf]  ;;  %v249_v30 = vmul.f32 %v7830_v24, %v213_v21  ;;  %v7847_v31 = vld [vmem:[%s9688_s1 + $0x2] ss:$0 sm:$0xff]  ;;  %v250_v32 = vmul.f32 %v7830_v24, %v214_v29 }
  0x16   : > { %v483_v15 = vld [vmem:[#allocation2 + $0x8] sm:$0x1]  ;;  %v428_v17 = vsel %vm7809_vm3, 0, %v427_v13  ;;  %v1147_v19 = vshll.u32 %v1071_v16, 16  ;;  %v1151_v20 = vshrl.u32 %v1071_v16, 16  ;;  %v7521_v39 = vld [vmem:[%s9689_s2 + $0x78] sm:$0xff]   ;;  %vm7881_vm11 = vmor %vm1134_vm5, %vm1135_vm7 }
  0x17   : > { %6799 = vmatpush3.bf16.msra.mxu1 %v7511_v5  ;;  %429 = vst [vmem:[#allocation2] sm:$0x1] %v428_v17  ;;  %v484_v23 = vsel %vm7817_vm4, 0, %v483_v15  ;;  %v430_v33 = vld [vmem:[#allocation2 + $0xc] sm:$0x1]  ;;  %v285_v35 = vadd.f32 %v7835_v25, %v249_v30  ;;  %v286_v38 = vadd.f32 %v7835_v25, %v250_v32  ;;  %v215_v42 = vld [vmem:[%s7805_s20 + $0x10] sm:$0xff]  ;;  %vm7897_vm13 = vmand %vm956_vm6, %vm481_vm2 }
  0x18   : > { %6991 = vmatpush3.bf16.msra.mxu0 %v7512_v6  ;;  %6800 = vmatprep.subr.bf16.mxu1 %v7513_v7  ;;  %485 = vst [vmem:[#allocation2 + $0x8] sm:$0x1] %v484_v23  ;;  %v7840_v27 = vrot.slane %v1147_v19, 5  ;;  %v1153_v28 = vrot.slane %v1151_v20, 4  ;;  %v486_v34 = vld [vmem:[#allocation2 + $0x14] sm:$0x1]  ;;  %v251_v46 = vmul.f32 %v7830_v24, %v215_v42 }
  0x19   : > { %6992 = vmatprep.subr.bf16.mxu0 %v7514_v8  ;;  %v431_v36 = vsel %vm7809_vm3, 0, %v430_v33  ;;  %v487_v37 = vsel %vm7817_vm4, 0, %v486_v34  ;;  %vm317_vm8 = vcmp.ge.f32.partialorder %v285_v35, 0.0  ;;  %v353_v41 = vmul.f32 %v7847_v31, %v285_v35  ;;  %v216_v43 = vld [vmem:[%s7805_s20 + $0x18] sm:$0xff]  ;;  %v489_v48 = vld [vmem:[#allocation2 + $0x20] sm:$0x1] }
  0x1a   : > { %432 = vst [vmem:[#allocation2 + $0xc] sm:$0x1] %v431_v36  ;;  %488 = vst [vmem:[#allocation2 + $0x14] sm:$0x1] %v487_v37  ;;  %v1154_v40 = vor.u32 %v1153_v28, %v7840_v27  ;;  %vm633_vm9 = vsmask.f32 4368  ;;  %v354_v45 = vmul.f32 %v7847_v31, %v286_v38  ;;  %v252_v51 = vmul.f32 %v7830_v24, %v216_v43 }
  0x1b   : > { %6801 = vmatpush3.bf16.msra.mxu1 %v7513_v7  ;;  %v7522_v44 = vld [vmem:[%s9689_s2 + $0x138] sm:$0xff]   ;;  %vm318_vm10 = vcmp.ge.f32.partialorder %v286_v38, 0.0  ;;  %v385_v50 = vsel %vm317_vm8, %v285_v35, %v353_v41  ;;  %v490_v53 = vsel %vm7817_vm4, 0, %v489_v48  ;;  %v7876_v62 = vld [vmem:[%s9689_s2] sm:$0xff]   ;;  %v287_v63 = vadd.f32 %v7835_v25, %v251_v46  ;;  %vm7905_vm15 = vmor %vm425_vm1, %vm633_vm9 }
  0x1c   : > { %6993 = vmatpush3.bf16.msra.mxu0 %v7514_v8  ;;  %6802 = vmatprep.subr.bf16.mxu1 %v7515_v9  ;;  %v433_v47 = vld [vmem:[#allocation2 + $0x18] sm:$0x1]  ;;  %v386_v57 = vsel %vm318_vm10, %v286_v38, %v354_v45  ;;  %v6546_v58 = vpack.c.bf16 %v385_v50, %v385_v50  ;;  %491 = vst [vmem:[#allocation2 + $0x20] sm:$0x1] %v490_v53  ;;  %v1155_v59 = vrot.slane %v1154_v40, 4  ;;  %v7888_v5 = vld [vmem:[%s9689_s2 + $0x140] sm:$0xff]  }
  0x1d   : > { %6994 = vmatprep.subr.bf16.mxu0 %v7516_v10  ;;  %v434_v52 = vsel %vm7809_vm3, 0, %v433_v47  ;;  %v6547_v61 = vpack.c.bf16 %v386_v57, %v386_v57  ;;  %vm319_vm12 = vcmp.ge.f32.partialorder %v287_v63, 0.0  ;;  %v355_v15 = vmul.f32 %v7847_v31, %v287_v63  ;;  %v218_v35 = vld [vmem:[%s7805_s20 + $0x28] sm:$0xff]  ;;  %v436_v40 = vld [vmem:[#allocation2 + $0x24] sm:$0x1]  ;;  %v219_v46 = vld [vmem:[%s7805_s20 + $0x30] sm:$0xff] }
  0x1e   : > { %v1070_v49 = vld [vmem:[#allocation2] sm:$0xf]  ;;  %435 = vst [vmem:[#allocation2 + $0x18] sm:$0x1] %v434_v52  ;;  %v636_v3 = vshrl.u32 %v6546_v58, 16  ;;  %v639_v4 = vshll.u32 %v6546_v58, 16 }
  0x1f   : > { %6803 = vmatpush3.bf16.msra.mxu1 %v7515_v9  ;;  %v1118_v54 = vld [vmem:[#allocation2 + $0x8] sm:$0x1]  ;;  %v1138_v55 = vshrl.u32 %v1070_v49, 16  ;;  %v1141_v56 = vshll.u32 %v1070_v49, 16  ;;  %v644_v7 = vshrl.u32 %v6547_v61, 16  ;;  %v647_v8 = vshll.u32 %v6547_v61, 16 }
  0x20   : > { %6995 = vmatpush3.bf16.msra.mxu0 %v7516_v10  ;;  %6804 = vmatprep.subr.bf16.mxu1 %v7517_v11  ;;  %v1157_v60 = vshll.u32 %v1118_v54, 16  ;;  %v288_v9 = vadd.f32 %v7835_v25, %v252_v51  ;;  %v217_v10 = vld [vmem:[%s7805_s20 + $0x20] sm:$0xff]  ;;  %v387_v29 = vsel %vm319_vm12, %v287_v63, %v355_v15  ;;  %v492_v41 = vld [vmem:[#allocation2 + $0x2c] sm:$0x1]  ;;  %v220_v47 = vld [vmem:[%s7805_s20 + $0x38] sm:$0xff]  ;;  %v254_v51 = vmul.f32 %v7830_v24, %v218_v35 }
  0x21   : > { %6996 = vmatprep.subr.bf16.mxu0 %v7518_v12  ;;  %v1140_v1 = vrot.slane %v1138_v55, 4  ;;  %v1143_v2 = vrot.slane %v1141_v56, 5  ;;  %v958_v13 = vld [vmem:[#allocation2 + $0xc] sm:$0xf]  ;;  %v646_v17 = vrot.slane %v644_v7, 7  ;;  %v6548_v34 = vpack.c.bf16 %v387_v29, %v387_v29 }
  0x22   : > { %v1159_v6 = vrot.slane %v1157_v60, 5  ;;  %vm320_vm14 = vcmp.ge.f32.partialorder %v288_v9, 0.0  ;;  %v356_v20 = vmul.f32 %v7847_v31, %v288_v9  ;;  %v962_v28 = vld [vmem:[#allocation2 + $0x14] sm:$0x1]  ;;  %v437_v55 = vsel %vm7809_vm3, 0, %v436_v40  ;;  %v7567_v19 = vld [vmem:[%s9689_s2 + $0xa8] sm:$0xff]  }
  0x23   : > { %6805 = vmatpush3.bf16.msra.mxu1 %v7517_v11  ;;  %v1144_v11 = vor.u32 %v1143_v2, %v1140_v1  ;;  %v649_v30 = vor.u32 %v647_v8, %v646_v17  ;;  %v651_v32 = vrot.slane %v646_v17, 4  ;;  %v653_v45 = vshrl.u32 %v6548_v34, 16  ;;  %v969_v53 = vld [vmem:[#allocation2 + $0x20] sm:$0x1]  ;;  %438 = vst [vmem:[#allocation2 + $0x24] sm:$0x1] %v437_v55 }
  0x24   : > { %6997 = vmatpush3.bf16.msra.mxu0 %v7518_v12  ;;  %6806 = vmatprep.subr.bf16.mxu1 %v7519_v22  ;;  %v638_v12 = vrot.slane %v636_v3, 7  ;;  %v1160_v16 = vsel %vm7881_vm11, %v1155_v59, %v1159_v6  ;;  %v388_v33 = vsel %vm320_vm14, %v288_v9, %v356_v20  ;;  %v493_v56 = vsel %vm7817_vm4, 0, %v492_v41 }
  0x25   : > { %6998 = vmatprep.subr.bf16.mxu0 %v7520_v26  ;;  %v1145_v21 = vrot.slane %v1144_v11, 4  ;;  %v6549_v38 = vpack.c.bf16 %v388_v33, %v388_v33  ;;  %v965_v50 = vld [vmem:[#allocation2 + $0x18] sm:$0xf]  ;;  %v655_v52 = vrot.slane %v653_v45, 7  ;;  %v290_v58 = vadd.f32 %v7835_v25, %v254_v51  ;;  %494 = vst [vmem:[#allocation2 + $0x2c] sm:$0x1] %v493_v56 }
  0x26   : > { %v641_v23 = vor.u32 %v639_v4, %v638_v12  ;;  %v255_v59 = vmul.f32 %v7830_v24, %v219_v46  ;;  %v256_v60 = vmul.f32 %v7830_v24, %v220_v47  ;;  %v221_v47 = vld [vmem:[%s7805_s20 + $0x40] sm:$0xff] }
  0x27   : > { %6807 = vmatpush3.bf16.msra.mxu1 %v7519_v22  ;;  %v1150_v36 = vsel %vm7881_vm11, %v1145_v21, %v7840_v27  ;;  %v656_v27 = vshll.u32 %v6548_v34, 16  ;;  %v661_v48 = vshrl.u32 %v6549_v38, 16  ;;  %v664_v49 = vshll.u32 %v6549_v38, 16  ;;  %v7573_v22 = vld [vmem:[%s9689_s2 + $0xb0] sm:$0xff]  }
  0x28   : > { %6999 = vmatpush3.bf16.msra.mxu0 %v7520_v26  ;;  %6808 = vmatprep.subr.bf16.mxu1 %v7521_v39  ;;  %v642_v26 = vrot.slane %v638_v12, 4  ;;  %v959_v37 = vsel %vm7897_vm13, %v641_v23, %v958_v13  ;;  %v6166_v42 = vcombine.low %v1150_v36, %v1160_v16  ;;  %v659_v63 = vrot.slane %v655_v52, 4 }
  0x29   : > { %7000 = vmatprep.subr.bf16.mxu0 %v7522_v44  ;;  %960 = vst [vmem:[#allocation2 + $0xc] sm:$0xf] %v959_v37  ;;  %v663_v57 = vrot.slane %v661_v48, 7  ;;  %v658_v61 = vor.u32 %v656_v27, %v655_v52  ;;  %vm322_vm2 = vcmp.ge.f32.partialorder %v290_v58, 0.0  ;;  %v358_v4 = vmul.f32 %v7847_v31, %v290_v58  ;;  %v222_v27 = vld [vmem:[%s7805_s20 + $0x48] sm:$0xff] }
  0x2a   : > { %v650_v43 = vsel %vm7905_vm15, %v642_v26, %v649_v30  ;;  %6810 = vmatprep.mubr.bf16.mxu1 %v6166_v42  ;;  %v7937_v8 = vadd.f32 %v7835_v25, %v255_v59  ;;  %v7944_v15 = vadd.f32 %v7835_v25, %v256_v60  ;;  %v7967_v60 = vmul.f32 %v7830_v24, %v221_v47 }
  0x2b   : > { %6809 = vmatpush3.bf16.msra.mxu1 %v7521_v39  ;;  %v253_v39 = vmul.f32 %v7830_v24, %v217_v10  ;;  %961 = vst [vmem:[#allocation2 + $0x10] sm:$0xf] %v650_v43  ;;  %v666_v2 = vor.u32 %v664_v49, %v663_v57  ;;  %v668_v3 = vrot.slane %v663_v57, 4  ;;  %v966_v6 = vsel %vm7897_vm13, %v658_v61, %v965_v50 }
  0x2c   : > { %7001 = vmatpush3.bf16.msra.mxu0 %v7522_v44  ;;  %6842 = vmatprep.subr.bf16.mxu1 %v7876_v62  ;;  %v963_v44 = vsel %vm7809_vm3, %v651_v32, %v962_v28  ;;  %967 = vst [vmem:[#allocation2 + $0x18] sm:$0xf] %v966_v6  ;;  %v390_v13 = vsel %vm322_vm2, %v290_v58, %v358_v4  ;;  %vm323_vm5 = vcmp.ge.f32.partialorder %v7937_v8, 0.0  ;;  %vm324_vm6 = vcmp.ge.f32.partialorder %v7944_v15, 0.0 }
  0x2d   : > { %7034 = vmatprep.subr.bf16.mxu0 %v7888_v5  ;;  %964 = vst [vmem:[#allocation2 + $0x14] sm:$0x1] %v963_v44  ;;  %v289_v54 = vadd.f32 %v7835_v25, %v253_v39  ;;  %v667_v11 = vsel %vm7905_vm15, %v659_v63, %v666_v2  ;;  %v970_v12 = vsel %vm7809_vm3, %v668_v3, %v969_v53 }
  0x2e   : > { %968 = vst [vmem:[#allocation2 + $0x1c] sm:$0xf] %v667_v11  ;;  %971 = vst [vmem:[#allocation2 + $0x20] sm:$0x1] %v970_v12  ;;  %v7948_v26 = vpack.c.bf16 %v390_v13, %v390_v13  ;;  %v7952_v33 = vmul.f32 %v7847_v31, %v7937_v8  ;;  %v7962_v56 = vmul.f32 %v7847_v31, %v7944_v15  ;;  %v7526_v13 = vld [vmem:[%s9689_s2 + $0x8] sm:$0xff]  }
  0x2f   : > { %vm321_vm1 = vcmp.ge.f32.partialorder %v289_v54, 0.0  ;;  %v357_v1 = vmul.f32 %v7847_v31, %v289_v54  ;;  %v7970_v61 = vmul.f32 %v7830_v24, %v222_v27  ;;  %v7529_v27 = vld [vmem:[%s9689_s2 + $0x10] sm:$0xff]  }
  0x30   : > { %v1072_v9 = vld [vmem:[#allocation2 + $0xc] sm:$0xf] }
  0x31   : > { %v389_v7 = vsel %vm321_vm1, %v289_v54, %v357_v1  ;;  %v2987_v10 = vld [vmem:[#allocation2 + $0xc] sm:$0xf]  ;;  %v1162_v20 = vshrl.u32 %v1072_v9, 16  ;;  %v1165_v21 = vshll.u32 %v1072_v9, 16 }
  0x32   : > { %v1073_v16 = vld [vmem:[#allocation2 + $0x10] sm:$0xf]  ;;  %v7946_v23 = vpack.c.bf16 %v389_v7, %v389_v7  ;;  %v3036_v37 = vshrl.u32 %v2987_v10, 16  ;;  %v3039_v38 = vshll.u32 %v2987_v10, 16 }
  0x33   : > { %v1171_v28 = vshll.u32 %v1073_v16, 16  ;;  %v1175_v29 = vshrl.u32 %v1073_v16, 16  ;;  %v2988_v32 = vld [vmem:[#allocation2 + $0x10] sm:$0xf]  ;;  %v1164_v34 = vrot.slane %v1162_v20, 4  ;;  %v1167_v35 = vrot.slane %v1165_v21, 5 }
  0x34   : > { %v1119_v17 = vld [vmem:[#allocation2 + $0x14] sm:$0x1]  ;;  %v3045_v42 = vshll.u32 %v2988_v32, 16  ;;  %v3038_v44 = vrot.slane %v3036_v37, 4  ;;  %v3041_v45 = vrot.slane %v3039_v38, 5  ;;  %v3049_v46 = vshrl.u32 %v2988_v32, 16 }
  0x35   : > { %v1181_v30 = vshll.u32 %v1119_v17, 16  ;;  %v7954_v36 = vld [vmem:[#allocation2 + $0x14] sm:$0x1]  ;;  %v1173_v39 = vrot.slane %v1171_v28, 5  ;;  %v1177_v40 = vrot.slane %v1175_v29, 4  ;;  %v1168_v43 = vor.u32 %v1167_v35, %v1164_v34 }
  0x36   : > { %v3047_v49 = vrot.slane %v3045_v42, 5  ;;  %v3055_v50 = vshll.u32 %v7954_v36, 16  ;;  %v3810_v51 = vrot.slane %v7954_v36, 5  ;;  %v3042_v53 = vor.u32 %v3041_v45, %v3038_v44  ;;  %v2990_v55 = vld [vmem:[#allocation2 + $0x18] sm:$0xf] }
  0x37   : > { %v1183_v41 = vrot.slane %v1181_v30, 5  ;;  %v1178_v48 = vor.u32 %v1177_v40, %v1173_v39  ;;  %v1169_v52 = vrot.slane %v1168_v43, 4  ;;  %v3051_v54 = vrot.slane %v3049_v46, 4  ;;  %v7964_v59 = vld [vmem:[#allocation2 + $0x1c] sm:$0xf] }
  0x38   : > { %v3057_v58 = vrot.slane %v3055_v50, 5  ;;  %v3043_v1 = vrot.slane %v3042_v53, 4  ;;  %v7974_v3 = vld [vmem:[#allocation2 + $0x20] sm:$0x1]  ;;  %v3060_v4 = vshrl.u32 %v2990_v55, 16  ;;  %v3063_v9 = vshll.u32 %v2990_v55, 16 }
  0x39   : > { %v1179_v57 = vrot.slane %v1178_v48, 4  ;;  %v1174_v63 = vsel %vm7881_vm11, %v1169_v52, %v1173_v39  ;;  %v3052_v2 = vor.u32 %v3051_v54, %v3047_v49  ;;  %v1074_v6 = vld [vmem:[#allocation2 + $0x18] sm:$0xf]  ;;  %v3069_v10 = vshll.u32 %v7964_v59, 16  ;;  %v1075_v12 = vld [vmem:[#allocation2 + $0x1c] sm:$0xf] }
  0x3a   : > { %v3073_v11 = vshrl.u32 %v7964_v59, 16  ;;  %v3048_v17 = vsel %vm7881_vm11, %v3043_v1, %v3047_v49  ;;  %v3062_v21 = vrot.slane %v3060_v4, 4  ;;  %v1120_v28 = vld [vmem:[#allocation2 + $0x20] sm:$0x1]  ;;  %v3065_v29 = vrot.slane %v3063_v9, 5 }
  0x3b   : > { %v1184_v7 = vsel %vm7881_vm11, %v1179_v57, %v1183_v41  ;;  %v3053_v20 = vrot.slane %v3052_v2, 4  ;;  %v3071_v30 = vrot.slane %v3069_v10, 5  ;;  %v3079_v34 = vshll.u32 %v7974_v3, 16  ;;  %v439_v2 = vld [vmem:[#allocation2 + $0x30] sm:$0x1] }
  0x3c   : > { %v6167_v16 = vcombine.low %v1174_v63, %v1184_v7  ;;  %v3075_v32 = vrot.slane %v3073_v11, 4  ;;  %v3814_v37 = vrot.slane %v7964_v59, 5  ;;  %v3817_v38 = vrot.slane %v7974_v3, 5  ;;  %v495_v11 = vld [vmem:[#allocation2 + $0x38] sm:$0x1] }
  0x3d   : > { %v3058_v35 = vsel %vm7881_vm11, %v3053_v20, %v3057_v58  ;;  %v1186_v39 = vshrl.u32 %v1074_v6, 16  ;;  %v3066_v41 = vor.u32 %v3065_v29, %v3062_v21  ;;  %v3081_v43 = vrot.slane %v3079_v34, 5 }
  0x3e   : > { %6811 = vmatmul.mubr.bf16.vlgmr.msra.gmra.mrb[0].mxu1 %v6167_v16  ;;  %v6326_v40 = vcombine.low %v3048_v17, %v3058_v35  ;;  %v3076_v42 = vor.u32 %v3075_v32, %v3071_v30  ;;  %v7993_v44 = vrot.slane %v3814_v37, 4  ;;  %v1189_v46 = vshll.u32 %v1074_v6, 16  ;;  %v7525_v6 = vld [vmem:[%s9689_s2 + $0x148] sm:$0xff]  }
  0x3f   : > { %6843 = vmatpush3.bf16.msra.mxu1 %v7876_v62  ;;  %v1188_v45 = vrot.slane %v1186_v39, 4  ;;  %v1195_v47 = vshll.u32 %v1075_v12, 16  ;;  %v3067_v48 = vrot.slane %v3066_v41, 4  ;;  %v1199_v50 = vshrl.u32 %v1075_v12, 16  ;;  %v7532_v12 = vld [vmem:[%s9689_s2 + $0x18] sm:$0xff]  }
  0x40   : > { %6844 = vmatprep.subr.bf16.mxu1 %v7526_v13  ;;  %7002 = vmatprep.mubr.bf16.mxu0 %v6326_v40  ;;  %v3077_v49 = vrot.slane %v3076_v42, 4  ;;  %v1205_v62 = vshll.u32 %v1120_v28, 16  ;;  %v1191_v52 = vrot.slane %v1189_v46, 5  ;;  %v670_v54 = vshrl.u32 %v7946_v23, 16  ;;  %v442_v42 = vld [vmem:[#allocation2 + $0x3c] sm:$0x1] }
  0x41   : > { %v1197_v53 = vrot.slane %v1195_v47, 5  ;;  %v673_v55 = vshll.u32 %v7946_v23, 16  ;;  %v3072_v57 = vsel %vm7881_vm11, %v3067_v48, %v3071_v30  ;;  %v1201_v63 = vrot.slane %v1199_v50, 4  ;;  %v972_v23 = vld [vmem:[#allocation2 + $0x24] sm:$0xf] }
  0x42   : > { %v3082_v58 = vsel %vm7881_vm11, %v3077_v49, %v3081_v43  ;;  %v1207_v1 = vrot.slane %v1205_v62, 5  ;;  %v1192_v7 = vor.u32 %v1191_v52, %v1188_v45  ;;  %v672_v9 = vrot.slane %v670_v54, 7  ;;  %v976_v30 = vld [vmem:[#allocation2 + $0x2c] sm:$0x1]  ;;  %v7535_v43 = vld [vmem:[%s9689_s2 + $0x20] sm:$0xff]   ;;  %v223_v49 = vld [vmem:[%s7805_s20 + $0x50] sm:$0xff] }
  0x43   : > { %6845 = vmatpush3.bf16.msra.mxu1 %v7526_v13  ;;  %v6327_v4 = vcombine.low %v3072_v57, %v3082_v58  ;;  %v678_v10 = vshrl.u32 %v7948_v26, 16  ;;  %v1202_v16 = vor.u32 %v1201_v63, %v1197_v53  ;;  %v681_v13 = vshll.u32 %v7948_v26, 16  ;;  %v498_v48 = vld [vmem:[#allocation2 + $0x44] sm:$0x1]  ;;  %v7528_v54 = vld [vmem:[%s9689_s2 + $0x158] sm:$0xff]  }
  0x44   : > { %6846 = vmatprep.subr.bf16.mxu1 %v7529_v27  ;;  %v1193_v17 = vrot.slane %v1192_v7, 4  ;;  %v675_v20 = vor.u32 %v673_v55, %v672_v9  ;;  %v676_v21 = vrot.slane %v672_v9, 4  ;;  %v391_v32 = vsel %vm323_vm5, %v7937_v8, %v7952_v33  ;;  %v7527_v8 = vld [vmem:[%s9689_s2 + $0x150] sm:$0xff]   ;;  %v224_v55 = vld [vmem:[%s7805_s20 + $0x58] sm:$0xff] }
  0x45   : > { %7003 = vmatmul.mubr.bf16.vlgmr.msra.gmra.mrb[0].mxu0 %v6327_v4  ;;  %v680_v28 = vrot.slane %v678_v10, 7  ;;  %v1203_v29 = vrot.slane %v1202_v16, 4  ;;  %v392_v34 = vsel %vm324_vm6, %v7944_v15, %v7962_v56  ;;  %v440_v26 = vsel %vm7809_vm3, 0, %v439_v2 }
  0x46   : > { %7035 = vmatpush3.bf16.msra.mxu0 %v7888_v5  ;;  %v1198_v35 = vsel %vm7881_vm11, %v1193_v17, %v1197_v53  ;;  %v973_v5 = vsel %vm7897_vm13, %v675_v20, %v972_v23  ;;  %441 = vst [vmem:[#allocation2 + $0x30] sm:$0x1] %v440_v26  ;;  %v496_v33 = vsel %vm7817_vm4, 0, %v495_v11  ;;  %v6552_v56 = vpack.c.bf16 %v391_v32, %v391_v32 }
  0x47   : > { %6847 = vmatpush3.bf16.msra.mxu1 %v7529_v27  ;;  %7036 = vmatprep.subr.bf16.mxu0 %v7525_v6  ;;  %v683_v39 = vor.u32 %v681_v13, %v680_v28  ;;  %v685_v40 = vrot.slane %v680_v28, 4  ;;  %v1208_v15 = vsel %vm7881_vm11, %v1203_v29, %v1207_v1  ;;  %974 = vst [vmem:[#allocation2 + $0x24] sm:$0xf] %v973_v5  ;;  %497 = vst [vmem:[#allocation2 + $0x38] sm:$0x1] %v496_v33 }
  0x48   : > { %6848 = vmatprep.subr.bf16.mxu1 %v7532_v12  ;;  %v6553_v41 = vpack.c.bf16 %v392_v34, %v392_v34  ;;  %v6168_v45 = vcombine.low %v1198_v35, %v1208_v15  ;;  %v293_v27 = vadd.f32 %v7835_v25, %v7967_v60  ;;  %v687_v50 = vshrl.u32 %v6552_v56, 16 }
  0x49   : > { %v684_v46 = vsel %vm7905_vm15, %v676_v21, %v683_v39  ;;  %v977_v47 = vsel %vm7809_vm3, %v685_v40, %v976_v30  ;;  %v690_v62 = vshll.u32 %v6552_v56, 16  ;;  %v294_v60 = vadd.f32 %v7835_v25, %v7970_v61  ;;  %v7530_v21 = vld [vmem:[%s9689_s2 + $0x160] sm:$0xff]  }
  0x4a   : > { %7037 = vmatpush3.bf16.msra.mxu0 %v7525_v6  ;;  %975 = vst [vmem:[#allocation2 + $0x28] sm:$0xf] %v684_v46  ;;  %978 = vst [vmem:[#allocation2 + $0x2c] sm:$0x1] %v977_v47  ;;  %v695_v52 = vshrl.u32 %v6553_v41, 16  ;;  %v698_v53 = vshll.u32 %v6553_v41, 16  ;;  %6814 = vmatprep.mubr.bf16.mxu1 %v6168_v45  ;;  %v361_v57 = vmul.f32 %v7847_v31, %v293_v27 }
  0x4b   : > { %6849 = vmatpush3.bf16.msra.mxu1 %v7532_v12  ;;  %7038 = vmatprep.subr.bf16.mxu0 %v7527_v8  ;;  %vm325_vm7 = vcmp.ge.f32.partialorder %v293_v27, 0.0  ;;  %v443_v58 = vsel %vm7809_vm3, 0, %v442_v42  ;;  %v689_v63 = vrot.slane %v687_v50, 7  ;;  %v499_v2 = vsel %vm7817_vm4, 0, %v498_v48 }
  0x4c   : > { %v697_v1 = vrot.slane %v695_v52, 7  ;;  %444 = vst [vmem:[#allocation2 + $0x3c] sm:$0x1] %v443_v58  ;;  %v259_v4 = vmul.f32 %v7830_v24, %v223_v49  ;;  %6850 = vmatprep.subr.bf16.mxu1 %v7535_v43  ;;  %vm326_vm8 = vcmp.ge.f32.partialorder %v294_v60, 0.0  ;;  %v362_v6 = vmul.f32 %v7847_v31, %v294_v60  ;;  %500 = vst [vmem:[#allocation2 + $0x44] sm:$0x1] %v499_v2 }
  0x4d   : > { %v393_v7 = vsel %vm325_vm7, %v293_v27, %v361_v57  ;;  %v260_v61 = vmul.f32 %v7830_v24, %v224_v55  ;;  %v692_v9 = vor.u32 %v690_v62, %v689_v63  ;;  %v693_v10 = vrot.slane %v689_v63, 4  ;;  %v979_v12 = vld [vmem:[#allocation2 + $0x30] sm:$0xf]  ;;  %v7531_v49 = vld [vmem:[%s9689_s2 + $0x168] sm:$0xff]  }
  0x4e   : > { %v700_v23 = vor.u32 %v698_v53, %v697_v1  ;;  %v702_v11 = vrot.slane %v697_v1, 4  ;;  %7039 = vmatpush3.bf16.msra.mxu0 %v7527_v8  ;;  %v1076_v16 = vld [vmem:[#allocation2 + $0x24] sm:$0xf]  ;;  %v394_v17 = vsel %vm326_vm8, %v294_v60, %v362_v6  ;;  %v8056_v20 = vpack.c.bf16 %v393_v7, %v393_v7  ;;  %v983_v35 = vld [vmem:[#allocation2 + $0x38] sm:$0x1]  ;;  %v7537_v55 = vld [vmem:[%s9689_s2 + $0x28] sm:$0xff]  }
  0x4f   : > { %6851 = vmatpush3.bf16.msra.mxu1 %v7535_v43  ;;  %v2993_v13 = vld [vmem:[#allocation2 + $0x24] sm:$0xf]  ;;  %7040 = vmatprep.subr.bf16.mxu0 %v7528_v54  ;;  %v8062_v28 = vadd.f32 %v7835_v25, %v259_v4  ;;  %v8065_v29 = vadd.f32 %v7835_v25, %v260_v61  ;;  %v1210_v30 = vshrl.u32 %v1076_v16, 16  ;;  %v1213_v32 = vshll.u32 %v1076_v16, 16 }
  0x50   : > { %v3084_v34 = vshrl.u32 %v2993_v13, 16  ;;  %v3087_v26 = vshll.u32 %v2993_v13, 16  ;;  %v701_v8 = vsel %vm7905_vm15, %v693_v10, %v700_v23  ;;  %v980_v15 = vsel %vm7897_vm13, %v692_v9, %v979_v12  ;;  %v225_v6 = vld [vmem:[%s7805_s20 + $0x60] sm:$0xff]  ;;  %6852 = vmatprep.subr.bf16.mxu1 %v7537_v55  ;;  %v7533_v23 = vld [vmem:[%s9689_s2 + $0x170] sm:$0xff]  }
  0x51   : > { %v1077_v39 = vld [vmem:[#allocation2 + $0x28] sm:$0xf]  ;;  %v1121_v40 = vld [vmem:[#allocation2 + $0x2c] sm:$0x1]  ;;  %v984_v33 = vsel %vm7809_vm3, %v702_v11, %v983_v35  ;;  %v8073_v56 = vpack.c.bf16 %v394_v17, %v394_v17  ;;  %v1212_v25 = vrot.slane %v1210_v30, 4  ;;  %v1215_v41 = vrot.slane %v1213_v32, 5 }
  0x52   : > { %v2994_v5 = vld [vmem:[#allocation2 + $0x28] sm:$0xf]  ;;  %v1219_v42 = vshll.u32 %v1077_v39, 16  ;;  %v1223_v43 = vshrl.u32 %v1077_v39, 16  ;;  %v2995_v45 = vld [vmem:[#allocation2 + $0x2c] sm:$0x1]  ;;  %7041 = vmatpush3.bf16.msra.mxu0 %v7528_v54  ;;  %v8096_v32 = vmul.f32 %v7847_v31, %v8062_v28 }
  0x53   : > { %981 = vst [vmem:[#allocation2 + $0x30] sm:$0xf] %v980_v15  ;;  %982 = vst [vmem:[#allocation2 + $0x34] sm:$0xf] %v701_v8  ;;  %v1229_v46 = vshll.u32 %v1121_v40, 16  ;;  %v3086_v47 = vrot.slane %v3084_v34, 4  ;;  %7042 = vmatprep.subr.bf16.mxu0 %v7530_v21  ;;  %v1216_v50 = vor.u32 %v1215_v41, %v1212_v25  ;;  %6853 = vmatpush3.bf16.msra.mxu1 %v7537_v55 }
  0x54   : > { %985 = vst [vmem:[#allocation2 + $0x38] sm:$0x1] %v984_v33  ;;  %v3089_v27 = vrot.slane %v3087_v26, 5  ;;  %v3093_v48 = vshll.u32 %v2994_v5, 16  ;;  %v1221_v62 = vrot.slane %v1219_v42, 5  ;;  %v1225_v52 = vrot.slane %v1223_v43, 4 }
  0x55   : > { %v3097_v53 = vshrl.u32 %v2994_v5, 16  ;;  %v1231_v60 = vrot.slane %v1229_v46, 5  ;;  %v3103_v58 = vshll.u32 %v2995_v45, 16  ;;  %v1217_v63 = vrot.slane %v1216_v50, 4 }
  0x56   : > { %v3090_v54 = vor.u32 %v3089_v27, %v3086_v47  ;;  %v3095_v57 = vrot.slane %v3093_v48, 5  ;;  %v1226_v1 = vor.u32 %v1225_v52, %v1221_v62  ;;  %v704_v4 = vshrl.u32 %v8056_v20, 16  ;;  %7043 = vmatpush3.bf16.msra.mxu0 %v7530_v21 }
  0x57   : > { %v3099_v2 = vrot.slane %v3097_v53, 4  ;;  %v3105_v61 = vrot.slane %v3103_v58, 5  ;;  %v707_v9 = vshll.u32 %v8056_v20, 16  ;;  %v712_v10 = vshrl.u32 %v8073_v56, 16  ;;  %7044 = vmatprep.subr.bf16.mxu0 %v7531_v49 }
  0x58   : > { %v3091_v7 = vrot.slane %v3090_v54, 4  ;;  %v1222_v11 = vsel %vm7881_vm11, %v1217_v63, %v1221_v62  ;;  %v1227_v12 = vrot.slane %v1226_v1, 4  ;;  %v8090_v13 = vrot.slane %v704_v4, 7  ;;  %v986_v1 = vld [vmem:[#allocation2 + $0x3c] sm:$0xf] }
  0x59   : > { %v3100_v16 = vor.u32 %v3099_v2, %v3095_v57  ;;  %v8100_v34 = vmul.f32 %v7847_v31, %v8065_v29  ;;  %v8103_v26 = vmul.f32 %v7830_v24, %v225_v6  ;;  %v7534_v31 = vld [vmem:[%s9689_s2 + $0x178] sm:$0xff]   ;;  %vm327_vm9 = vcmp.ge.f32.partialorder %v8062_v28, 0.0 }
  0x5a   : > { %v3096_v17 = vsel %vm7881_vm11, %v3091_v7, %v3095_v57  ;;  %v2996_v21 = vld [vmem:[#allocation2 + $0x30] sm:$0xf]  ;;  %v2997_v20 = vld [vmem:[#allocation2 + $0x34] sm:$0xf]  ;;  %v1232_v35 = vsel %vm7881_vm11, %v1227_v12, %v1231_v60  ;;  %7045 = vmatpush3.bf16.msra.mxu0 %v7531_v49  ;;  %v7536_v60 = vld [vmem:[%s9689_s2 + $0x180] sm:$0xff]   ;;  %v709_v63 = vor.u32 %v707_v9, %v8090_v13  ;;  %v710_v7 = vrot.slane %v8090_v13, 4 }
  0x5b   : > { %v2998_v30 = vld [vmem:[#allocation2 + $0x38] sm:$0x1]  ;;  %v3101_v39 = vrot.slane %v3100_v16, 4  ;;  %v3108_v40 = vshrl.u32 %v2996_v21, 16  ;;  %v3111_v5 = vshll.u32 %v2996_v21, 16  ;;  %v6169_v15 = vcombine.low %v1222_v11, %v1232_v35  ;;  %7046 = vmatprep.subr.bf16.mxu0 %v7533_v23 }
  0x5c   : > { %v1078_v8 = vld [vmem:[#allocation2 + $0x30] sm:$0xf]  ;;  %v3117_v33 = vshll.u32 %v2997_v20, 16  ;;  %v3121_v25 = vshrl.u32 %v2997_v20, 16  ;;  %v3127_v41 = vshll.u32 %v2998_v30, 16  ;;  %v714_v12 = vrot.slane %v712_v10, 7 }
  0x5d   : > { %v1079_v42 = vld [vmem:[#allocation2 + $0x34] sm:$0xf]  ;;  %v3106_v24 = vsel %vm7881_vm11, %v3101_v39, %v3105_v61  ;;  %v3110_v43 = vrot.slane %v3108_v40, 4  ;;  %v3113_v45 = vrot.slane %v3111_v5, 5  ;;  %v1122_v46 = vld [vmem:[#allocation2 + $0x38] sm:$0x1]  ;;  %6815 = vmatmul.mubr.bf16.gmra.mrb[4].mxu1 %v6169_v15  ;;  %v987_v35 = vsel %vm7897_vm13, %v709_v63, %v986_v1 }
  0x5e   : > { %v1234_v47 = vshrl.u32 %v1078_v8, 16  ;;  %v6328_v27 = vcombine.low %v3096_v17, %v3106_v24  ;;  %v3119_v48 = vrot.slane %v3117_v33, 5  ;;  %v3123_v49 = vrot.slane %v3121_v25, 4  ;;  %7047 = vmatpush3.bf16.msra.mxu0 %v7533_v23  ;;  %v990_v16 = vld [vmem:[#allocation2 + $0x44] sm:$0x1]  ;;  %v226_v39 = vld [vmem:[%s7805_s20 + $0x68] sm:$0xff] }
  0x5f   : > { %v3129_v50 = vrot.slane %v3127_v41, 5  ;;  %v3114_v62 = vor.u32 %v3113_v45, %v3110_v43  ;;  %v1237_v53 = vshll.u32 %v1078_v8, 16  ;;  %v1243_v55 = vshll.u32 %v1079_v42, 16  ;;  %7048 = vmatprep.subr.bf16.mxu0 %v7534_v31  ;;  %v445_v17 = vld [vmem:[#allocation2 + $0x48] sm:$0x1]  ;;  %v227_v24 = vld [vmem:[%s7805_s20 + $0x70] sm:$0xff] }
  0x60   : > { %v1236_v52 = vrot.slane %v1234_v47, 4  ;;  %7006 = vmatprep.mubr.bf16.mxu0 %v6328_v27  ;;  %v3124_v54 = vor.u32 %v3123_v49, %v3119_v48  ;;  %v1247_v57 = vshrl.u32 %v1079_v42, 16  ;;  %v1253_v58 = vshll.u32 %v1122_v46, 16  ;;  %v501_v21 = vld [vmem:[#allocation2 + $0x50] sm:$0x1] }
  0x61   : > { %v3115_v2 = vrot.slane %v3114_v62, 4  ;;  %v1239_v4 = vrot.slane %v1237_v53, 5  ;;  %v1245_v6 = vrot.slane %v1243_v55, 5  ;;  %v715_v9 = vshll.u32 %v8073_v56, 16  ;;  %988 = vst [vmem:[#allocation2 + $0x3c] sm:$0xf] %v987_v35 }
  0x62   : > { %v3125_v61 = vrot.slane %v3124_v54, 4  ;;  %v1249_v23 = vrot.slane %v1247_v57, 4  ;;  %v1255_v11 = vrot.slane %v1253_v58, 5  ;;  %7049 = vmatpush3.bf16.msra.mxu0 %v7534_v31  ;;  %v719_v10 = vrot.slane %v714_v12, 4  ;;  %v448_v5 = vld [vmem:[#allocation2 + $0x54] sm:$0x1] }
  0x63   : > { %v3120_v20 = vsel %vm7881_vm11, %v3115_v2, %v3119_v48  ;;  %v1240_v30 = vor.u32 %v1239_v4, %v1236_v52  ;;  %7082 = vmatprep.subr.bf16.mxu0 %v7536_v60  ;;  %v717_v33 = vor.u32 %v715_v9, %v714_v12  ;;  %vm328_vm10 = vcmp.ge.f32.partialorder %v8065_v29, 0.0  ;;  %v504_v31 = vld [vmem:[#allocation2 + $0x5c] sm:$0x1]  ;;  %v8147_v47 = vld [vmem:[%s9688_s1] ss:$0 sm:$0xff] }
  0x64   : > { %v3130_v13 = vsel %vm7881_vm11, %v3125_v61, %v3129_v50  ;;  %v1250_v40 = vor.u32 %v1249_v23, %v1245_v6  ;;  %v991_v25 = vsel %vm7809_vm3, %v719_v10, %v990_v16  ;;  %v395_v41 = vsel %vm327_vm9, %v8062_v28, %v8096_v32  ;;  %v8153_v49 = vld [vmem:[%s9688_s1 + $0x1] ss:$0 sm:$0xff]  ;;  %v228_v53 = vld [vmem:[%s7805_s20 + $0x78] sm:$0xff] }
  0x65   : > { %v6329_v8 = vcombine.low %v3120_v20, %v3130_v13  ;;  %v1241_v15 = vrot.slane %v1240_v30, 4  ;;  %v396_v42 = vsel %vm328_vm10, %v8065_v29, %v8100_v34  ;;  %v718_v45 = vsel %vm7905_vm15, %v710_v7, %v717_v33  ;;  %992 = vst [vmem:[#allocation2 + $0x44] sm:$0x1] %v991_v25 }
  0x66   : > { %v1251_v56 = vrot.slane %v1250_v40, 4  ;;  %v446_v46 = vsel %vm7809_vm3, 0, %v445_v17  ;;  %v502_v28 = vsel %vm7817_vm4, 0, %v501_v21  ;;  %989 = vst [vmem:[#allocation2 + $0x40] sm:$0xf] %v718_v45  ;;  %v6556_v32 = vpack.c.bf16 %v395_v41, %v395_v41 }
  0x67   : > { %7007 = vmatmul.mubr.bf16.gmra.mrb[4].mxu0 %v6329_v8  ;;  %v1246_v43 = vsel %vm7881_vm11, %v1241_v15, %v1245_v6  ;;  %447 = vst [vmem:[#allocation2 + $0x48] sm:$0x1] %v446_v46  ;;  %503 = vst [vmem:[#allocation2 + $0x50] sm:$0x1] %v502_v28  ;;  %v6557_v34 = vpack.c.bf16 %v396_v42, %v396_v42  ;;  %v262_v27 = vmul.f32 %v8147_v47, %v226_v39  ;;  %v7539_v6 = vld [vmem:[%s9689_s2 + $0x30] sm:$0xff]   ;;  %vm2164_vm7 = vcmask 1042432  }
  0x68   : > { %v1256_v29 = vsel %vm7881_vm11, %v1251_v56, %v1255_v11  ;;  %v297_v50 = vadd.f32 %v8153_v49, %v8103_v26  ;;  %v449_v62 = vsel %vm7809_vm3, 0, %v448_v5  ;;  %v505_v52 = vsel %vm7817_vm4, 0, %v504_v31  ;;  %v1080_v58 = vld [vmem:[#allocation2 + $0x3c] sm:$0xf]  ;;  %v8166_v26 = vld [vmem:[%s9688_s1 + $0x2] ss:$0 sm:$0xff]  ;;  %6854 = vmatprep.subr.bf16.mxu1 %v7539_v6 }
  0x69   : > { %v6170_v48 = vcombine.low %v1246_v43, %v1256_v29  ;;  %v721_v55 = vshrl.u32 %v6556_v32, 16  ;;  %v724_v60 = vshll.u32 %v6556_v32, 16  ;;  %v729_v54 = vshrl.u32 %v6557_v34, 16  ;;  %450 = vst [vmem:[#allocation2 + $0x54] sm:$0x1] %v449_v62  ;;  %6855 = vmatpush3.bf16.msra.mxu1 %v7539_v6 }
  0x6a   : > { %v732_v57 = vshll.u32 %v6557_v34, 16  ;;  %506 = vst [vmem:[#allocation2 + $0x5c] sm:$0x1] %v505_v52  ;;  %v2999_v63 = vld [vmem:[#allocation2 + $0x3c] sm:$0xf]  ;;  %v298_v1 = vadd.f32 %v8153_v49, %v262_v27  ;;  %vm329_vm12 = vcmp.ge.f32.partialorder %v297_v50, 0.0  ;;  %v365_v2 = vmul.f32 %v8166_v26, %v297_v50 }
  0x6b   : > { %6818 = vmatprep.mubr.bf16.mxu1 %v6170_v48  ;;  %v263_v4 = vmul.f32 %v8147_v47, %v227_v24  ;;  %v1258_v7 = vshrl.u32 %v1080_v58, 16  ;;  %v1261_v61 = vshll.u32 %v1080_v58, 16  ;;  %v3132_v23 = vshrl.u32 %v2999_v63, 16  ;;  %v451_v52 = vld [vmem:[#allocation2 + $0x60] sm:$0x1] }
  0x6c   : > { %v3135_v11 = vshll.u32 %v2999_v63, 16  ;;  %v723_v12 = vrot.slane %v721_v55, 7  ;;  %v731_v16 = vrot.slane %v729_v54, 7  ;;  %vm330_vm14 = vcmp.ge.f32.partialorder %v298_v1, 0.0  ;;  %v1123_v21 = vld [vmem:[#allocation2 + $0x44] sm:$0x1] }
  0x6d   : > { %v366_v17 = vmul.f32 %v8166_v26, %v298_v1  ;;  %v1260_v20 = vrot.slane %v1258_v7, 4  ;;  %v1263_v30 = vrot.slane %v1261_v61, 5  ;;  %v3001_v9 = vld [vmem:[#allocation2 + $0x44] sm:$0x1]  ;;  %v397_v35 = vsel %vm329_vm12, %v297_v50, %v365_v2  ;;  %v1081_v13 = vld [vmem:[#allocation2 + $0x40] sm:$0xf] }
  0x6e   : > { %v264_v39 = vmul.f32 %v8147_v47, %v228_v53  ;;  %v1277_v40 = vshll.u32 %v1123_v21, 16  ;;  %v3000_v10 = vld [vmem:[#allocation2 + $0x40] sm:$0xf]  ;;  %v3134_v5 = vrot.slane %v3132_v23, 4  ;;  %v726_v8 = vor.u32 %v724_v60, %v723_v12  ;;  %v993_v32 = vld [vmem:[#allocation2 + $0x48] sm:$0xf] }
  0x6f   : > { %v734_v15 = vor.u32 %v732_v57, %v731_v16  ;;  %v1264_v33 = vor.u32 %v1263_v30, %v1260_v20  ;;  %v1267_v56 = vshll.u32 %v1081_v13, 16  ;;  %v1271_v25 = vshrl.u32 %v1081_v13, 16  ;;  %v997_v62 = vld [vmem:[#allocation2 + $0x50] sm:$0x1] }
  0x70   : > { %v3137_v41 = vrot.slane %v3135_v11, 5  ;;  %v1279_v42 = vrot.slane %v1277_v40, 5  ;;  %v3141_v31 = vshll.u32 %v3000_v10, 16  ;;  %v3145_v24 = vshrl.u32 %v3000_v10, 16  ;;  %v507_v11 = vld [vmem:[#allocation2 + $0x68] sm:$0x1] }
  0x71   : > { %v3151_v43 = vshll.u32 %v3001_v9, 16  ;;  %v1265_v45 = vrot.slane %v1264_v33, 4  ;;  %v1269_v46 = vrot.slane %v1267_v56, 5  ;;  %v1273_v28 = vrot.slane %v1271_v25, 4  ;;  %v230_v40 = vld [vmem:[%s7805_s20 + $0x88] sm:$0xff]  ;;  %v231_v33 = vld [vmem:[%s7805_s20 + $0x90] sm:$0xff] }
  0x72   : > { %v3138_v29 = vor.u32 %v3137_v41, %v3134_v5  ;;  %v3143_v34 = vrot.slane %v3141_v31, 5  ;;  %v3147_v27 = vrot.slane %v3145_v24, 4  ;;  %v727_v50 = vrot.slane %v723_v12, 4 }
  0x73   : > { %v3153_v48 = vrot.slane %v3151_v43, 5  ;;  %v1270_v53 = vsel %vm7881_vm11, %v1265_v45, %v1269_v46  ;;  %v1274_v55 = vor.u32 %v1273_v28, %v1269_v46  ;;  %v736_v54 = vrot.slane %v731_v16, 4 }
  0x74   : > { %v3139_v60 = vrot.slane %v3138_v29, 4  ;;  %v3148_v57 = vor.u32 %v3147_v27, %v3143_v34  ;;  %v735_v58 = vsel %vm7905_vm15, %v727_v50, %v734_v15  ;;  %v994_v63 = vsel %vm7897_vm13, %v726_v8, %v993_v32  ;;  %v1000_v15 = vld [vmem:[#allocation2 + $0x54] sm:$0xf] }
  0x75   : > { %v398_v2 = vsel %vm330_vm14, %v298_v1, %v366_v17  ;;  %v1275_v6 = vrot.slane %v1274_v55, 4  ;;  %995 = vst [vmem:[#allocation2 + $0x48] sm:$0xf] %v994_v63  ;;  %996 = vst [vmem:[#allocation2 + $0x4c] sm:$0xf] %v735_v58  ;;  %v998_v61 = vsel %vm7809_vm3, %v736_v54, %v997_v62  ;;  %v6558_v23 = vpack.c.bf16 %v397_v35, %v397_v35  ;;  %v229_v1 = vld [vmem:[%s7805_s20 + $0x80] sm:$0xff] }
  0x76   : > { %v3144_v7 = vsel %vm7881_vm11, %v3139_v60, %v3143_v34  ;;  %v3149_v12 = vrot.slane %v3148_v57, 4  ;;  %999 = vst [vmem:[#allocation2 + $0x50] sm:$0x1] %v998_v61  ;;  %v6559_v16 = vpack.c.bf16 %v398_v2, %v398_v2  ;;  %v299_v21 = vadd.f32 %v8153_v49, %v263_v4 }
  0x77   : > { %v300_v20 = vadd.f32 %v8153_v49, %v264_v39  ;;  %v1280_v17 = vsel %vm7881_vm11, %v1275_v6, %v1279_v42  ;;  %v738_v30 = vshrl.u32 %v6558_v23, 16  ;;  %v741_v9 = vshll.u32 %v6558_v23, 16 }
  0x78   : > { %v452_v13 = vsel %vm7809_vm3, 0, %v451_v52  ;;  %v6171_v35 = vcombine.low %v1270_v53, %v1280_v17  ;;  %v3154_v10 = vsel %vm7881_vm11, %v3149_v12, %v3153_v48  ;;  %v746_v5 = vshrl.u32 %v6559_v16, 16 }
  0x79   : > { %v749_v8 = vshll.u32 %v6559_v16, 16  ;;  %453 = vst [vmem:[#allocation2 + $0x60] sm:$0x1] %v452_v13  ;;  %v6330_v4 = vcombine.low %v3144_v7, %v3154_v10  ;;  %v740_v39 = vrot.slane %v738_v30, 7  ;;  %vm331_vm1 = vcmp.ge.f32.partialorder %v299_v21, 0.0  ;;  %v7541_v13 = vld [vmem:[%s9689_s2 + $0x38] sm:$0xff]  }
  0x7a   : > { %vm332_vm2 = vcmp.ge.f32.partialorder %v300_v20, 0.0  ;;  %6819 = vmatmul.mubr.bf16.gmra.mrb[8].mxu1 %v6171_v35  ;;  %v748_v56 = vrot.slane %v746_v5, 7  ;;  %v367_v25 = vmul.f32 %v8166_v26, %v299_v21  ;;  %v368_v41 = vmul.f32 %v8166_v26, %v300_v20  ;;  %6856 = vmatprep.subr.bf16.mxu1 %v7541_v13 }
  0x7b   : > { %v508_v42 = vsel %vm7817_vm4, 0, %v507_v11  ;;  %7010 = vmatprep.mubr.bf16.mxu0 %v6330_v4  ;;  %v743_v31 = vor.u32 %v741_v9, %v740_v39  ;;  %v744_v24 = vrot.slane %v740_v39, 4  ;;  %v265_v43 = vmul.f32 %v8147_v47, %v229_v1  ;;  %v1004_v9 = vld [vmem:[#allocation2 + $0x5c] sm:$0x1]  ;;  %6857 = vmatpush3.bf16.msra.mxu1 %v7541_v13 }
  0x7c   : > { %509 = vst [vmem:[#allocation2 + $0x68] sm:$0x1] %v508_v42  ;;  %v8204_v45 = vmul.f32 %v8147_v47, %v230_v40  ;;  %v3002_v46 = vld [vmem:[#allocation2 + $0x48] sm:$0xf]  ;;  %v3003_v28 = vld [vmem:[#allocation2 + $0x4c] sm:$0xf]  ;;  %v751_v32 = vor.u32 %v749_v8, %v748_v56  ;;  %v399_v34 = vsel %vm331_vm1, %v299_v21, %v367_v25  ;;  %v400_v27 = vsel %vm332_vm2, %v300_v20, %v368_v41 }
  0x7d   : > { %v1082_v29 = vld [vmem:[#allocation2 + $0x48] sm:$0xf]  ;;  %v8209_v48 = vmul.f32 %v8147_v47, %v231_v33  ;;  %v3004_v50 = vld [vmem:[#allocation2 + $0x50] sm:$0x1]  ;;  %v3156_v62 = vshrl.u32 %v3002_v46, 16  ;;  %v3159_v52 = vshll.u32 %v3002_v46, 16  ;;  %v1001_v2 = vsel %vm7897_vm13, %v743_v31, %v1000_v15 }
  0x7e   : > { %v3165_v53 = vshll.u32 %v3003_v28, 16  ;;  %v3169_v55 = vshrl.u32 %v3003_v28, 16  ;;  %v3175_v60 = vshll.u32 %v3004_v50, 16  ;;  %v1083_v54 = vld [vmem:[#allocation2 + $0x4c] sm:$0xf]  ;;  %v1282_v58 = vshrl.u32 %v1082_v29, 16 }
  0x7f   : > { %v1124_v57 = vld [vmem:[#allocation2 + $0x50] sm:$0x1]  ;;  %v752_v63 = vsel %vm7905_vm15, %v744_v24, %v751_v32  ;;  %v3158_v6 = vrot.slane %v3156_v62, 4  ;;  %v3161_v7 = vrot.slane %v3159_v52, 5  ;;  %1002 = vst [vmem:[#allocation2 + $0x54] sm:$0xf] %v1001_v2  ;;  %v6560_v5 = vpack.c.bf16 %v399_v34, %v399_v34 }
  0x80   : > { %v3167_v61 = vrot.slane %v3165_v53, 5  ;;  %v3171_v23 = vrot.slane %v3169_v55, 4  ;;  %1003 = vst [vmem:[#allocation2 + $0x58] sm:$0xf] %v752_v63  ;;  %v3177_v11 = vrot.slane %v3175_v60, 5  ;;  %v1284_v12 = vrot.slane %v1282_v58, 4 }
  0x81   : > { %v1285_v16 = vshll.u32 %v1082_v29, 16  ;;  %v1291_v21 = vshll.u32 %v1083_v54, 16  ;;  %v3162_v20 = vor.u32 %v3161_v7, %v3158_v6  ;;  %v1295_v17 = vshrl.u32 %v1083_v54, 16  ;;  %v7545_v6 = vld [vmem:[%s9689_s2 + $0x80] sm:$0xff]  }
  0x82   : > { %v3172_v1 = vor.u32 %v3171_v23, %v3167_v61  ;;  %v1301_v30 = vshll.u32 %v1124_v57, 16  ;;  %v753_v10 = vrot.slane %v748_v56, 4  ;;  %v8220_v41 = vpack.c.bf16 %v400_v27, %v400_v27  ;;  %6890 = vmatprep.subr.bf16.mxu1 %v7545_v6 }
  0x83   : > { %v1287_v40 = vrot.slane %v1285_v16, 5  ;;  %v1293_v35 = vrot.slane %v1291_v21, 5  ;;  %v3163_v8 = vrot.slane %v3162_v20, 4  ;;  %v1297_v39 = vrot.slane %v1295_v17, 4 }
  0x84   : > { %v3173_v4 = vrot.slane %v3172_v1, 4  ;;  %v1303_v15 = vrot.slane %v1301_v30, 5  ;;  %v1005_v25 = vsel %vm7809_vm3, %v753_v10, %v1004_v9  ;;  %v755_v42 = vshrl.u32 %v6560_v5, 16  ;;  %v1007_v9 = vld [vmem:[#allocation2 + $0x60] sm:$0xf] }
  0x85   : > { %v1288_v33 = vor.u32 %v1287_v40, %v1284_v12  ;;  %v3168_v31 = vsel %vm7881_vm11, %v3163_v8, %v3167_v61  ;;  %v1298_v24 = vor.u32 %v1297_v39, %v1293_v35  ;;  %1006 = vst [vmem:[#allocation2 + $0x5c] sm:$0x1] %v1005_v25  ;;  %v758_v46 = vshll.u32 %v6560_v5, 16 }
  0x86   : > { %v3178_v56 = vsel %vm7881_vm11, %v3173_v4, %v3177_v11  ;;  %v1084_v32 = vld [vmem:[#allocation2 + $0x54] sm:$0xf]  ;;  %v8226_v50 = vrot.slane %v755_v42, 7  ;;  %v8229_v27 = vadd.f32 %v8153_v49, %v265_v43  ;;  %v763_v8 = vshrl.u32 %v8220_v41, 16 }
  0x87   : > { %v6331_v28 = vcombine.low %v3168_v31, %v3178_v56  ;;  %v1289_v29 = vrot.slane %v1288_v33, 4  ;;  %v1085_v34 = vld [vmem:[#allocation2 + $0x58] sm:$0xf]  ;;  %v1299_v62 = vrot.slane %v1298_v24, 4  ;;  %v1306_v52 = vshrl.u32 %v1084_v32, 16 }
  0x88   : > { %v1309_v53 = vshll.u32 %v1084_v32, 16  ;;  %v1315_v55 = vshll.u32 %v1085_v34, 16  ;;  %v3005_v60 = vld [vmem:[#allocation2 + $0x54] sm:$0xf]  ;;  %v1319_v57 = vshrl.u32 %v1085_v34, 16  ;;  %v760_v30 = vor.u32 %v758_v46, %v8226_v50 }
  0x89   : > { %7011 = vmatmul.mubr.bf16.gmra.mrb[8].mxu0 %v6331_v28  ;;  %v1294_v54 = vsel %vm7881_vm11, %v1289_v29, %v1293_v35  ;;  %v3006_v58 = vld [vmem:[#allocation2 + $0x58] sm:$0xf]  ;;  %v3180_v63 = vshrl.u32 %v3005_v60, 16  ;;  %v3183_v2 = vshll.u32 %v3005_v60, 16  ;;  %v1304_v43 = vsel %vm7881_vm11, %v1299_v62, %v1303_v15  ;;  %v1011_v32 = vld [vmem:[#allocation2 + $0x68] sm:$0x1] }
  0x8a   : > { %v1308_v7 = vrot.slane %v1306_v52, 4  ;;  %v1311_v61 = vrot.slane %v1309_v53, 5  ;;  %v1317_v23 = vrot.slane %v1315_v55, 5  ;;  %v6172_v11 = vcombine.low %v1294_v54, %v1304_v43  ;;  %v454_v34 = vld [vmem:[#allocation2 + $0x6c] sm:$0x1] }
  0x8b   : > { %v1321_v12 = vrot.slane %v1319_v57, 4  ;;  %v3182_v16 = vrot.slane %v3180_v63, 4  ;;  %v3185_v21 = vrot.slane %v3183_v2, 5  ;;  %v3189_v1 = vshll.u32 %v3006_v58, 16  ;;  %v3742_v63 = vld [vmem:[#allocation2 + $0x18] sm:$0xe] }
  0x8c   : > { %v1312_v20 = vor.u32 %v1311_v61, %v1308_v7  ;;  %v3193_v17 = vshrl.u32 %v3006_v58, 16  ;;  %6822 = vmatprep.mubr.bf16.mxu1 %v6172_v11  ;;  %v1125_v13 = vld [vmem:[#allocation2 + $0x5c] sm:$0x1]  ;;  %v761_v5 = vrot.slane %v8226_v50, 4  ;;  %v765_v56 = vrot.slane %v763_v8, 7 }
  0x8d   : > { %v1322_v40 = vor.u32 %v1321_v12, %v1317_v23  ;;  %v3007_v35 = vld [vmem:[#allocation2 + $0x5c] sm:$0x1]  ;;  %v3186_v10 = vor.u32 %v3185_v21, %v3182_v16  ;;  %v1325_v39 = vshll.u32 %v1125_v13, 16  ;;  %v3191_v15 = vrot.slane %v3189_v1, 5  ;;  %v510_v50 = vld [vmem:[#allocation2 + $0x74] sm:$0x1] }
  0x8e   : > { %v1313_v4 = vrot.slane %v1312_v20, 4  ;;  %v3195_v33 = vrot.slane %v3193_v17, 4  ;;  %v3199_v31 = vshll.u32 %v3007_v35, 16  ;;  %v766_v29 = vshll.u32 %v8220_v41, 16  ;;  %v3741_v58 = vld [vmem:[#allocation2 + $0xc] sm:$0xe] }
  0x8f   : > { %v1323_v25 = vrot.slane %v1322_v40, 4  ;;  %v3187_v42 = vrot.slane %v3186_v10, 4  ;;  %v1327_v46 = vrot.slane %v1325_v39, 5  ;;  %v770_v53 = vrot.slane %v765_v56, 4 }
  0x90   : > { %v1318_v24 = vsel %vm7881_vm11, %v1313_v4, %v1317_v23  ;;  %v3196_v28 = vor.u32 %v3195_v33, %v3191_v15  ;;  %v3201_v52 = vrot.slane %v3199_v31, 5  ;;  %v1008_v55 = vsel %vm7897_vm13, %v760_v30, %v1007_v9  ;;  %v232_v23 = vld [vmem:[%s7805_s20 + $0x98] sm:$0xff] }
  0x91   : > { %v3192_v62 = vsel %vm7881_vm11, %v3187_v42, %v3191_v15  ;;  %v1328_v60 = vsel %vm7881_vm11, %v1323_v25, %v1327_v46  ;;  %v768_v57 = vor.u32 %v766_v29, %v765_v56  ;;  %1009 = vst [vmem:[#allocation2 + $0x60] sm:$0xf] %v1008_v55  ;;  %v302_v41 = vadd.f32 %v8153_v49, %v8204_v45 }
  0x92   : > { %v3197_v54 = vrot.slane %v3196_v28, 4  ;;  %v6173_v2 = vcombine.low %v1318_v24, %v1328_v60  ;;  %v1012_v6 = vsel %vm7809_vm3, %v770_v53, %v1011_v32  ;;  %vm333_vm5 = vcmp.ge.f32.partialorder %v8229_v27, 0.0 }
  0x93   : > { %v369_v43 = vmul.f32 %v8166_v26, %v8229_v27  ;;  %v769_v61 = vsel %vm7905_vm15, %v761_v5, %v768_v57  ;;  %1013 = vst [vmem:[#allocation2 + $0x68] sm:$0x1] %v1012_v6  ;;  %vm334_vm6 = vcmp.ge.f32.partialorder %v302_v41, 0.0  ;;  %v370_v45 = vmul.f32 %v8166_v26, %v302_v41 }
  0x94   : > { %v3202_v7 = vsel %vm7881_vm11, %v3197_v54, %v3201_v52  ;;  %6823 = vmatmul.mubr.bf16.gmra.mrb[12].mxu1 %v6173_v2  ;;  %1010 = vst [vmem:[#allocation2 + $0x64] sm:$0xf] %v769_v61  ;;  %v455_v16 = vsel %vm7809_vm3, 0, %v454_v34  ;;  %v511_v21 = vsel %vm7817_vm4, 0, %v510_v50  ;;  %vm2165_vm8 = vcmask 1046532  }
  0x95   : > { %v6332_v11 = vcombine.low %v3192_v62, %v3202_v7  ;;  %v401_v12 = vsel %vm333_vm5, %v8229_v27, %v369_v43  ;;  %v402_v20 = vsel %vm334_vm6, %v302_v41, %v370_v45  ;;  %456 = vst [vmem:[#allocation2 + $0x6c] sm:$0x1] %v455_v16  ;;  %512 = vst [vmem:[#allocation2 + $0x74] sm:$0x1] %v511_v21  ;;  %v6350_v9 = vrot.slane %v3741_v58, 9 }
  0x96   : > { %v6562_v1 = vpack.c.bf16 %v401_v12, %v401_v12  ;;  %v6563_v17 = vpack.c.bf16 %v402_v20, %v402_v20  ;;  %vm8268_vm9 = vmor %vm2164_vm7, %vm2165_vm8  ;;  %v7630_v27 = vld [vmem:[#allocation2 + $0x10] sm:$0xf]  ;;  %v6351_v40 = vrot.slane %v3742_v63, 9  ;;  %v268_v8 = vmul.f32 %v8147_v47, %v232_v23  ;;  %v457_v16 = vld [vmem:[#allocation2 + $0x78] sm:$0x1] }
  0x97   : > { %7014 = vmatprep.mubr.bf16.mxu0 %v6332_v11  ;;  %v3807_v13 = vrot.slane %v7630_v27, 5  ;;  %v8277_v5 = vsel %vm8268_vm9, %v7993_v44, %v3817_v38  ;;  %v8296_v32 = vadd.f32 %v8153_v49, %v8209_v48 }
  0x98   : > { %v772_v35 = vshrl.u32 %v6562_v1, 16  ;;  %v775_v10 = vshll.u32 %v6562_v1, 16  ;;  %v3008_v4 = vld [vmem:[#allocation2 + $0x60] sm:$0xf]  ;;  %v780_v15 = vshrl.u32 %v6563_v17, 16  ;;  %v783_v33 = vshll.u32 %v6563_v17, 16 }
  0x99   : > { %v1086_v39 = vld [vmem:[#allocation2 + $0x60] sm:$0xf]  ;;  %v8282_v25 = vsel %vm8268_vm9, %v6350_v9, %v3807_v13  ;;  %v8288_v3 = vsel %vm8268_vm9, %v6351_v40, %v3814_v37  ;;  %v3204_v42 = vshrl.u32 %v3008_v4, 16  ;;  %v3207_v31 = vshll.u32 %v3008_v4, 16 }
  0x9a   : > { %v1330_v38 = vshrl.u32 %v1086_v39, 16  ;;  %v1333_v44 = vshll.u32 %v1086_v39, 16  ;;  %v8290_v56 = vld [vmem:[#allocation2 + $0x68] sm:$0x1]  ;;  %v774_v46 = vrot.slane %v772_v35, 7  ;;  %v782_v28 = vrot.slane %v780_v15, 7 }
  0x9b   : > { %v1126_v24 = vld [vmem:[#allocation2 + $0x68] sm:$0x1]  ;;  %v6383_v29 = vcombine.low %v8288_v3, %v8277_v5  ;;  %v8298_v59 = vld [vmem:[#allocation2 + $0x64] sm:$0xf]  ;;  %v3206_v37 = vrot.slane %v3204_v42, 4  ;;  %v3209_v34 = vrot.slane %v3207_v31, 5 }
  0x9c   : > { %v3223_v50 = vshll.u32 %v8290_v56, 16  ;;  %v1332_v62 = vrot.slane %v1330_v38, 4  ;;  %v3213_v52 = vshll.u32 %v8298_v59, 16  ;;  %v3217_v53 = vshrl.u32 %v8298_v59, 16  ;;  %v1087_v55 = vld [vmem:[#allocation2 + $0x64] sm:$0xf] }
  0x9d   : > { %v1335_v60 = vrot.slane %v1333_v44, 5  ;;  %v1349_v54 = vshll.u32 %v1126_v24, 16  ;;  %v3210_v57 = vor.u32 %v3209_v34, %v3206_v37  ;;  %v1339_v58 = vshll.u32 %v1087_v55, 16  ;;  %v1014_v7 = vld [vmem:[#allocation2 + $0x6c] sm:$0xf] }
  0x9e   : > { %v3225_v41 = vrot.slane %v3223_v50, 5  ;;  %v1343_v63 = vshrl.u32 %v1087_v55, 16  ;;  %v3215_v48 = vrot.slane %v3213_v52, 5  ;;  %v3219_v2 = vrot.slane %v3217_v53, 4  ;;  %v1018_v12 = vld [vmem:[#allocation2 + $0x74] sm:$0x1] }
  0x9f   : > { %v1336_v6 = vor.u32 %v1335_v60, %v1332_v62  ;;  %v1351_v43 = vrot.slane %v1349_v54, 5  ;;  %v3211_v61 = vrot.slane %v3210_v57, 4  ;;  %v1341_v45 = vrot.slane %v1339_v58, 5  ;;  %v513_v4 = vld [vmem:[#allocation2 + $0x80] sm:$0x1] }
  0xa0   : > { %v1345_v23 = vrot.slane %v1343_v63, 4  ;;  %v777_v11 = vor.u32 %v775_v10, %v774_v46  ;;  %v3220_v21 = vor.u32 %v3219_v2, %v3215_v48  ;;  %v778_v1 = vrot.slane %v774_v46, 4  ;;  %v460_v31 = vld [vmem:[#allocation2 + $0x84] sm:$0x1]  ;;  %v516_v46 = vld [vmem:[#allocation2 + $0x8c] sm:$0x1] }
  0xa1   : > { %v1337_v20 = vrot.slane %v1336_v6, 4  ;;  %v785_v17 = vor.u32 %v783_v33, %v782_v28  ;;  %v3216_v9 = vsel %vm7881_vm11, %v3211_v61, %v3215_v48  ;;  %v787_v40 = vrot.slane %v782_v28, 4  ;;  %v233_v33 = vld [vmem:[%s7805_s20 + $0xa0] sm:$0xff]  ;;  %v7631_v48 = vld [vmem:[#allocation2 + $0x28] sm:$0xf] }
  0xa2   : > { %v1346_v27 = vor.u32 %v1345_v23, %v1341_v45  ;;  %v1015_v35 = vsel %vm7897_vm13, %v777_v11, %v1014_v7  ;;  %v3221_v39 = vrot.slane %v3220_v21, 4  ;;  %v3809_v42 = vrot.slane %v3807_v13, 4  ;;  %v3743_v28 = vld [vmem:[#allocation2 + $0x24] sm:$0xe]  ;;  %v3744_v3 = vld [vmem:[#allocation2 + $0x30] sm:$0xe] }
  0xa3   : > { %v1342_v10 = vsel %vm7881_vm11, %v1337_v20, %v1341_v45  ;;  %v786_v15 = vsel %vm7905_vm15, %v778_v1, %v785_v17  ;;  %1016 = vst [vmem:[#allocation2 + $0x6c] sm:$0xf] %v1015_v35  ;;  %v1019_v44 = vsel %vm7809_vm3, %v787_v40, %v1018_v12  ;;  %v304_v24 = vadd.f32 %v8153_v49, %v268_v8  ;;  %v234_v8 = vld [vmem:[%s7805_s20 + $0xa8] sm:$0xff] }
  0xa4   : > { %v1347_v38 = vrot.slane %v1346_v27, 4  ;;  %1017 = vst [vmem:[#allocation2 + $0x70] sm:$0xf] %v786_v15  ;;  %vm335_vm10 = vcmp.ge.f32.partialorder %v8296_v32, 0.0  ;;  %v3226_v37 = vsel %vm7881_vm11, %v3221_v39, %v3225_v41  ;;  %1020 = vst [vmem:[#allocation2 + $0x74] sm:$0x1] %v1019_v44  ;;  %v3811_v13 = vsel %vm8268_vm9, %v3809_v42, %v3810_v51 }
  0xa5   : > { %v371_v34 = vmul.f32 %v8166_v26, %v8296_v32  ;;  %v458_v50 = vsel %vm7809_vm3, 0, %v457_v16  ;;  %v6333_v62 = vcombine.low %v3216_v9, %v3226_v37  ;;  %v6382_v53 = vcombine.low %v8282_v25, %v3811_v13 }
  0xa6   : > { %v1352_v52 = vsel %vm7881_vm11, %v1347_v38, %v1351_v43  ;;  %vm336_vm12 = vcmp.ge.f32.partialorder %v304_v24, 0.0  ;;  %459 = vst [vmem:[#allocation2 + $0x78] sm:$0x1] %v458_v50  ;;  %v372_v36 = vmul.f32 %v8166_v26, %v304_v24  ;;  %v514_v60 = vsel %vm7817_vm4, 0, %v513_v4  ;;  %v7538_v38 = vld [vmem:[%s9689_s2 + $0x188] sm:$0xff]  }
  0xa7   : > { %v6174_v55 = vcombine.low %v1342_v10, %v1352_v52  ;;  %v403_v51 = vsel %vm335_vm10, %v8296_v32, %v371_v34  ;;  %7015 = vmatmul.mubr.bf16.gmra.mrb[12].mxu0 %v6333_v62  ;;  %515 = vst [vmem:[#allocation2 + $0x80] sm:$0x1] %v514_v60  ;;  %v269_v57 = vmul.f32 %v8147_v47, %v233_v33  ;;  %v461_v25 = vsel %vm7809_vm3, 0, %v460_v31  ;;  %v235_v60 = vld [vmem:[%s7805_s20 + $0xb0] sm:$0xff] }
  0xa8   : > { %v6564_v54 = vpack.c.bf16 %v403_v51, %v403_v51  ;;  %v270_v41 = vmul.f32 %v8147_v47, %v234_v8  ;;  %7050 = vmatprep.mubr.bf16.mxu0 %v6382_v53  ;;  %v404_v58 = vsel %vm336_vm12, %v304_v24, %v372_v36  ;;  %462 = vst [vmem:[#allocation2 + $0x84] sm:$0x1] %v461_v25  ;;  %v517_v32 = vsel %vm7817_vm4, 0, %v516_v46  ;;  %v7632_v8 = vld [vmem:[%s9689_s2 + $0x180] sm:$0xff]   ;;  %v7633_v36 = vld [vmem:[#allocation2 + $0x2c] sm:$0x1] }
  0xa9   : > { %6826 = vmatprep.mubr.bf16.mxu1 %v6174_v55  ;;  %v6352_v63 = vrot.slane %v3743_v28, 9  ;;  %v3821_v2 = vrot.slane %v7631_v48, 5  ;;  %v6565_v43 = vpack.c.bf16 %v404_v58, %v404_v58  ;;  %v305_v45 = vadd.f32 %v8153_v49, %v269_v57  ;;  %518 = vst [vmem:[#allocation2 + $0x8c] sm:$0x1] %v517_v32  ;;  %v236_v58 = vld [vmem:[%s7805_s20 + $0xb8] sm:$0xff] }
  0xaa   : > { %v1088_v6 = vld [vmem:[#allocation2 + $0x6c] sm:$0xf]  ;;  %v789_v7 = vshrl.u32 %v6564_v54, 16  ;;  %v792_v61 = vshll.u32 %v6564_v54, 16  ;;  %v306_v16 = vadd.f32 %v8153_v49, %v270_v41  ;;  %v3824_v51 = vrot.slane %v7633_v36, 5  ;;  %v7540_v54 = vld [vmem:[%s9689_s2 + $0x190] sm:$0xff]  }
  0xab   : > { %v1089_v23 = vld [vmem:[#allocation2 + $0x70] sm:$0xf]  ;;  %v1354_v11 = vshrl.u32 %v1088_v6, 16  ;;  %v1357_v12 = vshll.u32 %v1088_v6, 16  ;;  %v8346_v21 = vsel %vm8268_vm9, %v6352_v63, %v3821_v2  ;;  %v1127_v20 = vld [vmem:[#allocation2 + $0x74] sm:$0x1]  ;;  %v373_v34 = vmul.f32 %v8166_v26, %v305_v45 }
  0xac   : > { %v1363_v1 = vshll.u32 %v1089_v23, 16  ;;  %v1367_v17 = vshrl.u32 %v1089_v23, 16  ;;  %v791_v9 = vrot.slane %v789_v7, 7  ;;  %v797_v27 = vshrl.u32 %v6565_v43, 16  ;;  %v463_v32 = vld [vmem:[#allocation2 + $0x90] sm:$0x1] }
  0xad   : > { %v1356_v40 = vrot.slane %v1354_v11, 4  ;;  %v1359_v35 = vrot.slane %v1357_v12, 5  ;;  %v1373_v4 = vshll.u32 %v1127_v20, 16  ;;  %v800_v39 = vshll.u32 %v6565_v43, 16  ;;  %v1021_v10 = vld [vmem:[#allocation2 + $0x78] sm:$0xf] }
  0xae   : > { %v1365_v15 = vrot.slane %v1363_v1, 5  ;;  %v1369_v42 = vrot.slane %v1367_v17, 4  ;;  %v794_v33 = vor.u32 %v792_v61, %v791_v9  ;;  %v795_v31 = vrot.slane %v791_v9, 4  ;;  %v1025_v13 = vld [vmem:[#allocation2 + $0x80] sm:$0x1]  ;;  %v8381_v43 = vld [vmem:[%s9689_s2 + $0x198] sm:$0xff]  }
  0xaf   : > { %v1360_v44 = vor.u32 %v1359_v35, %v1356_v40  ;;  %v1375_v24 = vrot.slane %v1373_v4, 5  ;;  %v799_v46 = vrot.slane %v797_v27, 7  ;;  %vm337_vm14 = vcmp.ge.f32.partialorder %v305_v45, 0.0  ;;  %7051 = vmatmul.mubr.bf16.vlgmr.msra.gmra.mrb[0].mxu0 %v6383_v29  ;;  %v7634_v23 = vld [vmem:[#allocation2 + $0x34] sm:$0xf] }
  0xb0   : > { %v1370_v28 = vor.u32 %v1369_v42, %v1365_v15  ;;  %v1022_v37 = vsel %vm7897_vm13, %v794_v33, %v1021_v10  ;;  %vm338_vm1 = vcmp.ge.f32.partialorder %v306_v16, 0.0  ;;  %7083 = vmatpush3.bf16.msra.mxu0 %v7632_v8  ;;  %v374_v5 = vmul.f32 %v8166_v26, %v306_v16  ;;  %v7635_v27 = vld [vmem:[#allocation2 + $0x38] sm:$0x1] }
  0xb1   : > { %v1361_v50 = vrot.slane %v1360_v44, 4  ;;  %v802_v62 = vor.u32 %v800_v39, %v799_v46  ;;  %v804_v52 = vrot.slane %v799_v46, 4  ;;  %1023 = vst [vmem:[#allocation2 + $0x78] sm:$0xf] %v1022_v37  ;;  %v405_v53 = vsel %vm337_vm14, %v305_v45, %v373_v34  ;;  %7084 = vmatprep.subr.bf16.mxu0 %v7538_v38  ;;  %v519_v34 = vld [vmem:[#allocation2 + $0x98] sm:$0x1] }
  0xb2   : > { %v1371_v29 = vrot.slane %v1370_v28, 4  ;;  %v3823_v55 = vrot.slane %v3821_v2, 4  ;;  %v406_v25 = vsel %vm338_vm1, %v306_v16, %v374_v5  ;;  %v6566_v48 = vpack.c.bf16 %v405_v53, %v405_v53  ;;  %v8400_v5 = vld [vmem:[%s9688_s1 + $0x1] ss:$0 sm:$0xff] }
  0xb3   : > { %v1366_v57 = vsel %vm7881_vm11, %v1361_v50, %v1365_v15  ;;  %v803_v41 = vsel %vm7905_vm15, %v795_v31, %v802_v62  ;;  %v1026_v26 = vsel %vm7809_vm3, %v804_v52, %v1025_v13  ;;  %v6567_v2 = vpack.c.bf16 %v406_v25, %v406_v25  ;;  %v1028_v31 = vld [vmem:[#allocation2 + $0x84] sm:$0xf]  ;;  %v1032_v13 = vld [vmem:[#allocation2 + $0x8c] sm:$0x1] }
  0xb4   : > { %v1376_v63 = vsel %vm7881_vm11, %v1371_v29, %v1375_v24  ;;  %1024 = vst [vmem:[#allocation2 + $0x7c] sm:$0xf] %v803_v41  ;;  %1027 = vst [vmem:[#allocation2 + $0x80] sm:$0x1] %v1026_v26  ;;  %v3825_v6 = vsel %vm8268_vm9, %v3823_v55, %v3824_v51  ;;  %v6353_v45 = vrot.slane %v3744_v3, 9  ;;  %v3828_v11 = vrot.slane %v7634_v23, 5  ;;  %7085 = vmatpush3.bf16.msra.mxu0 %v7538_v38 }
  0xb5   : > { %v6175_v7 = vcombine.low %v1366_v57, %v1376_v63  ;;  %v6384_v61 = vcombine.low %v8346_v21, %v3825_v6  ;;  %v806_v12 = vshrl.u32 %v6566_v48, 16  ;;  %v809_v16 = vshll.u32 %v6566_v48, 16  ;;  %7086 = vmatprep.subr.bf16.mxu0 %v7540_v54  ;;  %v7546_v24 = vld [vmem:[%s9689_s2 + $0x1a0] sm:$0xff]  }
  0xb6   : > { %v814_v20 = vshrl.u32 %v6567_v2, 16  ;;  %v817_v1 = vshll.u32 %v6567_v2, 16  ;;  %v3829_v17 = vsel %vm8268_vm9, %v6353_v45, %v3828_v11  ;;  %v3830_v9 = vrot.slane %v3828_v11, 4  ;;  %v237_v29 = vld [vmem:[%s7805_s20 + $0xc0] sm:$0xff] }
  0xb7   : > { %6827 = vmatmul.mubr.bf16.gmra.mrb[16].mxu1 %v6175_v7  ;;  %7054 = vmatprep.mubr.bf16.mxu0 %v6384_v61  ;;  %v3831_v40 = vrot.slane %v7635_v27, 5  ;;  %v271_v35 = vmul.f32 %v8147_v47, %v235_v60  ;;  %v808_v4 = vrot.slane %v806_v12, 7  ;;  %v272_v10 = vmul.f32 %v8147_v47, %v236_v58  ;;  %v238_v60 = vld [vmem:[%s7805_s20 + $0xc8] sm:$0xff]  ;;  %v522_v25 = vld [vmem:[#allocation2 + $0xa4] sm:$0x1] }
  0xb8   : > { %v1090_v21 = vld [vmem:[#allocation2 + $0x78] sm:$0xf]  ;;  %v816_v39 = vrot.slane %v814_v20, 7  ;;  %v464_v15 = vsel %vm7809_vm3, 0, %v463_v32  ;;  %7087 = vmatpush3.bf16.msra.mxu0 %v7540_v54  ;;  %v466_v54 = vld [vmem:[#allocation2 + $0x9c] sm:$0x1] }
  0xb9   : > { %v1378_v42 = vshrl.u32 %v1090_v21, 16  ;;  %v1381_v33 = vshll.u32 %v1090_v21, 16  ;;  %v3832_v38 = vsel %vm8268_vm9, %v3830_v9, %v3831_v40  ;;  %v307_v44 = vadd.f32 %v8153_v49, %v271_v35  ;;  %465 = vst [vmem:[#allocation2 + $0x90] sm:$0x1] %v464_v15  ;;  %7088 = vmatprep.subr.bf16.mxu0 %v8381_v43  ;;  %v7550_v58 = vld [vmem:[%s9689_s2 + $0x1a8] sm:$0xff]  }
  0xba   : > { %v811_v46 = vor.u32 %v809_v16, %v808_v4  ;;  %v812_v47 = vrot.slane %v808_v4, 4  ;;  %v819_v28 = vor.u32 %v817_v1, %v816_v39  ;;  %v821_v37 = vrot.slane %v816_v39, 4  ;;  %v8418_v6 = vld [vmem:[%s9688_s1 + $0x2] ss:$0 sm:$0xff]  ;;  %v8433_v20 = vld [vmem:[#allocation2 + $0x3c] sm:$0xe] }
  0xbb   : > { %v1091_v50 = vld [vmem:[#allocation2 + $0x7c] sm:$0xf]  ;;  %v1128_v8 = vld [vmem:[#allocation2 + $0x80] sm:$0x1]  ;;  %v1380_v62 = vrot.slane %v1378_v42, 4  ;;  %v1383_v49 = vrot.slane %v1381_v33, 5  ;;  %v6385_v52 = vcombine.low %v3829_v17, %v3832_v38  ;;  %v308_v3 = vadd.f32 %v8400_v5, %v272_v10 }
  0xbc   : > { %v1387_v53 = vshll.u32 %v1091_v50, 16  ;;  %v1391_v55 = vshrl.u32 %v1091_v50, 16  ;;  %v1397_v36 = vshll.u32 %v1128_v8, 16  ;;  %v820_v51 = vsel %vm7905_vm15, %v812_v47, %v819_v28  ;;  %7089 = vmatpush3.bf16.msra.mxu0 %v8381_v43  ;;  %v8427_v43 = vld [vmem:[%s9688_s1] ss:$0 sm:$0xff]  ;;  %v7554_v38 = vld [vmem:[%s9689_s2 + $0x1b0] sm:$0xff]  }
  0xbd   : > { %v1384_v57 = vor.u32 %v1383_v49, %v1380_v62  ;;  %v1029_v41 = vsel %vm7897_vm13, %v811_v46, %v1028_v31  ;;  %1031 = vst [vmem:[#allocation2 + $0x88] sm:$0xf] %v820_v51  ;;  %v1033_v26 = vsel %vm7809_vm3, %v821_v37, %v1032_v13  ;;  %7055 = vmatmul.mubr.bf16.gmra.mrb[4].mxu0 %v6385_v52  ;;  %vm339_vm2 = vcmp.ge.f32.partialorder %v307_v44, 0.0  ;;  %v7639_v15 = vld [vmem:[#allocation2 + $0x40] sm:$0xf] }
  0xbe   : > { %v1389_v32 = vrot.slane %v1387_v53, 5  ;;  %v1393_v63 = vrot.slane %v1391_v55, 4  ;;  %v1399_v48 = vrot.slane %v1397_v36, 5  ;;  %1030 = vst [vmem:[#allocation2 + $0x84] sm:$0xf] %v1029_v41  ;;  %vm340_vm5 = vcmp.ge.f32.partialorder %v308_v3, 0.0  ;;  %7090 = vmatprep.subr.bf16.mxu0 %v7546_v24 }
  0xbf   : > { %1034 = vst [vmem:[#allocation2 + $0x8c] sm:$0x1] %v1033_v26  ;;  %v1385_v2 = vrot.slane %v1384_v57, 4  ;;  %v375_v7 = vmul.f32 %v8418_v6, %v307_v44  ;;  %v376_v61 = vmul.f32 %v8418_v6, %v308_v3  ;;  %v520_v45 = vsel %vm7817_vm4, 0, %v519_v34  ;;  %v8446_v33 = vld [vmem:[#allocation2 + $0x44] sm:$0x1] }
  0xc0   : > { %v1394_v23 = vor.u32 %v1393_v63, %v1389_v32  ;;  %521 = vst [vmem:[#allocation2 + $0x98] sm:$0x1] %v520_v45  ;;  %v273_v11 = vmul.f32 %v8427_v43, %v237_v29  ;;  %v274_v12 = vmul.f32 %v8427_v43, %v238_v60  ;;  %v467_v16 = vsel %vm7809_vm3, 0, %v466_v54  ;;  %7091 = vmatpush3.bf16.msra.mxu0 %v7546_v24  ;;  %v7558_v53 = vld [vmem:[%s9689_s2 + $0x1b8] sm:$0xff]   ;;  %v1035_v54 = vld [vmem:[#allocation2 + $0x90] sm:$0xf] }
  0xc1   : > { %v1390_v1 = vsel %vm7881_vm11, %v1385_v2, %v1389_v32  ;;  %v407_v17 = vsel %vm339_vm2, %v307_v44, %v375_v7  ;;  %v408_v9 = vsel %vm340_vm5, %v308_v3, %v376_v61  ;;  %468 = vst [vmem:[#allocation2 + $0x9c] sm:$0x1] %v467_v16  ;;  %v523_v27 = vsel %vm7817_vm4, 0, %v522_v25  ;;  %7092 = vmatprep.subr.bf16.mxu0 %v7550_v58  ;;  %v3746_v45 = vld [vmem:[#allocation2 + $0x48] sm:$0xe] }
  0xc2   : > { %v1395_v40 = vrot.slane %v1394_v23, 4  ;;  %v6568_v35 = vpack.c.bf16 %v407_v17, %v407_v17  ;;  %v6569_v21 = vpack.c.bf16 %v408_v9, %v408_v9  ;;  %v309_v4 = vadd.f32 %v8400_v5, %v273_v11  ;;  %524 = vst [vmem:[#allocation2 + $0xa4] sm:$0x1] %v523_v27 }
  0xc3   : > { %v8443_v39 = vadd.f32 %v8400_v5, %v274_v12  ;;  %v6354_v10 = vrot.slane %v8433_v20, 9  ;;  %v3835_v42 = vrot.slane %v7639_v15, 5  ;;  %v3838_v31 = vrot.slane %v8446_v33, 5  ;;  %v8478_v20 = vld [vmem:[%s9689_s2 + $0x1c0] sm:$0xff]  }
  0xc4   : > { %v1400_v44 = vsel %vm7881_vm11, %v1395_v40, %v1399_v48  ;;  %v8454_v24 = vld [vmem:[#allocation2 + $0x88] sm:$0xf]  ;;  %v823_v46 = vshrl.u32 %v6568_v35, 16  ;;  %v826_v47 = vshll.u32 %v6568_v35, 16  ;;  %v831_v28 = vshrl.u32 %v6569_v21, 16  ;;  %7093 = vmatpush3.bf16.msra.mxu0 %v7550_v58  ;;  %v239_v40 = vld [vmem:[%s7805_s20 + $0xd0] sm:$0xff] }
  0xc5   : > { %v6176_v37 = vcombine.low %v1390_v1, %v1400_v44  ;;  %v8456_v13 = vld [vmem:[#allocation2 + $0x84] sm:$0xf]  ;;  %v1411_v50 = vshll.u32 %v8454_v24, 16  ;;  %v1415_v8 = vshrl.u32 %v8454_v24, 16  ;;  %v377_v62 = vmul.f32 %v8418_v6, %v309_v4  ;;  %7094 = vmatprep.subr.bf16.mxu0 %v7554_v38  ;;  %v240_v44 = vld [vmem:[%s7805_s20 + $0xd8] sm:$0xff] }
  0xc6   : > { %v1129_v34 = vld [vmem:[#allocation2 + $0x8c] sm:$0x1]  ;;  %v1402_v49 = vshrl.u32 %v8456_v13, 16  ;;  %v1405_v52 = vshll.u32 %v8456_v13, 16  ;;  %v825_v29 = vrot.slane %v823_v46, 7  ;;  %v833_v51 = vrot.slane %v831_v28, 7 }
  0xc7   : > { %v1421_v3 = vshll.u32 %v1129_v34, 16  ;;  %6830 = vmatprep.mubr.bf16.mxu1 %v6176_v37  ;;  %v1413_v55 = vrot.slane %v1411_v50, 5  ;;  %v1417_v36 = vrot.slane %v1415_v8, 4  ;;  %v834_v60 = vshll.u32 %v6569_v21, 16  ;;  %v1039_v32 = vld [vmem:[#allocation2 + $0x98] sm:$0x1] }
  0xc8   : > { %v1404_v57 = vrot.slane %v1402_v49, 4  ;;  %v1407_v41 = vrot.slane %v1405_v52, 5  ;;  %v828_v25 = vor.u32 %v826_v47, %v825_v29  ;;  %v829_v48 = vrot.slane %v825_v29, 4  ;;  %7095 = vmatpush3.bf16.msra.mxu0 %v7554_v38  ;;  %v469_v46 = vld [vmem:[#allocation2 + $0xa8] sm:$0x1]  ;;  %v241_v34 = vld [vmem:[%s7805_s20 + $0xe0] sm:$0xff] }
  0xc9   : > { %v1423_v26 = vrot.slane %v1421_v3, 5  ;;  %v1418_v63 = vor.u32 %v1417_v36, %v1413_v55  ;;  %v836_v2 = vor.u32 %v834_v60, %v833_v51  ;;  %v838_v58 = vrot.slane %v833_v51, 4  ;;  %7096 = vmatprep.subr.bf16.mxu0 %v7558_v53  ;;  %v525_v47 = vld [vmem:[#allocation2 + $0xb0] sm:$0x1] }
  0xca   : > { %v1408_v7 = vor.u32 %v1407_v41, %v1404_v57  ;;  %v1036_v61 = vsel %vm7897_vm13, %v828_v25, %v1035_v54  ;;  %vm341_vm6 = vcmp.ge.f32.partialorder %v309_v4, 0.0  ;;  %vm342_vm7 = vcmp.ge.f32.partialorder %v8443_v39, 0.0 }
  0xcb   : > { %v1419_v23 = vrot.slane %v1418_v63, 4  ;;  %v837_v11 = vsel %vm7905_vm15, %v829_v48, %v836_v2  ;;  %1037 = vst [vmem:[#allocation2 + $0x90] sm:$0xf] %v1036_v61  ;;  %v1040_v12 = vsel %vm7809_vm3, %v838_v58, %v1039_v32  ;;  %v378_v16 = vmul.f32 %v8418_v6, %v8443_v39 }
  0xcc   : > { %v1409_v1 = vrot.slane %v1408_v7, 4  ;;  %1038 = vst [vmem:[#allocation2 + $0x94] sm:$0xf] %v837_v11  ;;  %1041 = vst [vmem:[#allocation2 + $0x98] sm:$0x1] %v1040_v12  ;;  %v409_v17 = vsel %vm341_vm6, %v309_v4, %v377_v62  ;;  %v3836_v9 = vsel %vm8268_vm9, %v6354_v10, %v3835_v42  ;;  %v3837_v27 = vrot.slane %v3835_v42, 4  ;;  %7097 = vmatpush3.bf16.msra.mxu0 %v7558_v53 }
  0xcd   : > { %v1424_v35 = vsel %vm7881_vm11, %v1419_v23, %v1423_v26  ;;  %v410_v21 = vsel %vm342_vm7, %v8443_v39, %v378_v16  ;;  %v6570_v15 = vpack.c.bf16 %v409_v17, %v409_v17  ;;  %v6355_v38 = vrot.slane %v3746_v45, 9  ;;  %v7641_v42 = vld [vmem:[#allocation2 + $0x4c] sm:$0xf]  ;;  %7130 = vmatprep.subr.bf16.mxu0 %v8478_v20  ;;  %v1046_v11 = vld [vmem:[#allocation2 + $0xa4] sm:$0x1] }
  0xce   : > { %v1414_v4 = vsel %vm7881_vm11, %v1409_v1, %v1413_v55  ;;  %v6571_v28 = vpack.c.bf16 %v410_v21, %v410_v21  ;;  %v3839_v10 = vsel %vm8268_vm9, %v3837_v27, %v3838_v31  ;;  %v3842_v37 = vrot.slane %v7641_v42, 5  ;;  %v1042_v55 = vld [vmem:[#allocation2 + $0x9c] sm:$0xf]  ;;  %v7642_v31 = vld [vmem:[#allocation2 + $0x50] sm:$0x1] }
  0xcf   : > { %v6177_v50 = vcombine.low %v1414_v4, %v1424_v35  ;;  %v840_v39 = vshrl.u32 %v6570_v15, 16  ;;  %v843_v8 = vshll.u32 %v6570_v15, 16  ;;  %v6386_v62 = vcombine.low %v3836_v9, %v3839_v10  ;;  %v242_v9 = vld [vmem:[%s7805_s20 + $0xe8] sm:$0xff]  ;;  %v472_v27 = vld [vmem:[#allocation2 + $0xb4] sm:$0x1] }
  0xd0   : > { %v848_v49 = vshrl.u32 %v6571_v28, 16  ;;  %v851_v52 = vshll.u32 %v6571_v28, 16  ;;  %v3843_v3 = vsel %vm8268_vm9, %v6355_v38, %v3842_v37  ;;  %v3844_v29 = vrot.slane %v3842_v37, 4  ;;  %v528_v38 = vld [vmem:[#allocation2 + $0xbc] sm:$0x1] }
  0xd1   : > { %6831 = vmatmul.mubr.bf16.gmra.mrb[20].mxu1 %v6177_v50  ;;  %v842_v33 = vrot.slane %v840_v39, 7  ;;  %7058 = vmatprep.mubr.bf16.mxu0 %v6386_v62  ;;  %v3845_v36 = vrot.slane %v7642_v31, 5  ;;  %v275_v53 = vmul.f32 %v8427_v43, %v239_v40  ;;  %v276_v51 = vmul.f32 %v8427_v43, %v240_v44 }
  0xd2   : > { %v8501_v60 = vld [vmem:[#allocation2 + $0x90] sm:$0xf]  ;;  %v850_v54 = vrot.slane %v848_v49, 7  ;;  %v470_v57 = vsel %vm7809_vm3, 0, %v469_v46  ;;  %v526_v41 = vsel %vm7817_vm4, 0, %v525_v47  ;;  %v277_v26 = vmul.f32 %v8427_v43, %v241_v34 }
  0xd3   : > { %v8508_v25 = vld [vmem:[#allocation2 + $0x94] sm:$0xf]  ;;  %v1130_v32 = vld [vmem:[#allocation2 + $0x98] sm:$0x1]  ;;  %v1426_v63 = vshrl.u32 %v8501_v60, 16  ;;  %v1429_v48 = vshll.u32 %v8501_v60, 16  ;;  %v845_v2 = vor.u32 %v843_v8, %v842_v33  ;;  %v3846_v58 = vsel %vm8268_vm9, %v3844_v29, %v3845_v36 }
  0xd4   : > { %471 = vst [vmem:[#allocation2 + $0xa8] sm:$0x1] %v470_v57  ;;  %527 = vst [vmem:[#allocation2 + $0xb0] sm:$0x1] %v526_v41  ;;  %v1435_v7 = vshll.u32 %v8508_v25, 16  ;;  %v1439_v61 = vshrl.u32 %v8508_v25, 16  ;;  %v853_v1 = vor.u32 %v851_v52, %v850_v54  ;;  %v6387_v4 = vcombine.low %v3843_v3, %v3846_v58 }
  0xd5   : > { %v1445_v45 = vshll.u32 %v1130_v32, 16  ;;  %v846_v23 = vrot.slane %v842_v33, 4  ;;  %v1428_v12 = vrot.slane %v1426_v63, 4  ;;  %v1431_v16 = vrot.slane %v1429_v48, 5  ;;  %v8532_v52 = vld [vmem:[#allocation2 + $0x54] sm:$0xe] }
  0xd6   : > { %v855_v17 = vrot.slane %v850_v54, 4  ;;  %v1437_v40 = vrot.slane %v1435_v7, 5  ;;  %v1441_v35 = vrot.slane %v1439_v61, 4  ;;  %v1043_v15 = vsel %vm7897_vm13, %v845_v2, %v1042_v55  ;;  %7059 = vmatmul.mubr.bf16.gmra.mrb[8].mxu0 %v6387_v4  ;;  %v7643_v63 = vld [vmem:[#allocation2 + $0x58] sm:$0xf] }
  0xd7   : > { %v1447_v21 = vrot.slane %v1445_v45, 5  ;;  %v1432_v44 = vor.u32 %v1431_v16, %v1428_v12  ;;  %v854_v46 = vsel %vm7905_vm15, %v846_v23, %v853_v1  ;;  %1044 = vst [vmem:[#allocation2 + $0x9c] sm:$0xf] %v1043_v15  ;;  %v311_v10 = vadd.f32 %v8400_v5, %v275_v53 }
  0xd8   : > { %v1047_v47 = vsel %vm7809_vm3, %v855_v17, %v1046_v11  ;;  %v1442_v28 = vor.u32 %v1441_v35, %v1437_v40  ;;  %1045 = vst [vmem:[#allocation2 + $0xa0] sm:$0xf] %v854_v46  ;;  %v312_v42 = vadd.f32 %v8400_v5, %v276_v51  ;;  %v278_v37 = vmul.f32 %v8427_v43, %v242_v9 }
  0xd9   : > { %1048 = vst [vmem:[#allocation2 + $0xa4] sm:$0x1] %v1047_v47  ;;  %v1433_v34 = vrot.slane %v1432_v44, 4  ;;  %v313_v50 = vadd.f32 %v8400_v5, %v277_v26  ;;  %v473_v39 = vsel %vm7809_vm3, 0, %v472_v27  ;;  %v529_v8 = vsel %vm7817_vm4, 0, %v528_v38 }
  0xda   : > { %v1443_v62 = vrot.slane %v1442_v28, 4  ;;  %vm343_vm8 = vcmp.ge.f32.partialorder %v311_v10, 0.0  ;;  %vm344_vm10 = vcmp.ge.f32.partialorder %v312_v42, 0.0  ;;  %v379_v49 = vmul.f32 %v8418_v6, %v311_v10  ;;  %474 = vst [vmem:[#allocation2 + $0xb4] sm:$0x1] %v473_v39 }
  0xdb   : > { %530 = vst [vmem:[#allocation2 + $0xbc] sm:$0x1] %v529_v8  ;;  %v1438_v3 = vsel %vm7881_vm11, %v1433_v34, %v1437_v40  ;;  %v380_v29 = vmul.f32 %v8418_v6, %v312_v42  ;;  %v314_v33 = vadd.f32 %v8400_v5, %v278_v37  ;;  %vm345_vm12 = vcmp.ge.f32.partialorder %v313_v50, 0.0  ;;  %v1049_v4 = vld [vmem:[#allocation2 + $0xa8] sm:$0xf] }
  0xdc   : > { %v1448_v55 = vsel %vm7881_vm11, %v1443_v62, %v1447_v21  ;;  %v411_v31 = vsel %vm343_vm8, %v311_v10, %v379_v49  ;;  %v381_v36 = vmul.f32 %v8418_v6, %v313_v50  ;;  %v6356_v57 = vrot.slane %v8532_v52, 9  ;;  %v1053_v34 = vld [vmem:[#allocation2 + $0xb0] sm:$0x1] }
  0xdd   : > { %v6178_v53 = vcombine.low %v1438_v3, %v1448_v55  ;;  %v412_v51 = vsel %vm344_vm10, %v312_v42, %v380_v29  ;;  %v6572_v54 = vpack.c.bf16 %v411_v31, %v411_v31  ;;  %vm346_vm14 = vcmp.ge.f32.partialorder %v314_v33, 0.0 }
  0xde   : > { %v8542_v41 = vld [vmem:[#allocation2 + $0x9c] sm:$0xf]  ;;  %v6573_v26 = vpack.c.bf16 %v412_v51, %v412_v51  ;;  %v413_v32 = vsel %vm345_vm12, %v313_v50, %v381_v36  ;;  %v3849_v48 = vrot.slane %v7643_v63, 5  ;;  %v382_v45 = vmul.f32 %v8418_v6, %v314_v33  ;;  %v3748_v51 = vld [vmem:[#allocation2 + $0x60] sm:$0xe] }
  0xdf   : > { %6834 = vmatprep.mubr.bf16.mxu1 %v6178_v53  ;;  %v8544_v2 = vld [vmem:[#allocation2 + $0xa0] sm:$0xf]  ;;  %v1450_v7 = vshrl.u32 %v8542_v41, 16  ;;  %v1453_v61 = vshll.u32 %v8542_v41, 16  ;;  %v6574_v23 = vpack.c.bf16 %v413_v32, %v413_v32  ;;  %v857_v1 = vshrl.u32 %v6572_v54, 16 }
  0xe0   : > { %v1131_v58 = vld [vmem:[#allocation2 + $0xa4] sm:$0x1]  ;;  %v1459_v11 = vshll.u32 %v8544_v2, 16  ;;  %v1463_v12 = vshrl.u32 %v8544_v2, 16  ;;  %v860_v27 = vshll.u32 %v6572_v54, 16  ;;  %v865_v40 = vshrl.u32 %v6573_v26, 16 }
  0xe1   : > { %v1469_v16 = vshll.u32 %v1131_v58, 16  ;;  %v1452_v17 = vrot.slane %v1450_v7, 4  ;;  %v1455_v9 = vrot.slane %v1453_v61, 5  ;;  %v859_v38 = vrot.slane %v857_v1, 7  ;;  %v1056_v63 = vld [vmem:[#allocation2 + $0xb4] sm:$0xf] }
  0xe2   : > { %v1461_v35 = vrot.slane %v1459_v11, 5  ;;  %v1465_v21 = vrot.slane %v1463_v12, 4  ;;  %v867_v46 = vrot.slane %v865_v40, 7  ;;  %v868_v47 = vshll.u32 %v6573_v26, 16  ;;  %v3749_v12 = vld [vmem:[#allocation2 + $0x6c] sm:$0xe] }
  0xe3   : > { %v1471_v15 = vrot.slane %v1469_v16, 5  ;;  %v1456_v44 = vor.u32 %v1455_v9, %v1452_v17  ;;  %v414_v28 = vsel %vm346_vm14, %v314_v33, %v382_v45  ;;  %v862_v42 = vor.u32 %v860_v27, %v859_v38  ;;  %v7644_v17 = vld [vmem:[#allocation2 + $0x5c] sm:$0x1]  ;;  %v3012_v40 = vld [vmem:[#allocation2 + $0x70] sm:$0xf] }
  0xe4   : > { %v1466_v10 = vor.u32 %v1465_v21, %v1461_v35  ;;  %v863_v37 = vrot.slane %v859_v38, 4  ;;  %v6575_v50 = vpack.c.bf16 %v414_v28, %v414_v28  ;;  %v870_v8 = vor.u32 %v868_v47, %v867_v46 }
  0xe5   : > { %v1457_v39 = vrot.slane %v1456_v44, 4  ;;  %v872_v62 = vrot.slane %v867_v46, 4  ;;  %v874_v49 = vshrl.u32 %v6574_v23, 16  ;;  %v1050_v3 = vsel %vm7897_vm13, %v862_v42, %v1049_v4 }
  0xe6   : > { %v1467_v52 = vrot.slane %v1466_v10, 4  ;;  %v877_v29 = vshll.u32 %v6574_v23, 16  ;;  %v882_v55 = vshrl.u32 %v6575_v50, 16  ;;  %v871_v33 = vsel %vm7905_vm15, %v863_v37, %v870_v8  ;;  %1051 = vst [vmem:[#allocation2 + $0xa8] sm:$0xf] %v1050_v3 }
  0xe7   : > { %v1462_v31 = vsel %vm7881_vm11, %v1457_v39, %v1461_v35  ;;  %v1054_v36 = vsel %vm7809_vm3, %v872_v62, %v1053_v34  ;;  %v876_v53 = vrot.slane %v874_v49, 7  ;;  %1052 = vst [vmem:[#allocation2 + $0xac] sm:$0xf] %v871_v33  ;;  %v885_v32 = vshll.u32 %v6575_v50, 16  ;;  %v1060_v23 = vld [vmem:[#allocation2 + $0xbc] sm:$0x1] }
  0xe8   : > { %v1472_v54 = vsel %vm7881_vm11, %v1467_v52, %v1471_v15  ;;  %1055 = vst [vmem:[#allocation2 + $0xb0] sm:$0x1] %v1054_v36  ;;  %v884_v26 = vrot.slane %v882_v55, 7  ;;  %v3850_v58 = vsel %vm8268_vm9, %v6356_v57, %v3849_v48  ;;  %v3851_v11 = vrot.slane %v3849_v48, 4  ;;  %v3013_v15 = vld [vmem:[#allocation2 + $0x74] sm:$0x1] }
  0xe9   : > { %v6179_v7 = vcombine.low %v1462_v31, %v1472_v54  ;;  %v879_v61 = vor.u32 %v877_v29, %v876_v53  ;;  %v880_v45 = vrot.slane %v876_v53, 4  ;;  %v3852_v9 = vrot.slane %v7644_v17, 5  ;;  %v3750_v53 = vld [vmem:[#allocation2 + $0x78] sm:$0xe] }
  0xea   : > { %v887_v16 = vor.u32 %v885_v32, %v884_v26  ;;  %v889_v1 = vrot.slane %v884_v26, 4  ;;  %v6357_v27 = vrot.slane %v3748_v51, 9  ;;  %v3856_v21 = vrot.slane %v8298_v59, 5 }
  0xeb   : > { %6835 = vmatmul.mubr.bf16.gmra.mrb[24].mxu1 %v6179_v7  ;;  %v1057_v35 = vsel %vm7897_vm13, %v879_v61, %v1056_v63  ;;  %v3859_v57 = vrot.slane %v8290_v56, 5  ;;  %v3853_v44 = vsel %vm8268_vm9, %v3851_v11, %v3852_v9  ;;  %v6358_v46 = vrot.slane %v3749_v12, 9  ;;  %v8592_v63 = vld [vmem:[#allocation2 + $0x7c] sm:$0xf]  ;;  %v8600_v9 = vld [vmem:[#allocation2 + $0x80] sm:$0x1] }
  0xec   : > { %v888_v38 = vsel %vm7905_vm15, %v880_v45, %v887_v16  ;;  %1058 = vst [vmem:[#allocation2 + $0xb4] sm:$0xf] %v1057_v35  ;;  %v1061_v48 = vsel %vm7809_vm3, %v889_v1, %v1060_v23  ;;  %v6388_v47 = vcombine.low %v3850_v58, %v3853_v44  ;;  %v3857_v59 = vsel %vm8268_vm9, %v6357_v27, %v3856_v21 }
  0xed   : > { %1059 = vst [vmem:[#allocation2 + $0xb8] sm:$0xf] %v888_v38  ;;  %1062 = vst [vmem:[#allocation2 + $0xbc] sm:$0x1] %v1061_v48  ;;  %v3858_v4 = vrot.slane %v3856_v21, 4  ;;  %v3863_v56 = vrot.slane %v3012_v40, 5 }
  0xee   : > { %v8576_v28 = vld [vmem:[#allocation2 + $0xa8] sm:$0xf]  ;;  %v3866_v10 = vrot.slane %v3013_v15, 5  ;;  %v8578_v42 = vld [vmem:[#allocation2 + $0xac] sm:$0xf]  ;;  %7062 = vmatprep.mubr.bf16.mxu0 %v6388_v47  ;;  %v6359_v21 = vrot.slane %v3750_v53, 9 }
  0xef   : > { %v1132_v37 = vld [vmem:[#allocation2 + $0xb0] sm:$0x1]  ;;  %v1474_v34 = vshrl.u32 %v8576_v28, 16  ;;  %v1477_v50 = vshll.u32 %v8576_v28, 16  ;;  %v3860_v39 = vsel %vm8268_vm9, %v3858_v4, %v3859_v57  ;;  %v1483_v8 = vshll.u32 %v8578_v42, 16 }
  0xf0   : > { %v1487_v62 = vshrl.u32 %v8578_v42, 16  ;;  %v1493_v49 = vshll.u32 %v1132_v37, 16  ;;  %v6389_v52 = vcombine.low %v3857_v59, %v3860_v39  ;;  %v3864_v55 = vsel %vm8268_vm9, %v6358_v46, %v3863_v56  ;;  %v3018_v57 = vld [vmem:[#allocation2 + $0x88] sm:$0xf]  ;;  %v3019_v15 = vld [vmem:[#allocation2 + $0x8c] sm:$0x1] }
  0xf1   : > { %v1476_v3 = vrot.slane %v1474_v34, 4  ;;  %v1479_v29 = vrot.slane %v1477_v50, 5  ;;  %v3865_v31 = vrot.slane %v3863_v56, 4  ;;  %v1485_v33 = vrot.slane %v1483_v8, 5  ;;  %v3751_v38 = vld [vmem:[#allocation2 + $0x84] sm:$0xe] }
  0xf2   : > { %v1489_v36 = vrot.slane %v1487_v62, 4  ;;  %7063 = vmatmul.mubr.bf16.gmra.mrb[12].mxu0 %v6389_v52  ;;  %v1495_v54 = vrot.slane %v1493_v49, 5  ;;  %v3021_v47 = vld [vmem:[#allocation2 + $0x94] sm:$0xf]  ;;  %v3870_v56 = vrot.slane %v8592_v63, 5  ;;  %v3873_v50 = vrot.slane %v8600_v9, 5 }
  0xf3   : > { %v1480_v51 = vor.u32 %v1479_v29, %v1476_v3  ;;  %v8588_v26 = vld [vmem:[#allocation2 + $0xb4] sm:$0xf]  ;;  %v3867_v32 = vsel %vm8268_vm9, %v3865_v31, %v3866_v10  ;;  %v3752_v39 = vld [vmem:[#allocation2 + $0x90] sm:$0xe]  ;;  %v8608_v62 = vld [vmem:[#allocation2 + $0x4] sm:$0xf] }
  0xf4   : > { %v1490_v58 = vor.u32 %v1489_v36, %v1485_v33  ;;  %v8594_v7 = vld [vmem:[#allocation2 + $0xb8] sm:$0xf]  ;;  %v1133_v61 = vld [vmem:[#allocation2 + $0xbc] sm:$0x1]  ;;  %v1498_v45 = vshrl.u32 %v8588_v26, 16  ;;  %v1501_v23 = vshll.u32 %v8588_v26, 16  ;;  %v6390_v11 = vcombine.low %v3864_v55, %v3867_v32 }
  0xf5   : > { %v1481_v12 = vrot.slane %v1480_v51, 4  ;;  %v1507_v16 = vshll.u32 %v8594_v7, 16  ;;  %v1511_v1 = vshrl.u32 %v8594_v7, 16  ;;  %v1517_v17 = vshll.u32 %v1133_v61, 16  ;;  %v7646_v49 = vld [vmem:[#allocation2] sm:$0xf] }
  0xf6   : > { %v1491_v27 = vrot.slane %v1490_v58, 4  ;;  %v1500_v40 = vrot.slane %v1498_v45, 4  ;;  %v1503_v35 = vrot.slane %v1501_v23, 5  ;;  %7066 = vmatprep.mubr.bf16.mxu0 %v6390_v11  ;;  %v6190_v52 = vcombine.low %v7646_v49, %v8608_v62  ;;  %v3022_v53 = vld [vmem:[#allocation2 + $0x98] sm:$0x1] }
  0xf7   : > { %v1486_v48 = vsel %vm7881_vm11, %v1481_v12, %v1485_v33  ;;  %v1509_v44 = vrot.slane %v1507_v16, 5  ;;  %v1513_v46 = vrot.slane %v1511_v1, 4  ;;  %v1519_v34 = vrot.slane %v1517_v17, 5  ;;  %v3753_v61 = vld [vmem:[#allocation2 + $0x9c] sm:$0xe] }
  0xf8   : > { %v1496_v59 = vsel %vm7881_vm11, %v1491_v27, %v1495_v54  ;;  %v1504_v4 = vor.u32 %v1503_v35, %v1500_v40  ;;  %v3871_v3 = vsel %vm8268_vm9, %v6359_v21, %v3870_v56  ;;  %v3872_v29 = vrot.slane %v3870_v56, 4  ;;  %v3024_v16 = vld [vmem:[#allocation2 + $0xa0] sm:$0xf]  ;;  %v3025_v1 = vld [vmem:[#allocation2 + $0xa4] sm:$0x1] }
  0xf9   : > { %v6180_v10 = vcombine.low %v1486_v48, %v1496_v59  ;;  %v1514_v37 = vor.u32 %v1513_v46, %v1509_v44  ;;  %v6360_v31 = vrot.slane %v3751_v38, 9  ;;  %v3877_v33 = vrot.slane %v3018_v57, 5  ;;  %v3027_v35 = vld [vmem:[#allocation2 + $0xac] sm:$0xf]  ;;  %v3028_v38 = vld [vmem:[#allocation2 + $0xb0] sm:$0x1] }
  0xfa   : > { %v1505_v8 = vrot.slane %v1504_v4, 4  ;;  %v3880_v36 = vrot.slane %v3019_v15, 5  ;;  %v3874_v54 = vsel %vm8268_vm9, %v3872_v29, %v3873_v50  ;;  %v6361_v32 = vrot.slane %v3752_v39, 9  ;;  %v3754_v59 = vld [vmem:[#allocation2 + $0xa8] sm:$0xe] }
  0xfb   : > { %6838 = vmatprep.mubr.bf16.mxu1 %v6180_v10  ;;  %v1515_v55 = vrot.slane %v1514_v37, 4  ;;  %v3884_v58 = vrot.slane %v3021_v47, 5  ;;  %v6391_v23 = vcombine.low %v3871_v3, %v3874_v54  ;;  %v3878_v11 = vsel %vm8268_vm9, %v6360_v31, %v3877_v33  ;;  %v3030_v4 = vld [vmem:[#allocation2 + $0xb8] sm:$0xf]  ;;  %v243_v10 = vld [vmem:[%s7805_s20 + $0xf0] sm:$0xff] }
  0xfc   : > { %v1510_v51 = vsel %vm7881_vm11, %v1505_v8, %v1509_v44  ;;  %v3879_v12 = vrot.slane %v3877_v33, 4  ;;  %v3887_v40 = vrot.slane %v3022_v53, 5  ;;  %v6362_v15 = vrot.slane %v3753_v61, 9  ;;  %v244_v37 = vld [vmem:[%s7805_s20 + $0xf8] sm:$0xff]  ;;  %v8629_v50 = vld [vmem:[#allocation2 + $0x10] sm:$0xf] }
  0xfd   : > { %v1520_v45 = vsel %vm7881_vm11, %v1515_v55, %v1519_v34  ;;  %v3886_v27 = vrot.slane %v3884_v58, 4  ;;  %7067 = vmatmul.mubr.bf16.gmra.mrb[16].mxu0 %v6391_v23  ;;  %v3885_v57 = vsel %vm8268_vm9, %v6361_v32, %v3884_v58  ;;  %v3891_v46 = vrot.slane %v3024_v16, 5  ;;  %v7647_v34 = vld [vmem:[#allocation2 + $0xc] sm:$0xf]  ;;  %v7649_v8 = vld [vmem:[#allocation2 + $0x18] sm:$0xf] }
  0xfe   : > { %v6181_v17 = vcombine.low %v1510_v51, %v1520_v45  ;;  %v3881_v21 = vsel %vm8268_vm9, %v3879_v12, %v3880_v36  ;;  %v3894_v47 = vrot.slane %v3025_v1, 5  ;;  %v3898_v56 = vrot.slane %v3027_v35, 5  ;;  %v8632_v49 = vld [vmem:[#allocation2 + $0x1c] sm:$0xf]  ;;  %v475_v54 = vld [vmem:[#allocation2 + $0xc0] sm:$0x1] }
  0xff   : > { %v6392_v48 = vcombine.low %v3878_v11, %v3881_v21  ;;  %v3888_v44 = vsel %vm8268_vm9, %v3886_v27, %v3887_v40  ;;  %v6191_v39 = vcombine.low %v7647_v34, %v8629_v50  ;;  %v6192_v3 = vcombine.low %v7649_v8, %v8632_v49  ;;  %v3031_v31 = vld [vmem:[#allocation2 + $0xbc] sm:$0x1]  ;;  %v531_v23 = vld [vmem:[#allocation2 + $0xc8] sm:$0x1] }
 0x100   : > { %6839 = vmatmul.mubr.bf16.gmra.mrb[28].mxu1 %v6181_v17  ;;  %v3892_v29 = vsel %vm8268_vm9, %v6362_v15, %v3891_v46  ;;  %v3893_v55 = vrot.slane %v3891_v46, 4  ;;  %v6393_v33 = vcombine.low %v3885_v57, %v3888_v44  ;;  %v6363_v36 = vrot.slane %v3754_v59, 9  ;;  %v7549_v17 = vld [vmem:[%s9689_s2 + $0x88] sm:$0xff]   ;;  %v7651_v15 = vld [vmem:[%s9689_s2 + $0x80] sm:$0xff]   ;;  %v7553_v46 = vld [vmem:[%s9689_s2 + $0x90] sm:$0xff]  }
 0x101   : > { %6858 = vmatprep.mubr.bf16.mxu1 %v6190_v52  ;;  %7070 = vmatprep.mubr.bf16.mxu0 %v6392_v48  ;;  %v3755_v52 = vld [vmem:[#allocation2 + $0xb4] sm:$0xe]  ;;  %v3901_v53 = vrot.slane %v3028_v38, 5  ;;  %v3905_v51 = vrot.slane %v3030_v4, 5  ;;  %v3900_v58 = vrot.slane %v3898_v56, 4  ;;  %v279_v61 = vmul.f32 %v8427_v43, %v243_v10 }
 0x102   : > { %v3895_v32 = vsel %vm8268_vm9, %v3893_v55, %v3894_v47  ;;  %v280_v45 = vmul.f32 %v8427_v43, %v244_v37  ;;  %v6364_v12 = vrot.slane %v3755_v52, 9  ;;  %v3908_v1 = vrot.slane %v3031_v31, 5  ;;  %v7652_v10 = vld [vmem:[#allocation2 + $0x24] sm:$0xf]  ;;  %v8666_v37 = vld [vmem:[#allocation2 + $0x28] sm:$0xf] }
 0x103   : > { %v6394_v11 = vcombine.low %v3892_v29, %v3895_v32  ;;  %v3907_v16 = vrot.slane %v3905_v51, 4  ;;  %v315_v27 = vadd.f32 %v8400_v5, %v279_v61  ;;  %v476_v35 = vsel %vm7809_vm3, 0, %v475_v54  ;;  %v8669_v29 = vld [vmem:[#allocation2 + $0x34] sm:$0xf]  ;;  %v7557_v52 = vld [vmem:[%s9689_s2 + $0x98] sm:$0xff]  }
 0x104   : > { %v316_v40 = vadd.f32 %v8400_v5, %v280_v45  ;;  %v3899_v43 = vsel %vm8268_vm9, %v6363_v36, %v3898_v56  ;;  %477 = vst [vmem:[#allocation2 + $0xc0] sm:$0x1] %v476_v35  ;;  %v532_v21 = vsel %vm7817_vm4, 0, %v531_v23  ;;  %v3902_v57 = vsel %vm8268_vm9, %v3900_v58, %v3901_v53  ;;  %v7658_v35 = vld [vmem:[#allocation2 + $0x48] sm:$0xf] }
 0x105   : > { %7071 = vmatmul.mubr.bf16.gmra.mrb[20].mxu0 %v6393_v33  ;;  %vm347_vm1 = vcmp.ge.f32.partialorder %v315_v27, 0.0  ;;  %v383_v5 = vmul.f32 %v8418_v6, %v315_v27  ;;  %533 = vst [vmem:[#allocation2 + $0xc8] sm:$0x1] %v532_v21  ;;  %v3906_v38 = vsel %vm8268_vm9, %v6364_v12, %v3905_v51  ;;  %v3909_v48 = vsel %vm8268_vm9, %v3907_v16, %v3908_v1  ;;  %v7656_v16 = vld [vmem:[#allocation2 + $0x3c] sm:$0xf] }
 0x106   : > { %7074 = vmatprep.mubr.bf16.mxu0 %v6394_v11  ;;  %vm348_vm2 = vcmp.ge.f32.partialorder %v316_v40, 0.0  ;;  %v384_v44 = vmul.f32 %v8418_v6, %v316_v40  ;;  %v6395_v59 = vcombine.low %v3899_v43, %v3902_v57  ;;  %v6193_v34 = vcombine.low %v7652_v10, %v8666_v37  ;;  %v7561_v11 = vld [vmem:[%s9689_s2 + $0xa0] sm:$0xff]   ;;  %v8687_v43 = vld [vmem:[#allocation2 + $0x4c] sm:$0xf] }
 0x107   : > { %v415_v47 = vsel %vm347_vm1, %v315_v27, %v383_v5  ;;  %v8680_v1 = vld [vmem:[#allocation2 + $0x40] sm:$0xf]  ;;  %v6196_v21 = vcombine.low %v7658_v35, %v8687_v43  ;;  %v478_v57 = vld [vmem:[#allocation2 + $0xcc] sm:$0x1]  ;;  %v3261_v14 = vshll.u32 %v8592_v63, 16 }
 0x108   : > { %6859 = vmatmul.mubr.bf16.vlgmr.msra.gmra.mrb[0].mxu1 %v6191_v39  ;;  %v416_v4 = vsel %vm348_vm2, %v316_v40, %v384_v44  ;;  %v6576_v56 = vpack.c.bf16 %v415_v47, %v415_v47  ;;  %v6396_v39 = vcombine.low %v3906_v38, %v3909_v48  ;;  %v479_v5 = vsel %vm7809_vm3, 0, %v478_v57  ;;  %v7660_v38 = vld [vmem:[#allocation2 + $0x54] sm:$0xf]  ;;  %v8698_v48 = vld [vmem:[#allocation2 + $0x58] sm:$0xf] }
 0x109   : > { %6891 = vmatpush3.bf16.msra.mxu1 %v7651_v15  ;;  %6862 = vmatprep.mubr.bf16.mxu1 %v6192_v3  ;;  %v6577_v8 = vpack.c.bf16 %v416_v4, %v416_v4  ;;  %v7654_v3 = vld [vmem:[#allocation2 + $0x30] sm:$0xf]  ;;  %480 = vst [vmem:[#allocation2 + $0xcc] sm:$0x1] %v479_v5  ;;  %v6197_v44 = vcombine.low %v7660_v38, %v8698_v48  ;;  %v7662_v10 = vld [vmem:[#allocation2 + $0x60] sm:$0xf] }
 0x10a   : > { %6892 = vmatprep.subr.bf16.mxu1 %v7549_v17  ;;  %v6194_v6 = vcombine.low %v7654_v3, %v8669_v29  ;;  %v891_v55 = vshrl.u32 %v6576_v56, 16  ;;  %v894_v31 = vshll.u32 %v6576_v56, 16  ;;  %v7579_v3 = vld [vmem:[%s9689_s2 + $0xb8] sm:$0xff]   ;;  %v2120_v57 = vld [vmem:[#allocation2 + $0x30] sm:$0xe]  ;;  %v7564_v38 = vld [vmem:[#allocation2 + $0x24] sm:$0xff]  }
 0x10b   : > { %v899_v33 = vshrl.u32 %v6577_v8, 16  ;;  %v902_v36 = vshll.u32 %v6577_v8, 16  ;;  %v1063_v54 = vld [vmem:[#allocation2 + $0xc0] sm:$0xf]  ;;  %v3265_v8 = vshrl.u32 %v8592_v63, 16 }
 0x10c   : > { %v893_v53 = vrot.slane %v891_v55, 7  ;;  %v1067_v61 = vld [vmem:[#allocation2 + $0xc8] sm:$0x1] }
 0x10d   : > { %6893 = vmatpush3.bf16.msra.mxu1 %v7549_v17  ;;  %7075 = vmatmul.mubr.bf16.gmra.mrb[24].mxu0 %v6395_v59  ;;  %v901_v51 = vrot.slane %v899_v33, 7  ;;  %v6195_v17 = vcombine.low %v7656_v16, %v8680_v1  ;;  %v8713_v33 = vrot.slane %v3261_v14, 5  ;;  %v2118_v16 = vld [vmem:[#allocation2 + $0x18] sm:$0xe] }
 0x10e   : > { %6894 = vmatprep.subr.bf16.mxu1 %v7553_v46  ;;  %7078 = vmatprep.mubr.bf16.mxu0 %v6396_v39  ;;  %v896_v32 = vor.u32 %v894_v31, %v893_v53  ;;  %v897_v58 = vrot.slane %v893_v53, 4  ;;  %v8720_v53 = vld [vmem:[%s9689_s2 + $0xc0] sm:$0xff]  }
 0x10f   : > { %v904_v45 = vor.u32 %v902_v36, %v901_v51  ;;  %v906_v23 = vrot.slane %v901_v51, 4  ;;  %v8715_v36 = vrot.slane %v3265_v8, 4  ;;  %v2116_v51 = vld [vmem:[#allocation2] sm:$0xe]  ;;  %v7671_v8 = vld [vmem:[#allocation2 + $0x2c] sm:$0x1] }
 0x110   : > { %6863 = vmatmul.mubr.bf16.gmra.mrb[4].mxu1 %v6193_v34  ;;  %v1064_v12 = vsel %vm7897_vm13, %v896_v32, %v1063_v54  ;;  %v8701_v34 = vld [vmem:[#allocation2 + $0x64] sm:$0xf]  ;;  %v2169_v54 = vrot.slane %v8608_v62, 5  ;;  %v2117_v32 = vld [vmem:[#allocation2 + $0xc] sm:$0xe] }
 0x111   : > { %6866 = vmatprep.mubr.bf16.mxu1 %v6194_v6  ;;  %6895 = vmatpush3.bf16.msra.mxu1 %v7553_v46  ;;  %v905_v27 = vsel %vm7905_vm15, %v897_v58, %v904_v45  ;;  %1065 = vst [vmem:[#allocation2 + $0xc0] sm:$0xf] %v1064_v12  ;;  %v1068_v40 = vsel %vm7809_vm3, %v906_v23, %v1067_v61  ;;  %v2176_v58 = vrot.slane %v8629_v50, 5  ;;  %v7664_v61 = vld [vmem:[#allocation2 + $0x8] sm:$0x1] }
 0x112   : > { %6896 = vmatprep.subr.bf16.mxu1 %v7557_v52  ;;  %1066 = vst [vmem:[#allocation2 + $0xc4] sm:$0xf] %v905_v27  ;;  %1069 = vst [vmem:[#allocation2 + $0xc8] sm:$0x1] %v1068_v40  ;;  %v6198_v39 = vcombine.low %v7662_v10, %v8701_v34  ;;  %v2172_v45 = vrot.slane %v7664_v61, 5 }
 0x113   : > { %v7665_v23 = vld [vmem:[#allocation2 + $0x6c] sm:$0xf]  ;;  %v2119_v27 = vld [vmem:[#allocation2 + $0x24] sm:$0xe]  ;;  %v7667_v40 = vld [vmem:[#allocation2 + $0x14] sm:$0x1] }
 0x114   : > { %v2179_v35 = vrot.slane %v7667_v40, 5  ;;  %v8728_v62 = vld [vmem:[#allocation2 + $0x7c] sm:$0xf]  ;;  %v7670_v10 = vld [vmem:[#allocation2 + $0x20] sm:$0x1]  ;;  %v6217_v14 = vrot.slane %v2119_v27, 9  ;;  %v6205_v40 = vcombine.low %v8588_v26, %v8594_v7 }
 0x115   : > { %6897 = vmatpush3.bf16.msra.mxu1 %v7557_v52  ;;  %v7562_v52 = vld [vmem:[#allocation2 + $0x18] sm:$0xff]   ;;  %v2122_v27 = vld [vmem:[#allocation2 + $0x48] sm:$0xe] }
 0x116   : > { %6898 = vmatprep.subr.bf16.mxu1 %v7561_v11  ;;  %v7672_v61 = vld [vmem:[#allocation2 + $0x38] sm:$0x1] }
 0x118   : > { %6867 = vmatmul.mubr.bf16.gmra.mrb[8].mxu1 %v6195_v17  ;;  %v3756_v15 = vld [vmem:[#allocation2 + $0xc0] sm:$0xe]  ;;  %v2183_v17 = vrot.slane %v8632_v49, 5  ;;  %v2197_v49 = vrot.slane %v8669_v29, 5  ;;  %v6201_v29 = vcombine.low %v8456_v13, %v8454_v24 }
 0x119   : > { %6870 = vmatprep.mubr.bf16.mxu1 %v6196_v21  ;;  %6899 = vmatpush3.bf16.msra.mxu1 %v7561_v11  ;;  %v3033_v46 = vld [vmem:[#allocation2 + $0xc4] sm:$0xf]  ;;  %v3034_v47 = vld [vmem:[#allocation2 + $0xc8] sm:$0x1]  ;;  %v6365_v59 = vrot.slane %v3756_v15, 9  ;;  %v6214_v15 = vrot.slane %v2116_v51, 9  ;;  %v6204_v51 = vcombine.low %v8576_v28, %v8578_v42 }
 0x11a   : > { %6900 = vmatprep.subr.bf16.mxu1 %v7567_v19  ;;  %v3912_v4 = vrot.slane %v3033_v46, 5  ;;  %v3915_v56 = vrot.slane %v3034_v47, 5  ;;  %v8724_v11 = vld [vmem:[#allocation2 + $0x70] sm:$0xf]  ;;  %v7668_v21 = vld [vmem:[#allocation2 + $0x78] sm:$0xf] }
 0x11b   : > { %v6199_v12 = vcombine.low %v7665_v23, %v8724_v11  ;;  %v6200_v50 = vcombine.low %v7668_v21, %v8728_v62  ;;  %v2171_v46 = vrot.slane %v2169_v54, 4  ;;  %v6215_v47 = vrot.slane %v2117_v32, 9  ;;  %v4626_v21 = vld [vmem:[#allocation2 + $0x18] sm:$0xf] }
 0x11c   : > { %v3913_v6 = vsel %vm8268_vm9, %v6365_v59, %v3912_v4  ;;  %v3914_v55 = vrot.slane %v3912_v4, 4  ;;  %v2178_v59 = vrot.slane %v2176_v58, 4  ;;  %v6216_v4 = vrot.slane %v2118_v16, 9 }
 0x11d   : > { %6901 = vmatpush3.bf16.msra.mxu1 %v7567_v19  ;;  %v2190_v19 = vrot.slane %v8666_v37, 5  ;;  %v7569_v37 = vld [vmem:[%s9689_s2 + $0x1c8] sm:$0xff]   ;;  %v2199_v32 = vrot.slane %v2197_v49, 4  ;;  %v2200_v23 = vrot.slane %v7672_v61, 5  ;;  %v8754_v24 = vsel %vm8268_vm9, %v2171_v46, %v2172_v45 }
 0x11e   : > { %6902 = vmatprep.subr.bf16.mxu1 %v7573_v22  ;;  %v3916_v31 = vsel %vm8268_vm9, %v3914_v55, %v3915_v56  ;;  %v2185_v56 = vrot.slane %v2183_v17, 4  ;;  %v6202_v55 = vcombine.low %v8501_v60, %v8508_v25  ;;  %v8758_v13 = vsel %vm8268_vm9, %v6215_v47, %v2176_v58  ;;  %v7575_v58 = vld [vmem:[%s9689_s2 + $0x1d0] sm:$0xff]   ;;  %v7574_v46 = vld [vmem:[#allocation2 + $0x48] sm:$0xff]  }
 0x11f   : > { %v6397_v63 = vcombine.low %v3913_v6, %v3916_v31  ;;  %v2121_v6 = vld [vmem:[#allocation2 + $0x3c] sm:$0xe]  ;;  %v2192_v31 = vrot.slane %v2190_v19, 4  ;;  %v8762_v60 = vsel %vm8268_vm9, %v2178_v59, %v2179_v35  ;;  %v8766_v25 = vsel %vm8268_vm9, %v6216_v4, %v2183_v17  ;;  %v7673_v59 = vld [vmem:[#allocation2 + $0x44] sm:$0x1] }
 0x120   : > { %6871 = vmatmul.mubr.bf16.gmra.mrb[12].mxu1 %v6197_v44  ;;  %v7568_v44 = vld [vmem:[#allocation2 + $0x30] sm:$0xff]   ;;  %v6219_v16 = vrot.slane %v2121_v6, 9  ;;  %v2204_v45 = vrot.slane %v8680_v1, 5  ;;  %v8781_v17 = vsel %vm8268_vm9, %v6217_v14, %v2190_v19  ;;  %v2211_v1 = vrot.slane %v8687_v43, 5  ;;  %v4629_v43 = vld [vmem:[#allocation2 + $0x24] sm:$0xf] }
 0x121   : > { %6874 = vmatprep.mubr.bf16.mxu1 %v6198_v39  ;;  %6903 = vmatpush3.bf16.msra.mxu1 %v7573_v22  ;;  %v2186_v39 = vrot.slane %v7670_v10, 5  ;;  %v8798_v19 = vsel %vm8268_vm9, %v2199_v32, %v2200_v23  ;;  %v2207_v4 = vrot.slane %v7673_v59, 5  ;;  %v7674_v10 = vld [vmem:[#allocation2 + $0x50] sm:$0x1]  ;;  %v4630_v6 = vld [vmem:[#allocation2 + $0x28] sm:$0xf] }
 0x122   : > { %6904 = vmatprep.subr.bf16.mxu1 %v7579_v3  ;;  %7079 = vmatmul.mubr.bf16.gmra.mrb[28].mxu0 %v6397_v63  ;;  %v6203_v63 = vcombine.low %v8542_v41, %v8544_v2  ;;  %v8806_v14 = vsel %vm8268_vm9, %v6219_v16, %v2204_v45  ;;  %v4675_v32 = vshrl.u32 %v4626_v21, 16  ;;  %v4678_v61 = vshll.u32 %v4626_v21, 16  ;;  %v2124_v23 = vld [vmem:[#allocation2 + $0x60] sm:$0xe]  ;;  %v2125_v47 = vld [vmem:[#allocation2 + $0x6c] sm:$0xe] }
 0x123   : > { %7098 = vmatprep.mubr.bf16.mxu0 %v7562_v52  ;;  %v6218_v52 = vrot.slane %v2120_v57, 9  ;;  %v4702_v59 = vshll.u32 %v4629_v43, 16  ;;  %v6223_v28 = vrot.slane %v2125_v47, 9 }
 0x125   : > { %6905 = vmatpush3.bf16.msra.mxu1 %v7579_v3  ;;  %v2193_v3 = vrot.slane %v7671_v8, 5  ;;  %v2206_v8 = vrot.slane %v2204_v45, 4  ;;  %v4699_v45 = vshrl.u32 %v4629_v43, 16  ;;  %v4677_v43 = vrot.slane %v4675_v32, 4 }
 0x126   : > { %6938 = vmatprep.subr.bf16.mxu1 %v8720_v53 }
 0x127   : > { %v8785_v35 = vsel %vm8268_vm9, %v2192_v31, %v2193_v3  ;;  %v2218_v3 = vrot.slane %v8698_v48, 5  ;;  %v7581_v31 = vld [vmem:[%s9689_s2 + $0x1d8] sm:$0xff]   ;;  %v8817_v22 = vsel %vm8268_vm9, %v2206_v8, %v2207_v4  ;;  %v4680_v4 = vrot.slane %v4678_v61, 5  ;;  %v4631_v8 = vld [vmem:[#allocation2 + $0x2c] sm:$0x1] }
 0x128   : > { %6875 = vmatmul.mubr.bf16.gmra.mrb[16].mxu1 %v6199_v12  ;;  %v8750_v12 = vsel %vm8268_vm9, %v6214_v15, %v2169_v54  ;;  %v8770_v54 = vsel %vm8268_vm9, %v2185_v56, %v2186_v39  ;;  %v8794_v15 = vsel %vm8268_vm9, %v6218_v52, %v2197_v49  ;;  %v6220_v56 = vrot.slane %v2122_v27, 9  ;;  %v7676_v61 = vld [vmem:[#allocation2 + $0x68] sm:$0x1] }
 0x129   : > { %6878 = vmatprep.mubr.bf16.mxu1 %v6200_v50  ;;  %v6246_v50 = vcombine.low %v8750_v12, %v8754_v24  ;;  %v2214_v39 = vrot.slane %v7674_v10, 5  ;;  %v2213_v52 = vrot.slane %v2211_v1, 4  ;;  %v4712_v10 = vshrl.u32 %v4630_v6, 16 }
 0x12a   : > { %7099 = vmatmul.mubr.bf16.vlgmr.msra.gmra.mrb[0].mxu0 %v7564_v38  ;;  %v2123_v38 = vld [vmem:[#allocation2 + $0x54] sm:$0xe]  ;;  %v8821_v5 = vsel %vm8268_vm9, %v6220_v56, %v2211_v1  ;;  %v2220_v21 = vrot.slane %v2218_v3, 4 }
 0x12b   : > { %7131 = vmatpush3.bf16.msra.mxu0 %v8478_v20  ;;  %7102 = vmatprep.mubr.bf16.mxu0 %v7568_v44  ;;  %v7570_v20 = vld [vmem:[#allocation2 + $0x3c] sm:$0xff]   ;;  %v6221_v48 = vrot.slane %v2123_v38, 9  ;;  %v6222_v38 = vrot.slane %v2124_v23, 9  ;;  %v2228_v23 = vrot.slane %v7676_v61, 5 }
 0x12c   : > { %7132 = vmatprep.subr.bf16.mxu0 %v7569_v37  ;;  %v4627_v44 = vld [vmem:[#allocation2 + $0x1c] sm:$0xf] }
 0x12d   : > { %v4684_v16 = vshll.u32 %v4627_v44, 16  ;;  %v4688_v27 = vshrl.u32 %v4627_v44, 16  ;;  %v4628_v44 = vld [vmem:[#allocation2 + $0x20] sm:$0x1] }
 0x12f   : > { %7133 = vmatpush3.bf16.msra.mxu0 %v7569_v37  ;;  %v2225_v37 = vrot.slane %v8701_v34, 5  ;;  %v7585_v34 = vld [vmem:[%s9689_s2 + $0x1e0] sm:$0xff]   ;;  %v8830_v1 = vrot.slane %v4684_v16, 5  ;;  %v4690_v56 = vrot.slane %v4688_v27, 4  ;;  %v2232_v16 = vrot.slane %v8724_v11, 5  ;;  %v7589_v11 = vld [vmem:[%s9689_s2 + $0x1e8] sm:$0xff]  }
 0x130   : > { %6879 = vmatmul.mubr.bf16.gmra.mrb[20].mxu1 %v6201_v29  ;;  %7134 = vmatprep.subr.bf16.mxu0 %v7575_v58  ;;  %v7675_v29 = vld [vmem:[#allocation2 + $0x5c] sm:$0x1]  ;;  %v7580_v27 = vld [vmem:[#allocation2 + $0x60] sm:$0xff]  }
 0x131   : > { %6882 = vmatprep.mubr.bf16.mxu1 %v6202_v55  ;;  %v4708_v55 = vshll.u32 %v4630_v6, 16  ;;  %v2221_v49 = vrot.slane %v7675_v29, 5  ;;  %v4701_v6 = vrot.slane %v4699_v45, 4  ;;  %v2227_v29 = vrot.slane %v2225_v37, 4 }
 0x132   : > { %7103 = vmatmul.mubr.bf16.gmra.mrb[4].mxu0 %v7570_v20  ;;  %v8828_v20 = vsel %vm8268_vm9, %v2213_v52, %v2214_v39  ;;  %v4714_v39 = vrot.slane %v4712_v10, 4  ;;  %v7576_v52 = vld [vmem:[#allocation2 + $0x54] sm:$0xff]   ;;  %v8858_v45 = vsel %vm8268_vm9, %v6222_v38, %v2225_v37  ;;  %v4691_v42 = vor.u32 %v4690_v56, %v8830_v1 }
 0x133   : > { %7106 = vmatprep.mubr.bf16.mxu0 %v7574_v46  ;;  %7135 = vmatpush3.bf16.msra.mxu0 %v7575_v58  ;;  %v4704_v46 = vrot.slane %v4702_v59, 5  ;;  %v8834_v58 = vsel %vm8268_vm9, %v6221_v48, %v2218_v3  ;;  %v8836_v57 = vrot.slane %v4708_v55, 5  ;;  %v8843_v32 = vsel %vm8268_vm9, %v2220_v21, %v2221_v49  ;;  %v7677_v48 = vld [vmem:[#allocation2 + $0x74] sm:$0x1]  ;;  %v2126_v21 = vld [vmem:[#allocation2 + $0x78] sm:$0xe] }
 0x134   : > { %7136 = vmatprep.subr.bf16.mxu0 %v7581_v31  ;;  %v4694_v3 = vshll.u32 %v4628_v44, 16  ;;  %v4718_v49 = vshll.u32 %v4631_v8, 16  ;;  %v2235_v55 = vrot.slane %v7677_v48, 5  ;;  %v2239_v44 = vrot.slane %v8728_v62, 5  ;;  %v4633_v56 = vld [vmem:[#allocation2 + $0x34] sm:$0xf] }
 0x135   : > { %v4715_v10 = vor.u32 %v4714_v39, %v8836_v57  ;;  %v8867_v37 = vsel %vm8268_vm9, %v2227_v29, %v2228_v23  ;;  %v2234_v47 = vrot.slane %v2232_v16, 4  ;;  %v7593_v62 = vld [vmem:[%s9689_s2 + $0x1f0] sm:$0xff]   ;;  %v4692_v29 = vrot.slane %v4691_v42, 4  ;;  %v7680_v42 = vld [vmem:[#allocation2 + $0x8c] sm:$0x1] }
 0x136   : > { %v8869_v38 = vrot.slane %v4694_v3, 5  ;;  %v6224_v23 = vrot.slane %v2126_v21, 9  ;;  %v7679_v3 = vld [vmem:[#allocation2 + $0x80] sm:$0x1]  ;;  %v4732_v2 = vshll.u32 %v4633_v56, 16 }
 0x137   : > { %7137 = vmatpush3.bf16.msra.mxu0 %v7581_v31  ;;  %v4632_v31 = vld [vmem:[#allocation2 + $0x30] sm:$0xf]  ;;  %v2242_v48 = vrot.slane %v7679_v3, 5  ;;  %v4716_v59 = vrot.slane %v4715_v10, 4  ;;  %v7584_v10 = vld [vmem:[#allocation2 + $0x78] sm:$0xff]   ;;  %v8888_v26 = vsel %vm8268_vm9, %v2234_v47, %v2235_v55 }
 0x138   : > { %6883 = vmatmul.mubr.bf16.gmra.mrb[24].mxu1 %v6203_v63  ;;  %v4681_v63 = vor.u32 %v4680_v4, %v4677_v43  ;;  %7138 = vmatprep.subr.bf16.mxu0 %v7585_v34  ;;  %v7678_v43 = vld [vmem:[#allocation2 + $0x88] sm:$0xf]  ;;  %v4723_v39 = vshrl.u32 %v4632_v31, 16  ;;  %v4726_v61 = vshll.u32 %v4632_v31, 16  ;;  %v4697_v24 = vsel %vm7881_vm11, %v4692_v29, %v8869_v38  ;;  %v4634_v55 = vld [vmem:[#allocation2 + $0x38] sm:$0x1] }
 0x139   : > { %6886 = vmatprep.mubr.bf16.mxu1 %v6204_v51  ;;  %v4705_v51 = vor.u32 %v4704_v46, %v4701_v6  ;;  %v2246_v4 = vrot.slane %v7678_v43, 5  ;;  %v4720_v6 = vrot.slane %v4718_v49, 5  ;;  %v2127_v46 = vld [vmem:[#allocation2 + $0x84] sm:$0xe]  ;;  %v2241_v43 = vrot.slane %v2239_v44, 4 }
 0x13a   : > { %7107 = vmatmul.mubr.bf16.gmra.mrb[8].mxu0 %v7576_v52  ;;  %v4682_v8 = vrot.slane %v4681_v63, 4  ;;  %v8879_v63 = vsel %vm8268_vm9, %v6223_v28, %v2232_v16  ;;  %v6225_v49 = vrot.slane %v2127_v46, 9  ;;  %v4725_v7 = vrot.slane %v4723_v39, 4  ;;  %v4635_v16 = vld [vmem:[#allocation2 + $0x3c] sm:$0xf] }
 0x13b   : > { %7110 = vmatprep.mubr.bf16.mxu0 %v7580_v27  ;;  %7139 = vmatpush3.bf16.msra.mxu0 %v7585_v34  ;;  %v4706_v52 = vrot.slane %v4705_v51, 4  ;;  %v4736_v27 = vshrl.u32 %v4633_v56, 16  ;;  %v7582_v34 = vld [vmem:[#allocation2 + $0x6c] sm:$0xff]   ;;  %v2248_v31 = vrot.slane %v2246_v4, 4  ;;  %v2249_v51 = vrot.slane %v7680_v42, 5  ;;  %v7597_v28 = vld [vmem:[%s9689_s2 + $0x1f8] sm:$0xff]  }
 0x13c   : > { %7140 = vmatprep.subr.bf16.mxu0 %v7589_v11  ;;  %v4687_v12 = vsel %vm7881_vm11, %v4682_v8, %v8830_v1  ;;  %v4636_v47 = vld [vmem:[#allocation2 + $0x40] sm:$0xf]  ;;  %v4721_v56 = vsel %vm7881_vm11, %v4716_v59, %v4720_v6  ;;  %v8910_v1 = vsel %vm8268_vm9, %v2241_v43, %v2242_v48  ;;  %v8912_v8 = vrot.slane %v4732_v2, 5 }
 0x13d   : > { %v4738_v38 = vrot.slane %v4736_v27, 4  ;;  %v4747_v46 = vshrl.u32 %v4635_v16, 16  ;;  %v4750_v39 = vshll.u32 %v4635_v16, 16  ;;  %v4742_v6 = vshll.u32 %v4634_v55, 16 }
 0x13e   : > { %v4756_v29 = vshll.u32 %v4636_v47, 16  ;;  %v4760_v2 = vshrl.u32 %v4636_v47, 16  ;;  %v8929_v48 = vcombine.low %v4687_v12, %v4697_v24  ;;  %v9713_v55 = vcombine.low %v8766_v25, %v8770_v54  ;;  %v7588_v47 = vld [vmem:[#allocation2 + $0x90] sm:$0xff]  }
 0x13f   : > { %7141 = vmatpush3.bf16.msra.mxu0 %v7589_v11  ;;  %v8904_v11 = vsel %vm8268_vm9, %v6224_v23, %v2239_v44  ;;  %v8920_v44 = vsel %vm8268_vm9, %v2248_v31, %v2249_v51  ;;  %v7586_v23 = vld [vmem:[#allocation2 + $0x84] sm:$0xff]   ;;  %v4641_v51 = vld [vmem:[#allocation2 + $0x54] sm:$0xf]  ;;  %v4749_v16 = vrot.slane %v4747_v46, 4  ;;  %v4752_v12 = vrot.slane %v4750_v39, 5 }
 0x140   : > { %6887 = vmatmul.mubr.bf16.gmra.mrb[28].mxu1 %v6205_v40  ;;  %v4728_v40 = vrot.slane %v4726_v61, 5  ;;  %7142 = vmatprep.subr.bf16.mxu0 %v7593_v62  ;;  %v4638_v61 = vld [vmem:[#allocation2 + $0x48] sm:$0xf]  ;;  %v4762_v46 = vrot.slane %v4760_v2, 4  ;;  %v2128_v39 = vld [vmem:[#allocation2 + $0x90] sm:$0xe] }
 0x141   : > { %6906 = vmatprep.mubr.bf16.mxu1 %v6246_v50  ;;  %v4711_v50 = vsel %vm7881_vm11, %v4706_v52, %v8836_v57  ;;  %v8916_v57 = vsel %vm8268_vm9, %v6225_v49, %v2246_v4  ;;  %v8922_v52 = vld [vmem:[#allocation2 + $0x4c] sm:$0xf]  ;;  %v4739_v49 = vor.u32 %v4738_v38, %v8912_v8  ;;  %v4771_v31 = vshrl.u32 %v4638_v61, 16  ;;  %v2129_v2 = vld [vmem:[#allocation2 + $0x9c] sm:$0xe] }
 0x142   : > { %7111 = vmatmul.mubr.bf16.gmra.mrb[12].mxu0 %v7582_v34  ;;  %v4729_v59 = vor.u32 %v4728_v40, %v4725_v7  ;;  %v7587_v4 = vld [vmem:[%s9689_s2 + $0xc8] sm:$0xff]   ;;  %v8936_v43 = vcombine.low %v4711_v50, %v4721_v56  ;;  %v4774_v42 = vshll.u32 %v4638_v61, 16  ;;  %v9712_v7 = vcombine.low %v8758_v13, %v8762_v60  ;;  %v4637_v40 = vld [vmem:[#allocation2 + $0x44] sm:$0x1]  ;;  %v7591_v56 = vld [vmem:[%s9689_s2 + $0xd0] sm:$0xff]  }
 0x143   : > { %7114 = vmatprep.mubr.bf16.mxu0 %v7584_v10  ;;  %7143 = vmatpush3.bf16.msra.mxu0 %v7593_v62  ;;  %v8934_v62 = vld [vmem:[%s9689_s2 + $0x200] sm:$0xff]   ;;  %v8943_v10 = vld [vmem:[#allocation2 + $0x58] sm:$0xf]  ;;  %v4780_v24 = vshll.u32 %v8922_v52, 16  ;;  %v4784_v50 = vshrl.u32 %v8922_v52, 16  ;;  %v4744_v60 = vrot.slane %v4742_v6, 5 }
 0x144   : > { %7144 = vmatprep.subr.bf16.mxu0 %v7597_v28  ;;  %9711 = vst [vmem:[#allocation3_spill] sm:$0xff] %v8943_v10  ;;  %v4730_v13 = vrot.slane %v4729_v59, 4  ;;  %v8957_v38 = vrot.slane %v4756_v29, 5  ;;  %v4795_v61 = vshrl.u32 %v4641_v51, 16  ;;  %v4808_v25 = vshrl.u32 %v8943_v10, 16 }
 0x145   : > { %v4740_v54 = vrot.slane %v4739_v49, 4  ;;  %v4773_v34 = vrot.slane %v4771_v31, 4  ;;  %v4776_v27 = vrot.slane %v4774_v42, 5  ;;  %v4753_v59 = vor.u32 %v4752_v12, %v4749_v16  ;;  %v7681_v6 = vld [vmem:[#allocation2 + $0x94] sm:$0xf] }
 0x146   : > { %v2253_v29 = vrot.slane %v7681_v6, 5  ;;  %v8962_v3 = vrot.slane %v4780_v24, 5  ;;  %v4735_v49 = vsel %vm7881_vm11, %v4730_v13, %v8912_v8  ;;  %v4763_v31 = vor.u32 %v4762_v46, %v8957_v38  ;;  %v7682_v42 = vld [vmem:[#allocation2 + $0x98] sm:$0x1]  ;;  %v8971_v16 = vld [vmem:[#allocation2 + $0x50] sm:$0x1] }
 0x147   : > { %7145 = vmatpush3.bf16.msra.mxu0 %v7597_v28  ;;  %v4786_v28 = vrot.slane %v4784_v50, 4  ;;  %v8973_v12 = vld [vmem:[#allocation2 + $0x5c] sm:$0x1]  ;;  %v4797_v24 = vrot.slane %v4795_v61, 4  ;;  %v4745_v6 = vsel %vm7881_vm11, %v4740_v54, %v4744_v60  ;;  %v6227_v21 = vrot.slane %v2129_v2, 9  ;;  %v7592_v60 = vld [vmem:[#allocation2 + $0xa8] sm:$0xff]  }
 0x148   : > { %6907 = vmatmul.mubr.bf16.vlgmr.msra.gmra.mrb[0].mxu1 %v9712_v7  ;;  %v4798_v7 = vshll.u32 %v4641_v51, 16  ;;  %7178 = vmatprep.subr.bf16.mxu0 %v8934_v62  ;;  %v7595_v51 = vld [vmem:[%s9689_s2 + $0xd8] sm:$0xff]   ;;  %v7683_v8 = vld [vmem:[#allocation2 + $0xa0] sm:$0xf]  ;;  %v4777_v46 = vor.u32 %v4776_v27, %v4773_v34  ;;  %v4754_v41 = vrot.slane %v4753_v59, 4  ;;  %v8995_v34 = vcombine.low %v4735_v49, %v4745_v6 }
 0x149   : > { %6939 = vmatpush3.bf16.msra.mxu1 %v8720_v53  ;;  %6910 = vmatprep.mubr.bf16.mxu1 %v9713_v55  ;;  %v4804_v53 = vshll.u32 %v8943_v10, 16  ;;  %v4766_v55 = vshll.u32 %v4637_v40, 16  ;;  %v2256_v40 = vrot.slane %v7682_v42, 5  ;;  %v2260_v13 = vrot.slane %v7683_v8, 5  ;;  %v7590_v42 = vld [vmem:[#allocation2 + $0x9c] sm:$0xff]  }
 0x14a   : > { %6940 = vmatprep.subr.bf16.mxu1 %v7587_v4  ;;  %7115 = vmatmul.mubr.bf16.gmra.mrb[16].mxu0 %v7586_v23  ;;  %v6226_v23 = vrot.slane %v2128_v39, 9  ;;  %v9714_v39 = vcombine.low %v8781_v17, %v8785_v35  ;;  %v2255_v10 = vrot.slane %v2253_v29, 4  ;;  %v4787_v61 = vor.u32 %v4786_v28, %v8962_v3  ;;  %v7599_v35 = vld [vmem:[%s9689_s2 + $0xe0] sm:$0xff]   ;;  %v2131_v6 = vld [vmem:[#allocation2 + $0xb4] sm:$0xe] }
 0x14b   : > { %7118 = vmatprep.mubr.bf16.mxu0 %v7588_v47  ;;  %v8975_v50 = vrot.slane %v4804_v53, 5  ;;  %v4810_v47 = vrot.slane %v4808_v25, 4  ;;  %v9715_v53 = vcombine.low %v8794_v15, %v8798_v19  ;;  %v4764_v25 = vrot.slane %v4763_v31, 4  ;;  %v2130_v19 = vld [vmem:[#allocation2 + $0xa8] sm:$0xe] }
 0x14c   : > { %v4768_v54 = vrot.slane %v4766_v55, 5  ;;  %v8989_v27 = vsel %vm8268_vm9, %v6226_v23, %v2253_v29  ;;  %v4814_v17 = vshll.u32 %v8973_v12, 16  ;;  %v9000_v55 = vsel %vm8268_vm9, %v6227_v21, %v2260_v13  ;;  %v7685_v28 = vld [vmem:[#allocation2 + $0xa4] sm:$0x1]  ;;  %v4644_v8 = vld [vmem:[#allocation2 + $0x60] sm:$0xf] }
 0x14d   : > { %6941 = vmatpush3.bf16.msra.mxu1 %v7587_v4  ;;  %v4800_v4 = vrot.slane %v4798_v7, 5  ;;  %v4790_v7 = vshll.u32 %v8971_v16, 16  ;;  %v4811_v15 = vor.u32 %v4810_v47, %v8975_v50  ;;  %v2262_v29 = vrot.slane %v2260_v13, 4 }
 0x14e   : > { %6942 = vmatprep.subr.bf16.mxu1 %v7591_v56  ;;  %v2263_v31 = vrot.slane %v7685_v28, 5  ;;  %v4778_v23 = vrot.slane %v4777_v46, 4  ;;  %v4759_v49 = vsel %vm7881_vm11, %v4754_v41, %v8957_v38  ;;  %v4769_v21 = vsel %vm7881_vm11, %v4764_v25, %v4768_v54  ;;  %v7601_v41 = vld [vmem:[%s9689_s2 + $0xe8] sm:$0xff]  }
 0x14f   : > { %v4801_v59 = vor.u32 %v4800_v4, %v4797_v24  ;;  %v9007_v24 = vsel %vm8268_vm9, %v2255_v10, %v2256_v40  ;;  %v4788_v4 = vrot.slane %v4787_v61, 4  ;;  %v4792_v47 = vrot.slane %v4790_v7, 5  ;;  %v7687_v61 = vld [vmem:[#allocation2 + $0xb0] sm:$0x1] }
 0x150   : > { %6911 = vmatmul.mubr.bf16.gmra.mrb[4].mxu1 %v9714_v39  ;;  %v4816_v13 = vrot.slane %v4814_v17, 5  ;;  %v6228_v46 = vrot.slane %v2130_v19, 9  ;;  %v7686_v39 = vld [vmem:[#allocation2 + $0xb8] sm:$0xf]  ;;  %v4812_v38 = vrot.slane %v4811_v15, 4  ;;  %v2270_v7 = vrot.slane %v7687_v61, 5 }
 0x151   : > { %6914 = vmatprep.mubr.bf16.mxu1 %v9715_v53  ;;  %6943 = vmatpush3.bf16.msra.mxu1 %v7591_v56  ;;  %v7684_v56 = vld [vmem:[#allocation2 + $0xac] sm:$0xf]  ;;  %v9011_v53 = vld [vmem:[#allocation2 + $0x64] sm:$0xf]  ;;  %v4802_v10 = vrot.slane %v4801_v59, 4  ;;  %v6229_v25 = vrot.slane %v2131_v6, 9  ;;  %v9716_v17 = vcombine.low %v8806_v14, %v8817_v22  ;;  %v4793_v59 = vsel %vm7881_vm11, %v4788_v4, %v4792_v47 }
 0x152   : > { %6944 = vmatprep.subr.bf16.mxu1 %v7595_v51  ;;  %v2267_v2 = vrot.slane %v7684_v56, 5  ;;  %7119 = vmatmul.mubr.bf16.gmra.mrb[20].mxu0 %v7590_v42  ;;  %v2274_v42 = vrot.slane %v7686_v39, 5  ;;  %v4819_v54 = vshrl.u32 %v4644_v8, 16  ;;  %v7594_v19 = vld [vmem:[#allocation2 + $0xb4] sm:$0xff]   ;;  %v4822_v15 = vshll.u32 %v4644_v8, 16 }
 0x153   : > { %7122 = vmatprep.mubr.bf16.mxu0 %v7592_v60  ;;  %v4783_v60 = vsel %vm7881_vm11, %v4778_v23, %v8962_v3  ;;  %v4828_v56 = vshll.u32 %v9011_v53, 16  ;;  %v9717_v28 = vcombine.low %v8821_v5, %v8828_v20  ;;  %v7596_v3 = vld [vmem:[#allocation2 + $0xc0] sm:$0xff]   ;;  %v7688_v23 = vld [vmem:[#allocation2 + $0xbc] sm:$0x1]  ;;  %v9037_v4 = vld [vmem:[#allocation2 + $0x68] sm:$0x1]  ;;  %v4807_v5 = vsel %vm7881_vm11, %v4802_v10, %v8975_v50 }
 0x154   : > { %v2269_v40 = vrot.slane %v2267_v2, 4  ;;  %v2276_v14 = vrot.slane %v2274_v42, 4  ;;  %v2277_v6 = vrot.slane %v7688_v23, 5  ;;  %v7603_v47 = vld [vmem:[%s9689_s2 + $0xf0] sm:$0xff]   ;;  %v4817_v20 = vsel %vm7881_vm11, %v4812_v38, %v4816_v13  ;;  %v4647_v8 = vld [vmem:[#allocation2 + $0x6c] sm:$0xf] }
 0x155   : > { %6945 = vmatpush3.bf16.msra.mxu1 %v7595_v51  ;;  %v9018_v51 = vsel %vm8268_vm9, %v2262_v29, %v2263_v31  ;;  %v4832_v29 = vshrl.u32 %v9011_v53, 16  ;;  %v9033_v31 = vcombine.low %v4759_v49, %v4769_v21  ;;  %v9057_v39 = vcombine.low %v4783_v60, %v4793_v59  ;;  %v9065_v13 = vld [vmem:[#allocation2 + $0x70] sm:$0xf]  ;;  %v4653_v59 = vld [vmem:[#allocation2 + $0x84] sm:$0xf] }
 0x156   : > { %6946 = vmatprep.subr.bf16.mxu1 %v7599_v35  ;;  %v9053_v49 = vsel %vm8268_vm9, %v2269_v40, %v2270_v7  ;;  %v9061_v50 = vsel %vm8268_vm9, %v6229_v25, %v2274_v42  ;;  %v9063_v10 = vrot.slane %v4819_v54, 4  ;;  %v9067_v38 = vrot.slane %v4828_v56, 5  ;;  %v9070_v7 = vld [vmem:[#allocation2 + $0x7c] sm:$0xf]  ;;  %v4656_v21 = vld [vmem:[#allocation2 + $0x90] sm:$0xf] }
 0x157   : > { %9718 = vst [vmem:[#allocation4_spill] sm:$0xff] %v9061_v50  ;;  %v4834_v40 = vrot.slane %v4832_v29, 4  ;;  %v4838_v61 = vshll.u32 %v9037_v4, 16  ;;  %9719 = vst [vmem:[#allocation5_spill] sm:$0xff] %v9070_v7  ;;  %v9720_v60 = vshll.u32 %v8600_v9, 16  ;;  %v9076_v42 = vcombine.low %v4807_v5, %v4817_v20  ;;  %v7598_v5 = vld [vmem:[#allocation2 + $0xcc] sm:$0xff]  }
 0x158   : > { %6915 = vmatmul.mubr.bf16.gmra.mrb[8].mxu1 %v9716_v17  ;;  %v9082_v54 = vsel %vm8268_vm9, %v2276_v14, %v2277_v6  ;;  %v4843_v9 = vshrl.u32 %v4647_v8, 16  ;;  %v4852_v56 = vshll.u32 %v9065_v13, 16  ;;  %v9089_v29 = vld [vmem:[#allocation2 + $0x88] sm:$0xf]  ;;  %v4876_v23 = vshll.u32 %v9070_v7, 16 }
 0x159   : > { %6918 = vmatprep.mubr.bf16.mxu1 %v9717_v28  ;;  %6947 = vmatpush3.bf16.msra.mxu1 %v7599_v35  ;;  %v9049_v35 = vsel %vm8268_vm9, %v6228_v46, %v2267_v2  ;;  %v4650_v2 = vld [vmem:[#allocation2 + $0x78] sm:$0xf]  ;;  %v4824_v46 = vrot.slane %v4822_v15, 5  ;;  %v9074_v17 = vrot.slane %v9720_v60, 5  ;;  %9722 = vst [vmem:[#allocation7_spill] sm:$0xff] %v9082_v54  ;;  %v4846_v15 = vshll.u32 %v4647_v8, 16 }
 0x15a   : > { %6948 = vmatprep.subr.bf16.mxu1 %v7601_v41  ;;  %7123 = vmatmul.mubr.bf16.gmra.mrb[24].mxu0 %v7594_v19  ;;  %v7605_v19 = vld [vmem:[%s9689_s2 + $0xf8] sm:$0xff]   ;;  %9723 = vst [vmem:[#allocation8_spill] sm:$0xff] %v9089_v29  ;;  %v4867_v28 = vshrl.u32 %v4650_v2, 16  ;;  %v4880_v14 = vshrl.u32 %v9070_v7, 16  ;;  %v9724_v6 = vcombine.low %v8834_v58, %v8843_v32  ;;  %v4835_v60 = vor.u32 %v4834_v40, %v9067_v38  ;;  %v9111_v20 = vld [vmem:[#allocation2 + $0x74] sm:$0x1] }
 0x15b   : > { %9721 = vst [vmem:[#allocation6_spill] sm:$0xff] %v9074_v17  ;;  %7126 = vmatprep.mubr.bf16.mxu0 %v7596_v3  ;;  %v4870_v3 = vshll.u32 %v4650_v2, 16  ;;  %v4825_v8 = vor.u32 %v4824_v46, %v9063_v10  ;;  %v9100_v25 = vrot.slane %v4838_v61, 5  ;;  %v9725_v2 = vcombine.low %v8858_v45, %v8867_v37 }
 0x15c   : > { %v4891_v22 = vshrl.u32 %v4653_v59, 16  ;;  %v4894_v7 = vshll.u32 %v4653_v59, 16  ;;  %v4900_v58 = vshll.u32 %v9089_v29, 16  ;;  %v4904_v32 = vshrl.u32 %v9089_v29, 16  ;;  %v9115_v59 = vld [vmem:[#allocation2 + $0x80] sm:$0x1] }
 0x15d   : > { %6949 = vmatpush3.bf16.msra.mxu1 %v7601_v41  ;;  %v4856_v41 = vshrl.u32 %v9065_v13, 16  ;;  %v4845_v10 = vrot.slane %v4843_v9, 4  ;;  %v4848_v46 = vrot.slane %v4846_v15, 5  ;;  %v9109_v40 = vrot.slane %v4852_v56, 5  ;;  %v9120_v15 = vld [vmem:[#allocation2 + $0x8c] sm:$0x1] }
 0x15e   : > { %6950 = vmatprep.subr.bf16.mxu1 %v7603_v47  ;;  %v4869_v17 = vrot.slane %v4867_v28, 4  ;;  %v4872_v45 = vrot.slane %v4870_v3, 5  ;;  %v9113_v37 = vrot.slane %v4876_v23, 5  ;;  %v4918_v29 = vshll.u32 %v4656_v21, 16 }
 0x15f   : > { %v4858_v61 = vrot.slane %v4856_v41, 4  ;;  %v4893_v56 = vrot.slane %v4891_v22, 4  ;;  %v4896_v41 = vrot.slane %v4894_v7, 5  ;;  %v9122_v28 = vrot.slane %v4900_v58, 5 }
 0x160   : > { %6919 = vmatmul.mubr.bf16.gmra.mrb[12].mxu1 %v9724_v6  ;;  %v9107_v6 = vld [vmem:[#allocation2 + $0x94] sm:$0xf]  ;;  %v4906_v3 = vrot.slane %v4904_v32, 4  ;;  %v9124_v23 = vrot.slane %v4825_v8, 4  ;;  %v4873_v7 = vor.u32 %v4872_v45, %v4869_v17  ;;  %v4886_v8 = vshll.u32 %v9115_v59, 16 }
 0x161   : > { %6922 = vmatprep.mubr.bf16.mxu1 %v9725_v2  ;;  %6951 = vmatpush3.bf16.msra.mxu1 %v7603_v47  ;;  %9726 = vst [vmem:[#allocation9_spill] sm:$0xff] %v9107_v6  ;;  %v4882_v47 = vrot.slane %v4880_v14, 4  ;;  %v4915_v2 = vshrl.u32 %v4656_v21, 16  ;;  %v4924_v54 = vshll.u32 %v9107_v6, 16  ;;  %v4928_v9 = vshrl.u32 %v9107_v6, 16  ;;  %v9132_v6 = vld [vmem:[%s9689_s2 + $0x100] sm:$0xff]  }
 0x162   : > { %6952 = vmatprep.subr.bf16.mxu1 %v7605_v19  ;;  %7127 = vmatmul.mubr.bf16.gmra.mrb[28].mxu0 %v7598_v5  ;;  %v9126_v14 = vrot.slane %v4835_v60, 4  ;;  %v4849_v5 = vor.u32 %v4848_v46, %v4845_v10  ;;  %v4862_v21 = vshll.u32 %v9111_v20, 16  ;;  %9727 = vst [vmem:[#allocation10_spill] sm:$0xff] %v9132_v6  ;;  %v4859_v22 = vor.u32 %v4858_v61, %v9109_v40  ;;  %v4659_v60 = vld [vmem:[#allocation2 + $0x9c] sm:$0xf] }
 0x163   : > { %7146 = vmatprep.mubr.bf16.mxu0 %v8929_v48  ;;  %v534_v48 = vld [vmem:[#allocation2 + $0xd4] sm:$0x1]  ;;  %v9728_v58 = vcombine.low %v8879_v63, %v8888_v26  ;;  %v4917_v32 = vrot.slane %v4915_v2, 4  ;;  %v4920_v10 = vrot.slane %v4918_v29, 5  ;;  %v9141_v46 = vrot.slane %v4924_v54, 5  ;;  %v7602_v26 = vld [vmem:[%s9689_s2 + $0x208] sm:$0xff]  }
 0x164   : > { %v4930_v50 = vrot.slane %v4928_v9, 4  ;;  %v4897_v61 = vor.u32 %v4896_v41, %v4893_v56  ;;  %v4907_v17 = vor.u32 %v4906_v3, %v9122_v28  ;;  %v4910_v45 = vshll.u32 %v9120_v15, 16  ;;  %v9163_v56 = vld [vmem:[#allocation2 + $0xa0] sm:$0xf] }
 0x165   : > { %6953 = vmatpush3.bf16.msra.mxu1 %v7605_v19  ;;  %v4883_v19 = vor.u32 %v4882_v47, %v9113_v37  ;;  %v9148_v47 = vld [vmem:[#allocation2 + $0x98] sm:$0x1]  ;;  %v535_v63 = vsel %vm7817_vm4, 0, %v534_v48  ;;  %v4939_v54 = vshrl.u32 %v4659_v60, 16  ;;  %v4942_v29 = vshll.u32 %v4659_v60, 16 }
 0x166   : > { %7226 = vmatprep.subr.bf16.mxu1 %v9132_v6  ;;  %v9729_v6 = vcombine.low %v8904_v11, %v8910_v1  ;;  %v4831_v11 = vsel %vm7881_vm11, %v9124_v23, %v9067_v38  ;;  %v4864_v1 = vrot.slane %v4862_v21, 5  ;;  %536 = vst [vmem:[#allocation2 + $0xd4] sm:$0x1] %v535_v63  ;;  %v4850_v18 = vrot.slane %v4849_v5, 4  ;;  %v4662_v21 = vld [vmem:[#allocation2 + $0xa8] sm:$0xf] }
 0x167   : > { %v4860_v2 = vrot.slane %v4859_v22, 4  ;;  %v4888_v9 = vrot.slane %v4886_v8, 5  ;;  %v4874_v41 = vrot.slane %v4873_v7, 4  ;;  %v4921_v3 = vor.u32 %v4920_v10, %v4917_v32  ;;  %v9188_v63 = vld [vmem:[#allocation2 + $0xac] sm:$0xf] }
 0x168   : > { %6923 = vmatmul.mubr.bf16.gmra.mrb[16].mxu1 %v9728_v58  ;;  %v4931_v38 = vor.u32 %v4930_v50, %v9141_v46  ;;  %v4934_v23 = vshll.u32 %v9148_v47, 16  ;;  %v4884_v48 = vrot.slane %v4883_v19, 4  ;;  %v4912_v5 = vrot.slane %v4910_v45, 5  ;;  %v9180_v19 = vld [vmem:[#allocation2 + $0xa4] sm:$0x1] }
 0x169   : > { %6926 = vmatprep.mubr.bf16.mxu1 %v9729_v6  ;;  %v4841_v6 = vsel %vm7881_vm11, %v9126_v14, %v9100_v25  ;;  %v4898_v25 = vrot.slane %v4897_v61, 4  ;;  %v4908_v14 = vrot.slane %v4907_v17, 4  ;;  %v4941_v22 = vrot.slane %v4939_v54, 4 }
 0x16a   : > { %7147 = vmatmul.mubr.bf16.vlgmr.msra.gmra.mrb[0].mxu0 %v8936_v43  ;;  %v7604_v43 = vld [vmem:[%s9689_s2 + $0x210] sm:$0xff]   ;;  %v4944_v7 = vrot.slane %v4942_v29, 5  ;;  %v4948_v50 = vshll.u32 %v9163_v56, 16  ;;  %v4952_v8 = vshrl.u32 %v9163_v56, 16  ;;  %v4963_v60 = vshrl.u32 %v4662_v21, 16 }
 0x16b   : > { %7179 = vmatpush3.bf16.msra.mxu0 %v8934_v62  ;;  %7150 = vmatprep.mubr.bf16.mxu0 %v8995_v34  ;;  %v4855_v62 = vsel %vm7881_vm11, %v4850_v18, %v9109_v40  ;;  %v4865_v34 = vsel %vm7881_vm11, %v4860_v2, %v4864_v1  ;;  %v4966_v58 = vshll.u32 %v4662_v21, 16  ;;  %v9730_v32 = vcombine.low %v8916_v57, %v8920_v44  ;;  %v5384_v18 = vld [vmem:[#allocation2 + $0x48] sm:$0xe] }
 0x16c   : > { %7180 = vmatprep.subr.bf16.mxu0 %v7602_v26  ;;  %v4879_v10 = vsel %vm7881_vm11, %v4874_v41, %v9113_v37  ;;  %v4922_v61 = vrot.slane %v4921_v3, 4  ;;  %v4932_v17 = vrot.slane %v4931_v38, 4  ;;  %v4936_v45 = vrot.slane %v4934_v23, 5 }
 0x16d   : > { %v9731_v40 = vor.u32 %v8715_v36, %v8713_v33  ;;  %v9732_v54 = vcombine.low %v8989_v27, %v9007_v24  ;;  %v4889_v57 = vsel %vm7881_vm11, %v4884_v48, %v4888_v9  ;;  %v4903_v44 = vsel %vm7881_vm11, %v4898_v25, %v9122_v28  ;;  %v7606_v36 = vld [vmem:[%s9689_s2 + $0x218] sm:$0xff]   ;;  %v9213_v9 = vld [vmem:[#allocation2 + $0xb0] sm:$0x1] }
 0x16e   : > { %v4913_v37 = vsel %vm7881_vm11, %v4908_v14, %v4912_v5  ;;  %v9208_v29 = vrot.slane %v4948_v50, 5  ;;  %v9210_v27 = vrot.slane %v4952_v8, 4  ;;  %v4958_v24 = vshll.u32 %v9180_v19, 16  ;;  %v5385_v14 = vld [vmem:[#allocation2 + $0x54] sm:$0xe]  ;;  %v7609_v5 = vld [vmem:[%s9689_s2 + $0x220] sm:$0xff]  }
 0x16f   : > { %v9193_v1 = vrot.slane %v9731_v40, 4  ;;  %7181 = vmatpush3.bf16.msra.mxu0 %v7602_v26  ;;  %v4945_v26 = vor.u32 %v4944_v7, %v4941_v22  ;;  %v6468_v2 = vcombine.low %v4831_v11, %v4841_v6  ;;  %v9215_v28 = vrot.slane %v4963_v60, 4  ;;  %v5386_v7 = vld [vmem:[#allocation2 + $0x60] sm:$0xe] }
 0x170   : > { %6927 = vmatmul.mubr.bf16.gmra.mrb[20].mxu1 %v9730_v32  ;;  %7182 = vmatprep.subr.bf16.mxu0 %v7604_v43  ;;  %v9217_v41 = vrot.slane %v4966_v58, 5  ;;  %v4972_v3 = vshll.u32 %v9188_v63, 16  ;;  %v9221_v38 = vcombine.low %v4855_v62, %v4865_v34  ;;  %v9223_v23 = vcombine.low %v4879_v10, %v4889_v57  ;;  %v4665_v62 = vld [vmem:[#allocation2 + $0xb4] sm:$0xf] }
 0x171   : > { %6930 = vmatprep.mubr.bf16.mxu1 %v9732_v54  ;;  %v4927_v21 = vsel %vm7881_vm11, %v4922_v61, %v9141_v46  ;;  %v4937_v11 = vsel %vm7881_vm11, %v4932_v17, %v4936_v45  ;;  %v9231_v6 = vcombine.low %v4903_v44, %v4913_v37  ;;  %v4976_v48 = vshrl.u32 %v9188_v63, 16  ;;  %v9734_v61 = vld [vmem:[#allocation3_spill] sm:$0xff] }
 0x172   : > { %7151 = vmatmul.mubr.bf16.gmra.mrb[4].mxu0 %v9033_v31  ;;  %v6490_v25 = vrot.slane %v5384_v18, 9  ;;  %v5474_v31 = vrot.slane %v8922_v52, 5  ;;  %v9238_v46 = vrot.slane %v4945_v26, 4  ;;  %v4955_v22 = vor.u32 %v9210_v27, %v9208_v29 }
 0x173   : > { %7154 = vmatprep.mubr.bf16.mxu0 %v9057_v39  ;;  %7183 = vmatpush3.bf16.msra.mxu0 %v7604_v43  ;;  %v9242_v39 = vrot.slane %v4958_v24, 5  ;;  %v4982_v43 = vshll.u32 %v9213_v9, 16  ;;  %v9245_v50 = vcombine.low %v4927_v21, %v4937_v11  ;;  %v4969_v52 = vor.u32 %v9217_v41, %v9215_v28 }
 0x174   : > { %7184 = vmatprep.subr.bf16.mxu0 %v7606_v36  ;;  %v9249_v8 = vrot.slane %v4972_v3, 5  ;;  %v9253_v34 = vsel %vm8268_vm9, %v6490_v25, %v5474_v31  ;;  %v9733_v60 = vcombine.low %v9000_v55, %v9018_v51  ;;  %v5476_v58 = vrot.slane %v5474_v31, 4  ;;  %v5387_v55 = vld [vmem:[#allocation2 + $0x6c] sm:$0xe]  ;;  %v9270_v51 = vld [vmem:[#allocation2 + $0xb8] sm:$0xf] }
 0x175   : > { %v5477_v32 = vrot.slane %v8971_v16, 5  ;;  %v6491_v10 = vrot.slane %v5385_v14, 9  ;;  %v5481_v17 = vrot.slane %v9734_v61, 5  ;;  %v9735_v45 = vcombine.low %v9049_v35, %v9053_v49  ;;  %v7612_v16 = vld [vmem:[%s9689_s2 + $0x228] sm:$0xff]  }
 0x176   : > { %v9263_v40 = vrot.slane %v4976_v48, 4  ;;  %v5484_v54 = vrot.slane %v8973_v12, 5  ;;  %v6492_v57 = vrot.slane %v5386_v7, 9  ;;  %v5488_v44 = vrot.slane %v9011_v53, 5  ;;  %v7607_v3 = vld [vmem:[#allocation2 + $0xc] sm:$0xff]  }
 0x177   : > { %7185 = vmatpush3.bf16.msra.mxu0 %v7606_v36  ;;  %v4987_v37 = vshrl.u32 %v4665_v62, 16  ;;  %v9274_v35 = vsel %vm8268_vm9, %v5476_v58, %v5477_v32  ;;  %v9278_v49 = vsel %vm8268_vm9, %v6491_v10, %v5481_v17  ;;  %v5483_v12 = vrot.slane %v5481_v17, 4  ;;  %v3014_v48 = vld [vmem:[#allocation2 + $0x78] sm:$0xf]  ;;  %v9736_v58 = vld [vmem:[#allocation4_spill] sm:$0xff] }
 0x178   : > { %6931 = vmatmul.mubr.bf16.gmra.mrb[24].mxu1 %v9733_v60  ;;  %7186 = vmatprep.subr.bf16.mxu0 %v7609_v5  ;;  %v6522_v53 = vcombine.low %v9253_v34, %v9274_v35  ;;  %v9284_v36 = vsel %vm8268_vm9, %v6492_v57, %v5488_v44  ;;  %v5490_v26 = vrot.slane %v5488_v44, 4  ;;  %v5491_v27 = vrot.slane %v9037_v4, 5  ;;  %v5388_v60 = vld [vmem:[#allocation2 + $0x78] sm:$0xe]  ;;  %v4668_v17 = vld [vmem:[#allocation2 + $0xc0] sm:$0xf] }
 0x179   : > { %6934 = vmatprep.mubr.bf16.mxu1 %v9735_v45  ;;  %v9290_v24 = vsel %vm8268_vm9, %v5483_v12, %v5484_v54  ;;  %v6493_v18 = vrot.slane %v5387_v55, 9  ;;  %v5495_v28 = vrot.slane %v9065_v13, 5  ;;  %v5498_v41 = vrot.slane %v9111_v20, 5  ;;  %v7615_v20 = vld [vmem:[%s9689_s2 + $0x230] sm:$0xff]   ;;  %v9737_v32 = vld [vmem:[#allocation7_spill] sm:$0xff] }
 0x17a   : > { %7155 = vmatmul.mubr.bf16.gmra.mrb[8].mxu0 %v9076_v42  ;;  %v4990_v21 = vshll.u32 %v4665_v62, 16  ;;  %v4996_v11 = vshll.u32 %v9270_v51, 16  ;;  %v6523_v4 = vcombine.low %v9278_v49, %v9290_v24  ;;  %v9299_v42 = vsel %vm8268_vm9, %v5490_v26, %v5491_v27  ;;  %v5389_v55 = vld [vmem:[#allocation2 + $0x84] sm:$0xe]  ;;  %v7618_v12 = vld [vmem:[%s9689_s2 + $0x238] sm:$0xff]  }
 0x17b   : > { %7158 = vmatprep.mubr.bf16.mxu0 %v6468_v2  ;;  %7187 = vmatpush3.bf16.msra.mxu0 %v7609_v5  ;;  %v4951_v13 = vsel %vm7881_vm11, %v9238_v46, %v9208_v29  ;;  %v6524_v2 = vcombine.low %v9284_v36, %v9299_v42  ;;  %v9312_v25 = vsel %vm8268_vm9, %v6493_v18, %v5495_v28  ;;  %v5497_v31 = vrot.slane %v5495_v28, 4 }
 0x17c   : > { %7188 = vmatprep.subr.bf16.mxu0 %v7612_v16  ;;  %v9314_v14 = vrot.slane %v4955_v22, 4  ;;  %v9316_v5 = vrot.slane %v4969_v52, 4  ;;  %v9318_v7 = vrot.slane %v4982_v43, 5  ;;  %v5000_v62 = vshrl.u32 %v9270_v51, 16 }
 0x17d   : > { %v9738_v10 = vcombine.low %v9736_v58, %v9737_v32  ;;  %v4979_v61 = vor.u32 %v9263_v40, %v9249_v8  ;;  %v9328_v45 = vsel %vm8268_vm9, %v5497_v31, %v5498_v41  ;;  %v3252_v22 = vshrl.u32 %v3014_v48, 16  ;;  %v9338_v40 = vld [vmem:[#allocation2 + $0xc4] sm:$0xf] }
 0x17e   : > { %v3255_v52 = vshll.u32 %v3014_v48, 16  ;;  %v9330_v43 = vrot.slane %v4987_v37, 4  ;;  %v9332_v54 = vrot.slane %v4990_v21, 5  ;;  %v9334_v57 = vrot.slane %v4996_v11, 5  ;;  %v7608_v48 = vld [vmem:[#allocation2 + $0x18] sm:$0xff]   ;;  %v9741_v32 = vld [vmem:[#allocation8_spill] sm:$0xff] }
 0x17f   : > { %7189 = vmatpush3.bf16.msra.mxu0 %v7612_v16  ;;  %v6525_v44 = vcombine.low %v9312_v25, %v9328_v45  ;;  %v3254_v26 = vrot.slane %v3252_v22, 4  ;;  %v9739_v16 = vld [vmem:[#allocation6_spill] sm:$0xff]  ;;  %v6494_v18 = vrot.slane %v5388_v60, 9  ;;  %v5011_v28 = vshrl.u32 %v4668_v17, 16  ;;  %v9353_v60 = vld [vmem:[#allocation2 + $0xbc] sm:$0x1] }
 0x180   : > { %6935 = vmatmul.mubr.bf16.gmra.mrb[28].mxu1 %v9738_v10  ;;  %7190 = vmatprep.subr.bf16.mxu0 %v7615_v20  ;;  %v3257_v27 = vrot.slane %v3255_v52, 5  ;;  %v3274_v37 = vsel %vm7881_vm11, %v9193_v1, %v9739_v16  ;;  %v5014_v41 = vshll.u32 %v4668_v17, 16  ;;  %v5505_v11 = vrot.slane %v9115_v59, 5  ;;  %v7610_v52 = vld [vmem:[#allocation2 + $0x24] sm:$0xff]   ;;  %v7715_v45 = vld [vmem:[#allocation2 + $0xb0] sm:$0x1] }
 0x181   : > { %6954 = vmatprep.mubr.bf16.mxu1 %v7607_v3  ;;  %v9740_v3 = vld [vmem:[#allocation5_spill] sm:$0xff]  ;;  %v6495_v58 = vrot.slane %v5389_v55, 9  ;;  %v5509_v10 = vrot.slane %v9741_v32, 5  ;;  %v5512_v22 = vrot.slane %v9120_v15, 5  ;;  %v4980_v1 = vrot.slane %v4979_v61, 4 }
 0x182   : > { %v5502_v21 = vrot.slane %v9740_v3, 5  ;;  %7159 = vmatmul.mubr.bf16.gmra.mrb[12].mxu0 %v9221_v38  ;;  %v3258_v31 = vor.u32 %v3257_v27, %v3254_v26  ;;  %v5020_v17 = vshll.u32 %v9338_v40, 16  ;;  %v5024_v55 = vshrl.u32 %v9338_v40, 16  ;;  %v9400_v32 = vld [vmem:[#allocation2 + $0xd0] sm:$0xf] }
 0x183   : > { %7162 = vmatprep.mubr.bf16.mxu0 %v9223_v23  ;;  %7191 = vmatpush3.bf16.msra.mxu0 %v7615_v20  ;;  %v9363_v15 = vsel %vm8268_vm9, %v6495_v58, %v5509_v10  ;;  %v5511_v23 = vrot.slane %v5509_v10, 4  ;;  %v5002_v61 = vrot.slane %v5000_v62, 4  ;;  %v5013_v27 = vrot.slane %v5011_v28, 4  ;;  %v9742_v62 = vld [vmem:[#allocation10_spill] sm:$0xff] }
 0x184   : > { %v9358_v59 = vsel %vm8268_vm9, %v6494_v18, %v5502_v21  ;;  %v5504_v38 = vrot.slane %v5502_v21, 4  ;;  %7192 = vmatprep.subr.bf16.mxu0 %v7618_v12  ;;  %v3259_v26 = vrot.slane %v3258_v31, 4  ;;  %v5016_v16 = vrot.slane %v5014_v41, 5  ;;  %v4671_v41 = vld [vmem:[#allocation2 + $0xcc] sm:$0xf] }
 0x185   : > { %v5006_v18 = vshll.u32 %v9353_v60, 16  ;;  %v9377_v31 = vsel %vm8268_vm9, %v5511_v23, %v5512_v22  ;;  %v4961_v28 = vsel %vm7881_vm11, %v9314_v14, %v9242_v39  ;;  %v4975_v58 = vsel %vm7881_vm11, %v9316_v5, %v9249_v8  ;;  %v7611_v8 = vld [vmem:[#allocation2 + $0x30] sm:$0xff]  }
 0x186   : > { %v9367_v20 = vsel %vm8268_vm9, %v5504_v38, %v5505_v11  ;;  %v3264_v3 = vsel %vm7881_vm11, %v3259_v26, %v8713_v33  ;;  %v6527_v33 = vcombine.low %v9363_v15, %v9377_v31  ;;  %v4985_v39 = vsel %vm7881_vm11, %v4980_v1, %v9318_v7  ;;  %v5390_v26 = vld [vmem:[#allocation2 + $0x90] sm:$0xe] }
 0x187   : > { %v6526_v21 = vcombine.low %v9358_v59, %v9367_v20  ;;  %v9384_v11 = vcombine.low %v3264_v3, %v3274_v37  ;;  %v9398_v14 = vrot.slane %v5020_v17, 5  ;;  %v5026_v37 = vrot.slane %v5024_v55, 4  ;;  %7193 = vmatpush3.bf16.msra.mxu0 %v7618_v12  ;;  %v5391_v55 = vld [vmem:[#allocation2 + $0x9c] sm:$0xe]  ;;  %v7691_v23 = vld [vmem:[%s9689_s2 + $0x110] sm:$0xff]  }
 0x188   : > { %6955 = vmatmul.mubr.bf16.vlgmr.msra.gmra.mrb[0].mxu1 %v7608_v48  ;;  %v7690_v48 = vld [vmem:[%s9689_s2 + $0x108] sm:$0xff]   ;;  %v4993_v10 = vor.u32 %v9332_v54, %v9330_v43  ;;  %v5003_v22 = vor.u32 %v5002_v61, %v9334_v57  ;;  %v5017_v38 = vor.u32 %v5016_v16, %v5013_v27  ;;  %v6473_v5 = vcombine.low %v4951_v13, %v4961_v28  ;;  %v7613_v43 = vld [vmem:[#allocation2 + $0x3c] sm:$0xff]  }
 0x189   : > { %7234 = vmatpush3.bf16.msra.mxu1 %v9742_v62  ;;  %6958 = vmatprep.mubr.bf16.mxu1 %v7610_v52  ;;  %v9405_v52 = vld [vmem:[#allocation2 + $0xc8] sm:$0x1]  ;;  %v9413_v7 = vrot.slane %v5006_v18, 5  ;;  %v5035_v12 = vshrl.u32 %v4671_v41, 16  ;;  %v6474_v54 = vcombine.low %v4975_v58, %v4985_v39  ;;  %v5038_v1 = vshll.u32 %v4671_v41, 16 }
 0x18a   : > { %7227 = vmatprep.subr.bf16.mxu1 %v7690_v48  ;;  %7163 = vmatmul.mubr.bf16.gmra.mrb[16].mxu0 %v9231_v6  ;;  %v5044_v17 = vshll.u32 %v9400_v32, 16  ;;  %v5048_v6 = vshrl.u32 %v9400_v32, 16  ;;  %v5027_v29 = vor.u32 %v5026_v37, %v9398_v14  ;;  %v5030_v46 = vshll.u32 %v9405_v52, 16 }
 0x18b   : > { %7166 = vmatprep.mubr.bf16.mxu0 %v9245_v50  ;;  %v6496_v13 = vrot.slane %v5390_v26, 9  ;;  %v9743_v50 = vld [vmem:[#allocation9_spill] sm:$0xff]  ;;  %v4994_v27 = vrot.slane %v4993_v10, 4  ;;  %v5004_v16 = vrot.slane %v5003_v22, 4  ;;  %v5018_v18 = vrot.slane %v5017_v38, 4 }
 0x18c   : > { %v5516_v61 = vrot.slane %v9743_v50, 5  ;;  %v5519_v3 = vrot.slane %v9148_v47, 5  ;;  %v5037_v62 = vrot.slane %v5035_v12, 4  ;;  %v5040_v58 = vrot.slane %v5038_v1, 5  ;;  %v7692_v47 = vld [vmem:[%s9689_s2 + $0x118] sm:$0xff]  }
 0x18d   : > { %7235 = vmatpush3.bf16.msra.mxu1 %v7690_v48  ;;  %v6497_v48 = vrot.slane %v5391_v55, 9  ;;  %v9429_v39 = vrot.slane %v5044_v17, 5  ;;  %v5050_v37 = vrot.slane %v5048_v6, 4  ;;  %v5523_v10 = vrot.slane %v9163_v56, 5  ;;  %v9435_v26 = vld [vmem:[#allocation2 + $0xd4] sm:$0x1] }
 0x18e   : > { %7228 = vmatprep.subr.bf16.mxu1 %v7691_v23  ;;  %v9427_v28 = vsel %vm8268_vm9, %v6496_v13, %v5516_v61  ;;  %v5518_v41 = vrot.slane %v5516_v61, 4  ;;  %v5028_v22 = vrot.slane %v5027_v29, 4  ;;  %v5032_v38 = vrot.slane %v5030_v46, 5  ;;  %v7614_v56 = vld [vmem:[#allocation2 + $0x48] sm:$0xff]   ;;  %v5380_v46 = vld [vmem:[#allocation2 + $0x18] sm:$0xe] }
 0x18f   : > { %v5526_v12 = vrot.slane %v9180_v19, 5  ;;  %v4999_v1 = vsel %vm7881_vm11, %v4994_v27, %v9334_v57  ;;  %v9449_v17 = vsel %vm8268_vm9, %v6497_v48, %v5523_v10  ;;  %v5525_v6 = vrot.slane %v5523_v10, 4  ;;  %v7616_v19 = vld [vmem:[#allocation2 + $0x54] sm:$0xff]  }
 0x190   : > { %6959 = vmatmul.mubr.bf16.gmra.mrb[4].mxu1 %v7611_v8  ;;  %v9439_v8 = vsel %vm8268_vm9, %v5518_v41, %v5519_v3  ;;  %v5009_v55 = vsel %vm7881_vm11, %v5004_v16, %v9413_v7  ;;  %v5054_v29 = vshll.u32 %v9435_v26, 16  ;;  %v5023_v57 = vsel %vm7881_vm11, %v5018_v18, %v9398_v14  ;;  %v7694_v7 = vld [vmem:[#allocation2 + $0x1c] sm:$0xf]  ;;  %v5392_v16 = vld [vmem:[#allocation2 + $0xa8] sm:$0xe] }
 0x191   : > { %6962 = vmatprep.mubr.bf16.mxu1 %v7613_v43  ;;  %7236 = vmatpush3.bf16.msra.mxu1 %v7691_v23  ;;  %v6528_v43 = vcombine.low %v9427_v28, %v9439_v8  ;;  %v5041_v23 = vor.u32 %v5040_v58, %v5037_v62  ;;  %v5033_v13 = vsel %vm7881_vm11, %v5028_v22, %v5032_v38  ;;  %v5446_v50 = vrot.slane %v7694_v7, 5  ;;  %v7695_v3 = vld [vmem:[#allocation2 + $0x20] sm:$0x1]  ;;  %v5393_v10 = vld [vmem:[#allocation2 + $0xb4] sm:$0xe]  ;;  %v7696_v22 = vld [vmem:[%s9689_s2 + $0x128] sm:$0xff]  }
 0x192   : > { %7229 = vmatprep.subr.bf16.mxu1 %v7692_v47  ;;  %7167 = vmatmul.mubr.bf16.gmra.mrb[20].mxu0 %v6473_v5  ;;  %v5051_v5 = vor.u32 %v5050_v37, %v9429_v39  ;;  %v9466_v61 = vsel %vm8268_vm9, %v5525_v6, %v5526_v12  ;;  %v6475_v14 = vcombine.low %v4999_v1, %v5009_v55  ;;  %v6486_v18 = vrot.slane %v5380_v46, 9  ;;  %v7617_v1 = vld [vmem:[#allocation2 + $0x60] sm:$0xff]   ;;  %v7619_v6 = vld [vmem:[#allocation2 + $0x6c] sm:$0xff]   ;;  %v7697_v55 = vld [vmem:[#allocation2 + $0x28] sm:$0xf] }
 0x193   : > { %7170 = vmatprep.mubr.bf16.mxu0 %v6474_v54  ;;  %v7693_v54 = vld [vmem:[%s9689_s2 + $0x120] sm:$0xff]   ;;  %v6529_v27 = vcombine.low %v9449_v17, %v9466_v61  ;;  %v5449_v62 = vrot.slane %v7695_v3, 5  ;;  %v6476_v41 = vcombine.low %v5023_v57, %v5033_v13  ;;  %v5042_v48 = vrot.slane %v5041_v23, 4  ;;  %v5382_v57 = vld [vmem:[#allocation2 + $0x30] sm:$0xe] }
 0x194   : > { %v5052_v58 = vrot.slane %v5051_v5, 4  ;;  %v5056_v37 = vrot.slane %v5054_v29, 5  ;;  %v6498_v38 = vrot.slane %v5392_v16, 9  ;;  %v5530_v12 = vrot.slane %v9188_v63, 5 }
 0x195   : > { %7237 = vmatpush3.bf16.msra.mxu1 %v7692_v47  ;;  %v5448_v47 = vrot.slane %v5446_v50, 4  ;;  %v6499_v29 = vrot.slane %v5393_v10, 9  ;;  %v5047_v46 = vsel %vm7881_vm11, %v5042_v48, %v9429_v39  ;;  %v5537_v13 = vrot.slane %v9270_v51, 5  ;;  %v7699_v39 = vld [vmem:[%s9689_s2 + $0x130] sm:$0xff]   ;;  %v7700_v10 = vld [vmem:[#allocation2 + $0x2c] sm:$0x1] }
 0x196   : > { %7230 = vmatprep.subr.bf16.mxu1 %v7693_v54  ;;  %v9477_v23 = vsel %vm8268_vm9, %v6498_v38, %v5530_v12  ;;  %v5532_v5 = vrot.slane %v5530_v12, 4  ;;  %v5057_v63 = vsel %vm7881_vm11, %v5052_v58, %v5056_v37  ;;  %v5447_v7 = vsel %vm8268_vm9, %v6486_v18, %v5446_v50  ;;  %v7701_v12 = vld [vmem:[#allocation2 + $0x38] sm:$0x1] }
 0x197   : > { %v5450_v16 = vsel %vm8268_vm9, %v5448_v47, %v5449_v62  ;;  %v5539_v50 = vrot.slane %v5537_v13, 4  ;;  %v6477_v18 = vcombine.low %v5047_v46, %v5057_v63  ;;  %v6488_v48 = vrot.slane %v5382_v57, 9 }
 0x198   : > { %6963 = vmatmul.mubr.bf16.gmra.mrb[8].mxu1 %v7614_v56  ;;  %v5533_v56 = vrot.slane %v9213_v9, 5  ;;  %v5381_v9 = vld [vmem:[#allocation2 + $0x24] sm:$0xe]  ;;  %v6518_v58 = vcombine.low %v5447_v7, %v5450_v16  ;;  %v5456_v47 = vrot.slane %v7700_v10, 5 }
 0x199   : > { %6966 = vmatprep.mubr.bf16.mxu1 %v7616_v19  ;;  %7238 = vmatpush3.bf16.msra.mxu1 %v7693_v54  ;;  %v5453_v19 = vrot.slane %v7697_v55, 5  ;;  %v5540_v54 = vrot.slane %v9353_v60, 5  ;;  %v9501_v60 = vsel %vm8268_vm9, %v6499_v29, %v5537_v13  ;;  %v6487_v62 = vrot.slane %v5381_v9, 9  ;;  %v5394_v55 = vld [vmem:[#allocation2 + $0xc0] sm:$0xe]  ;;  %v7620_v29 = vld [vmem:[#allocation2 + $0x78] sm:$0xff]  }
 0x19a   : > { %7231 = vmatprep.subr.bf16.mxu1 %v7696_v22  ;;  %7171 = vmatmul.mubr.bf16.gmra.mrb[24].mxu0 %v6475_v14  ;;  %v7698_v14 = vld [vmem:[#allocation2 + $0x34] sm:$0xf]  ;;  %v5383_v9 = vld [vmem:[#allocation2 + $0x3c] sm:$0xe]  ;;  %v7621_v13 = vld [vmem:[#allocation2 + $0x84] sm:$0xff]   ;;  %v6500_v16 = vrot.slane %v5394_v55, 9 }
 0x19b   : > { %7174 = vmatprep.mubr.bf16.mxu0 %v6476_v41  ;;  %v5460_v3 = vrot.slane %v7698_v14, 5  ;;  %v9495_v41 = vsel %vm8268_vm9, %v5532_v5, %v5533_v56  ;;  %v5455_v37 = vrot.slane %v5453_v19, 4  ;;  %v5463_v56 = vrot.slane %v7701_v12, 5  ;;  %v3011_v5 = vld [vmem:[#allocation2 + $0x6c] sm:$0xf] }
 0x19c   : > { %v6530_v51 = vcombine.low %v9477_v23, %v9495_v41  ;;  %v5454_v46 = vsel %vm8268_vm9, %v6487_v62, %v5453_v19  ;;  %v5544_v14 = vrot.slane %v9338_v40, 5  ;;  %v3228_v19 = vshrl.u32 %v3011_v5, 16  ;;  %v7704_v62 = vld [vmem:[#allocation2 + $0x70] sm:$0xf] }
 0x19d   : > { %7239 = vmatpush3.bf16.msra.mxu1 %v7696_v22  ;;  %v9505_v22 = vsel %vm8268_vm9, %v5539_v50, %v5540_v54  ;;  %v5462_v38 = vrot.slane %v5460_v3, 4  ;;  %v5461_v63 = vsel %vm8268_vm9, %v6488_v48, %v5460_v3  ;;  %v5457_v57 = vsel %vm8268_vm9, %v5455_v37, %v5456_v47  ;;  %v7703_v54 = vld [vmem:[#allocation2 + $0x40] sm:$0xf] }
 0x19e   : > { %7232 = vmatprep.subr.bf16.mxu1 %v7699_v39  ;;  %v5467_v7 = vrot.slane %v7703_v54, 5  ;;  %v3237_v3 = vshll.u32 %v7704_v62, 16  ;;  %v6489_v48 = vrot.slane %v5383_v9, 9  ;;  %v3241_v12 = vshrl.u32 %v7704_v62, 16 }
 0x19f   : > { %v5464_v50 = vsel %vm8268_vm9, %v5462_v38, %v5463_v56  ;;  %v5546_v37 = vrot.slane %v5544_v14, 4  ;;  %v6519_v47 = vcombine.low %v5454_v46, %v5457_v57  ;;  %v5547_v40 = vrot.slane %v9405_v52, 5 }
 0x1a0   : > { %6967 = vmatmul.mubr.bf16.gmra.mrb[12].mxu1 %v7617_v1  ;;  %v7702_v1 = vld [vmem:[%s9689_s2 + $0x138] sm:$0xff]   ;;  %v6520_v38 = vcombine.low %v5461_v63, %v5464_v50  ;;  %v5469_v56 = vrot.slane %v5467_v7, 4  ;;  %v5554_v9 = vrot.slane %v9435_v26, 5  ;;  %v3230_v54 = vrot.slane %v3228_v19, 4 }
 0x1a1   : > { %6970 = vmatprep.mubr.bf16.mxu1 %v7619_v6  ;;  %7240 = vmatpush3.bf16.msra.mxu1 %v7699_v39  ;;  %v6531_v6 = vcombine.low %v9501_v60, %v9505_v22  ;;  %v5395_v39 = vld [vmem:[#allocation2 + $0xcc] sm:$0xe]  ;;  %v3239_v62 = vrot.slane %v3237_v3, 5  ;;  %v3243_v46 = vrot.slane %v3241_v12, 4  ;;  %v5468_v26 = vsel %vm8268_vm9, %v6489_v48, %v5467_v7  ;;  %v7706_v3 = vld [vmem:[#allocation2 + $0x74] sm:$0x1] }
 0x1a2   : > { %7233 = vmatprep.subr.bf16.mxu1 %v7702_v1  ;;  %7175 = vmatmul.mubr.bf16.gmra.mrb[28].mxu0 %v6477_v18  ;;  %v3231_v18 = vshll.u32 %v3011_v5, 16  ;;  %v6501_v55 = vrot.slane %v5395_v39, 9  ;;  %v5551_v5 = vrot.slane %v9400_v32, 5  ;;  %v7622_v32 = vld [vmem:[#allocation2 + $0x90] sm:$0xff]   ;;  %v3247_v12 = vshll.u32 %v7706_v3, 16 }
 0x1a3   : > { %7194 = vmatprep.mubr.bf16.mxu0 %v6518_v58  ;;  %v7705_v58 = vld [vmem:[#allocation2 + $0x44] sm:$0x1]  ;;  %v7707_v48 = vld [vmem:[#allocation2 + $0x88] sm:$0xf]  ;;  %v7709_v3 = vld [vmem:[#allocation2 + $0x94] sm:$0xf] }
 0x1a4   : > { %v5470_v10 = vrot.slane %v7705_v58, 5  ;;  %v3233_v58 = vrot.slane %v3231_v18, 5  ;;  %v9536_v52 = vsel %vm8268_vm9, %v6501_v55, %v5551_v5  ;;  %v5553_v63 = vrot.slane %v5551_v5, 4  ;;  %v7624_v5 = vld [vmem:[#allocation2 + $0xa8] sm:$0xff]  }
 0x1a5   : > { %7241 = vmatpush3.bf16.msra.mxu1 %v7702_v1  ;;  %v9523_v1 = vsel %vm8268_vm9, %v6500_v16, %v5544_v14  ;;  %v7623_v16 = vld [vmem:[#allocation2 + $0x9c] sm:$0xff]   ;;  %v3017_v14 = vld [vmem:[#allocation2 + $0x84] sm:$0xf]  ;;  %v3244_v18 = vor.u32 %v3243_v46, %v3239_v62 }
 0x1a6   : > { %v9544_v39 = vsel %vm8268_vm9, %v5553_v63, %v5554_v9  ;;  %v3234_v50 = vor.u32 %v3233_v58, %v3230_v54  ;;  %v3279_v7 = vshll.u32 %v3017_v14, 16  ;;  %v7625_v9 = vld [vmem:[#allocation2 + $0xb4] sm:$0xff]  }
 0x1a7   : > { %v6533_v19 = vcombine.low %v9536_v52, %v9544_v39  ;;  %v3245_v30 = vrot.slane %v3244_v18, 4 }
 0x1a8   : > { %6971 = vmatmul.mubr.bf16.gmra.mrb[16].mxu1 %v7620_v29  ;;  %v9530_v29 = vsel %vm8268_vm9, %v5546_v37, %v5547_v40  ;;  %v3289_v40 = vshrl.u32 %v7707_v48, 16  ;;  %v3235_v55 = vrot.slane %v3234_v50, 4  ;;  %v3281_v58 = vrot.slane %v3279_v7, 5  ;;  %v7708_v50 = vld [vmem:[#allocation2 + $0x8c] sm:$0x1] }
 0x1a9   : > { %6974 = vmatprep.mubr.bf16.mxu1 %v7621_v13  ;;  %v6532_v57 = vcombine.low %v9523_v1, %v9530_v29  ;;  %v5471_v13 = vsel %vm8268_vm9, %v5469_v56, %v5470_v10  ;;  %v3285_v10 = vshll.u32 %v7707_v48, 16  ;;  %v3249_v56 = vrot.slane %v3247_v12, 5 }
 0x1aa   : > { %7195 = vmatmul.mubr.bf16.vlgmr.msra.gmra.mrb[0].mxu0 %v6519_v47  ;;  %v6521_v37 = vcombine.low %v5468_v26, %v5471_v13  ;;  %v3276_v47 = vshrl.u32 %v3017_v14, 16  ;;  %v3291_v63 = vrot.slane %v3289_v40, 4  ;;  %v3023_v13 = vld [vmem:[#allocation2 + $0x9c] sm:$0xf]  ;;  %v3295_v18 = vshll.u32 %v7708_v50, 16 }
 0x1ab   : > { %7198 = vmatprep.mubr.bf16.mxu0 %v6520_v38  ;;  %v3020_v38 = vld [vmem:[#allocation2 + $0x90] sm:$0xf]  ;;  %v9551_v46 = vrot.slane %v3285_v10, 5  ;;  %v3250_v14 = vsel %vm7881_vm11, %v3245_v30, %v3249_v56  ;;  %v3309_v12 = vshll.u32 %v7709_v3, 16  ;;  %v3324_v34 = vshrl.u32 %v3023_v13, 16 }
 0x1ac   : > { %v3278_v54 = vrot.slane %v3276_v47, 4  ;;  %v3303_v26 = vshll.u32 %v3020_v38, 16  ;;  %v3327_v35 = vshll.u32 %v3023_v13, 16  ;;  %v3297_v30 = vrot.slane %v3295_v18, 5  ;;  %v7712_v18 = vld [vmem:[#allocation2 + $0xa4] sm:$0x1] }
 0x1ad   : > { %v3292_v10 = vor.u32 %v3291_v63, %v9551_v46  ;;  %v9558_v56 = vrot.slane %v3309_v12, 5  ;;  %v3343_v49 = vshll.u32 %v7712_v18, 16  ;;  %v3029_v12 = vld [vmem:[#allocation2 + $0xb4] sm:$0xf] }
 0x1ae   : > { %v3282_v48 = vor.u32 %v3281_v58, %v3278_v54  ;;  %v3329_v13 = vrot.slane %v3327_v35, 5  ;;  %v3026_v54 = vld [vmem:[#allocation2 + $0xa8] sm:$0xf]  ;;  %v7713_v35 = vld [vmem:[#allocation2 + $0xac] sm:$0xf] }
 0x1af   : > { %v3293_v63 = vrot.slane %v3292_v10, 4  ;;  %v3348_v24 = vshrl.u32 %v3026_v54, 16  ;;  %v3361_v36 = vshrl.u32 %v7713_v35, 16  ;;  %v3375_v10 = vshll.u32 %v3029_v12, 16 }
 0x1b0   : > { %6975 = vmatmul.mubr.bf16.gmra.mrb[20].mxu1 %v7622_v32  ;;  %v3300_v32 = vshrl.u32 %v3020_v38, 16  ;;  %v3283_v58 = vrot.slane %v3282_v48, 4  ;;  %v3372_v48 = vshrl.u32 %v3029_v12, 16 }
 0x1b1   : > { %6978 = vmatprep.mubr.bf16.mxu1 %v7623_v16  ;;  %v3240_v16 = vsel %vm7881_vm11, %v3235_v55, %v3239_v62  ;;  %v3305_v62 = vrot.slane %v3303_v26, 5  ;;  %v7626_v55 = vld [vmem:[#allocation2 + $0xc0] sm:$0xff]   ;;  %v7711_v26 = vld [vmem:[#allocation2 + $0x98] sm:$0x1] }
 0x1b2   : > { %7199 = vmatmul.mubr.bf16.gmra.mrb[4].mxu0 %v6521_v37  ;;  %v3313_v37 = vshrl.u32 %v7709_v3, 16  ;;  %v3302_v40 = vrot.slane %v3300_v32, 4  ;;  %v6334_v38 = vcombine.low %v3240_v16, %v3250_v14  ;;  %v3319_v16 = vshll.u32 %v7711_v26, 16 }
 0x1b3   : > { %7202 = vmatprep.mubr.bf16.mxu0 %v6522_v53  ;;  %v7710_v53 = vld [vmem:[#allocation2 + $0xa0] sm:$0xf]  ;;  %v3288_v42 = vsel %vm7881_vm11, %v3283_v58, %v9551_v46  ;;  %v3363_v58 = vrot.slane %v3361_v36, 4 }
 0x1b4   : > { %v3333_v47 = vshll.u32 %v7710_v53, 16  ;;  %v3337_v7 = vshrl.u32 %v7710_v53, 16  ;;  %v3315_v50 = vrot.slane %v3313_v37, 4  ;;  %v3306_v32 = vor.u32 %v3305_v62, %v3302_v40  ;;  %v7714_v40 = vld [vmem:[#allocation2 + $0xb8] sm:$0xf] }
 0x1b5   : > { %v3357_v53 = vshll.u32 %v7713_v35, 16  ;;  %v3381_v62 = vshll.u32 %v7714_v40, 16 }
 0x1b6   : > { %v9563_v3 = vrot.slane %v3333_v47, 5  ;;  %v3316_v14 = vor.u32 %v3315_v50, %v9558_v56  ;;  %v3307_v47 = vrot.slane %v3306_v32, 4  ;;  %v3377_v32 = vrot.slane %v3375_v10, 5 }
 0x1b7   : > { %v3383_v26 = vrot.slane %v3381_v62, 5 }
 0x1b8   : > { %6979 = vmatmul.mubr.bf16.gmra.mrb[24].mxu1 %v7624_v5  ;;  %v3326_v5 = vrot.slane %v3324_v34, 4  ;;  %v3317_v50 = vrot.slane %v3316_v14, 4  ;;  %v3032_v14 = vld [vmem:[#allocation2 + $0xc0] sm:$0xf]  ;;  %v3312_v18 = vsel %vm7881_vm11, %v3307_v47, %v9558_v56  ;;  %v7716_v56 = vld [vmem:[#allocation2 + $0xc4] sm:$0xf] }
 0x1b9   : > { %6982 = vmatprep.mubr.bf16.mxu1 %v7625_v9  ;;  %v3339_v9 = vrot.slane %v3337_v7, 4  ;;  %v3321_v7 = vrot.slane %v3319_v16, 5  ;;  %v3405_v12 = vshll.u32 %v7716_v56, 16 }
 0x1ba   : > { %7203 = vmatmul.mubr.bf16.gmra.mrb[8].mxu0 %v6523_v4  ;;  %v3351_v4 = vshll.u32 %v3026_v54, 16  ;;  %v3330_v37 = vor.u32 %v3329_v13, %v3326_v5  ;;  %v3345_v5 = vrot.slane %v3343_v49, 5  ;;  %v3350_v13 = vrot.slane %v3348_v24, 4 }
 0x1bb   : > { %7206 = vmatprep.mubr.bf16.mxu0 %v6524_v2  ;;  %v3340_v34 = vor.u32 %v3339_v9, %v9563_v3  ;;  %v3298_v2 = vsel %vm7881_vm11, %v3293_v63, %v3297_v30  ;;  %v3359_v54 = vrot.slane %v3357_v53, 5  ;;  %v3374_v63 = vrot.slane %v3372_v48, 4  ;;  %v7717_v53 = vld [vmem:[#allocation2 + $0xbc] sm:$0x1] }
 0x1bc   : > { %v3353_v9 = vrot.slane %v3351_v4, 5  ;;  %v6336_v30 = vcombine.low %v3288_v42, %v3298_v2  ;;  %v3322_v25 = vsel %vm7881_vm11, %v3317_v50, %v3321_v7  ;;  %v3396_v24 = vshrl.u32 %v3032_v14, 16 }
 0x1bd   : > { %v3341_v46 = vrot.slane %v3340_v34, 4  ;;  %v3364_v49 = vor.u32 %v3363_v58, %v3359_v54  ;;  %v3399_v4 = vshll.u32 %v3032_v14, 16  ;;  %v3378_v34 = vor.u32 %v3377_v32, %v3374_v63 }
 0x1be   : > { %v3391_v36 = vshll.u32 %v7717_v53, 16  ;;  %v3398_v7 = vrot.slane %v3396_v24, 4  ;;  %v3407_v10 = vrot.slane %v3405_v12, 5 }
 0x1bf   : > { %v3346_v20 = vsel %vm7881_vm11, %v3341_v46, %v3345_v5  ;;  %v3365_v2 = vrot.slane %v3364_v49, 4  ;;  %v3401_v48 = vrot.slane %v3399_v4, 5  ;;  %v3379_v62 = vrot.slane %v3378_v34, 4 }
 0x1c0   : > { %6983 = vmatmul.mubr.bf16.gmra.mrb[28].mxu1 %v7626_v55  ;;  %v3385_v55 = vshrl.u32 %v7714_v40, 16  ;;  %v3393_v50 = vrot.slane %v3391_v36, 5 }
 0x1c1   : > { %7018 = vmatprep.mubr.bf16.mxu1 %v6334_v38  ;;  %v3331_v38 = vrot.slane %v3330_v37, 4  ;;  %v3409_v37 = vshrl.u32 %v7716_v56, 16  ;;  %v3384_v8 = vsel %vm7881_vm11, %v3379_v62, %v3383_v26 }
 0x1c2   : > { %7207 = vmatmul.mubr.bf16.gmra.mrb[12].mxu0 %v6525_v44  ;;  %v3387_v16 = vrot.slane %v3385_v55, 4  ;;  %v3367_v44 = vshll.u32 %v7715_v45, 16 }
 0x1c3   : > { %7210 = vmatprep.mubr.bf16.mxu0 %v6526_v21  ;;  %v3336_v59 = vsel %vm7881_vm11, %v3331_v38, %v9563_v3  ;;  %v3354_v21 = vor.u32 %v3353_v9, %v3350_v13  ;;  %v3411_v40 = vrot.slane %v3409_v37, 4  ;;  %v7718_v13 = vld [vmem:[#allocation2 + $0xc8] sm:$0x1] }
 0x1c4   : > { %v3388_v35 = vor.u32 %v3387_v16, %v3383_v26  ;;  %v6338_v3 = vcombine.low %v3336_v59, %v3346_v20  ;;  %v3369_v47 = vrot.slane %v3367_v44, 5  ;;  %v3415_v28 = vshll.u32 %v7718_v13, 16 }
 0x1c5   : > { %v3355_v42 = vrot.slane %v3354_v21, 4  ;;  %v3412_v5 = vor.u32 %v3411_v40, %v3407_v10 }
 0x1c6   : > { %v3389_v55 = vrot.slane %v3388_v35, 4  ;;  %v3370_v31 = vsel %vm7881_vm11, %v3365_v2, %v3369_v47  ;;  %v3417_v58 = vrot.slane %v3415_v28, 5 }
 0x1c7   : > { %v3360_v15 = vsel %vm7881_vm11, %v3355_v42, %v3359_v54  ;;  %v3413_v54 = vrot.slane %v3412_v5, 4 }
 0x1c8   : > { %7019 = vmatmul.mubr.bf16.vlgmr.msra.gmra.mrb[16].mxu1 %v9384_v11  ;;  %v6337_v11 = vcombine.low %v3312_v18, %v3322_v25  ;;  %v6339_v9 = vcombine.low %v3360_v15, %v3370_v31 }
 0x1c9   : > { %7022 = vmatprep.mubr.bf16.mxu1 %v6336_v30  ;;  %v3418_v63 = vsel %vm7881_vm11, %v3413_v54, %v3417_v58 }
 0x1ca   : > { %7211 = vmatmul.mubr.bf16.gmra.mrb[16].mxu0 %v6527_v33  ;;  %v3402_v33 = vor.u32 %v3401_v48, %v3398_v7 }
 0x1cb   : > { %7214 = vmatprep.mubr.bf16.mxu0 %v6528_v43  ;;  %v3394_v43 = vsel %vm7881_vm11, %v3389_v55, %v3393_v50 }
 0x1cc   : > { %v6340_v38 = vcombine.low %v3384_v8, %v3394_v43  ;;  %v3403_v46 = vrot.slane %v3402_v33, 4 }
 0x1ce   : > { %v3408_v30 = vsel %vm7881_vm11, %v3403_v46, %v3407_v10 }
 0x1cf   : > { %v6341_v17 = vcombine.low %v3408_v30, %v3418_v63 }
 0x1d0   : > { %7023 = vmatmul.mubr.bf16.gmra.mrb[20].mxu1 %v6337_v11 }
 0x1d1   : > { %7026 = vmatprep.mubr.bf16.mxu1 %v6338_v3 }
 0x1d2   : > { %7215 = vmatmul.mubr.bf16.gmra.mrb[20].mxu0 %v6529_v27 }
 0x1d3   : > { %7218 = vmatprep.mubr.bf16.mxu0 %v6530_v51 }
 0x1d8   : > { %7027 = vmatmul.mubr.bf16.gmra.mrb[24].mxu1 %v6339_v9 }
 0x1d9   : > { %7030 = vmatprep.mubr.bf16.mxu1 %v6340_v38 }
 0x1da   : > { %7219 = vmatmul.mubr.bf16.gmra.mrb[24].mxu0 %v6531_v6 }
 0x1db   : > { %7222 = vmatprep.mubr.bf16.mxu0 %v6532_v57 }
 0x1e0   : > { %7031 = vmatmul.mubr.bf16.gmra.mrb[28].mxu1 %v6341_v17 }
 0x1e2   : > { %7223 = vmatmul.mubr.bf16.gmra.mrb[28].mxu0 %v6533_v19 }
 0x25b   : > { %v6956_v61 = vpop.f32.mrb[0].mxu1 }
 0x25c   : > { %v2828_v27 = vpop.f32.mrb[1].mxu1 }
 0x25d   : > { %v6957_v23 = vpop.f32.mrb[2].mxu1 }
 0x25e   : > { %v2831_v0 = vpop.f32.mrb[3].mxu1 }
 0x263   : > { %v6960_v41 = vpop.f32.mrb[4].mxu1 }
 0x264   : > { %v2844_v51 = vpop.f32.mrb[5].mxu1 }
 0x265   : > { %v6961_v32 = vpop.f32.mrb[6].mxu1 }
 0x266   : > { %v2847_v60 = vpop.f32.mrb[7].mxu1 }
 0x26b   : > { %v6964_v22 = vpop.f32.mrb[8].mxu1 }
 0x26c   : > { %v2860_v6 = vpop.f32.mrb[9].mxu1 }
 0x26d   : > { %v6965_v26 = vpop.f32.mrb[10].mxu1 }
 0x26e   : > { %v9625_v16 = vpop.f32.mrb[11].mxu1 }
 0x273   : > { %v9627_v1 = vpop.f32.mrb[12].mxu1 }
 0x274   : > { %v9629_v29 = vpop.f32.mrb[13].mxu1 }
 0x275   : > { %v9631_v57 = vpop.f32.mrb[14].mxu1 }
 0x276   : > { %v9633_v52 = vpop.f32.mrb[15].mxu1 }
 0x27d   : > { %v7196_v39 = vpop.f32.mrb[0].mxu0 }
 0x27e   : > { %v7242_v19 = vadd.f32 %v7196_v39, %v6956_v61  ;;  %v5719_v14 = vpop.f32.mrb[1].mxu0 }
 0x27f   : > { %v7243_v18 = vadd.f32 %v5719_v14, %v2828_v27  ;;  %v7197_v25 = vpop.f32.mrb[2].mxu0 }
 0x280   : > { %5880 = vst [vmem:[%s9640_s23 + $0x10] sm:$0xff] %v7242_v19  ;;  %v7244_v45 = vadd.f32 %v7197_v25, %v6957_v23  ;;  %v5722_v44 = vpop.f32.mrb[3].mxu0  ;;  %v5949_v24 = vmul.f32 %v7242_v19, %v7242_v19 }
 0x281   : > { %5878 = vst [vmem:[%s9640_s23] sm:$0xff] %v7243_v18  ;;  %v7245_v59 = vadd.f32 %v5722_v44, %v2831_v0  ;;  %v5947_v20 = vmul.f32 %v7243_v18, %v7243_v18 }
 0x282   : > { %5881 = vst [vmem:[%s9640_s23 + $0x18] sm:$0xff] %v7244_v45  ;;  %v5950_v35 = vmul.f32 %v7244_v45, %v7244_v45 }
 0x283   : > { %5879 = vst [vmem:[%s9640_s23 + $0x8] sm:$0xff] %v7245_v59  ;;  %v5910_v21 = vadd.f32 %v7245_v59, %v7243_v18  ;;  %v5948_v49 = vmul.f32 %v7245_v59, %v7245_v59 }
 0x285   : > { %v5911_v4 = vadd.f32 %v7242_v19, %v5910_v21  ;;  %v5979_v56 = vadd.f32 %v5948_v49, %v5947_v20  ;;  %v7200_v12 = vpop.f32.mrb[4].mxu0 }
 0x286   : > { %v7246_v37 = vadd.f32 %v7200_v12, %v6960_v41  ;;  %v5735_v34 = vpop.f32.mrb[5].mxu0 }
 0x287   : > { %v5980_v53 = vadd.f32 %v5979_v56, %v5949_v24  ;;  %v7247_v36 = vadd.f32 %v5735_v34, %v2844_v51  ;;  %v5912_v11 = vadd.f32 %v7244_v45, %v5911_v4  ;;  %v7201_v3 = vpop.f32.mrb[6].mxu0 }
 0x288   : > { %5884 = vst [vmem:[%s9640_s23 + $0x30] sm:$0xff] %v7246_v37  ;;  %v7248_v42 = vadd.f32 %v7201_v3, %v6961_v32  ;;  %v5738_v2 = vpop.f32.mrb[7].mxu0  ;;  %v5953_v50 = vmul.f32 %v7246_v37, %v7246_v37 }
 0x289   : > { %5882 = vst [vmem:[%s9640_s23 + $0x20] sm:$0xff] %v7247_v36  ;;  %v5913_v47 = vadd.f32 %v7247_v36, %v5912_v11  ;;  %v5951_v7 = vmul.f32 %v7247_v36, %v7247_v36  ;;  %v5981_v48 = vadd.f32 %v5980_v53, %v5950_v35  ;;  %v7249_v10 = vadd.f32 %v5738_v2, %v2847_v60 }
 0x28a   : > { %5885 = vst [vmem:[%s9640_s23 + $0x38] sm:$0xff] %v7248_v42  ;;  %v5954_v28 = vmul.f32 %v7248_v42, %v7248_v42 }
 0x28b   : > { %v5982_v40 = vadd.f32 %v5981_v48, %v5951_v7  ;;  %5883 = vst [vmem:[%s9640_s23 + $0x28] sm:$0xff] %v7249_v10  ;;  %v5914_v62 = vadd.f32 %v7249_v10, %v5913_v47  ;;  %v5952_v55 = vmul.f32 %v7249_v10, %v7249_v10 }
 0x28d   : > { %v5915_v15 = vadd.f32 %v7246_v37, %v5914_v62  ;;  %v5983_v31 = vadd.f32 %v5982_v40, %v5952_v55  ;;  %v7204_v33 = vpop.f32.mrb[8].mxu0 }
 0x28e   : > { %v7250_v5 = vadd.f32 %v7204_v33, %v6964_v22  ;;  %v5751_v13 = vpop.f32.mrb[9].mxu0 }
 0x28f   : > { %v5984_v8 = vadd.f32 %v5983_v31, %v5953_v50  ;;  %v7251_v43 = vadd.f32 %v5751_v13, %v2860_v6  ;;  %v5916_v9 = vadd.f32 %v7248_v42, %v5915_v15  ;;  %v7205_v38 = vpop.f32.mrb[10].mxu0 }
 0x290   : > { %5888 = vst [vmem:[%s9640_s23 + $0x50] sm:$0xff] %v7250_v5  ;;  %v7252_v46 = vadd.f32 %v7205_v38, %v6965_v26  ;;  %v5754_v54 = vpop.f32.mrb[11].mxu0  ;;  %v5957_v0 = vmul.f32 %v7250_v5, %v7250_v5 }
 0x291   : > { %5886 = vst [vmem:[%s9640_s23 + $0x40] sm:$0xff] %v7251_v43  ;;  %v5917_v58 = vadd.f32 %v7251_v43, %v5916_v9  ;;  %v5955_v30 = vmul.f32 %v7251_v43, %v7251_v43  ;;  %v5985_v63 = vadd.f32 %v5984_v8, %v5954_v28  ;;  %v7253_v17 = vadd.f32 %v5754_v54, %v9625_v16 }
 0x292   : > { %5889 = vst [vmem:[%s9640_s23 + $0x58] sm:$0xff] %v7252_v46  ;;  %v5958_v6 = vmul.f32 %v7252_v46, %v7252_v46 }
 0x293   : > { %v5986_v61 = vadd.f32 %v5985_v63, %v5955_v30  ;;  %5887 = vst [vmem:[%s9640_s23 + $0x48] sm:$0xff] %v7253_v17  ;;  %v5918_v27 = vadd.f32 %v7253_v17, %v5917_v58  ;;  %v5956_v23 = vmul.f32 %v7253_v17, %v7253_v17 }
 0x295   : > { %v5919_v41 = vadd.f32 %v7250_v5, %v5918_v27  ;;  %v5987_v51 = vadd.f32 %v5986_v61, %v5956_v23  ;;  %v7208_v32 = vpop.f32.mrb[12].mxu0 }
 0x296   : > { %v7254_v60 = vadd.f32 %v7208_v32, %v9627_v1  ;;  %v5767_v22 = vpop.f32.mrb[13].mxu0 }
 0x297   : > { %v5988_v26 = vadd.f32 %v5987_v51, %v5957_v0  ;;  %v7255_v16 = vadd.f32 %v5767_v22, %v9629_v29  ;;  %v5920_v39 = vadd.f32 %v7252_v46, %v5919_v41  ;;  %v7209_v19 = vpop.f32.mrb[14].mxu0 }
 0x298   : > { %5892 = vst [vmem:[%s9640_s23 + $0x70] sm:$0xff] %v7254_v60  ;;  %v7256_v14 = vadd.f32 %v7209_v19, %v9631_v57  ;;  %v5770_v18 = vpop.f32.mrb[15].mxu0  ;;  %v5961_v56 = vmul.f32 %v7254_v60, %v7254_v60 }
 0x299   : > { %5890 = vst [vmem:[%s9640_s23 + $0x60] sm:$0xff] %v7255_v16  ;;  %v5921_v25 = vadd.f32 %v7255_v16, %v5920_v39  ;;  %v5959_v45 = vmul.f32 %v7255_v16, %v7255_v16  ;;  %v5989_v44 = vadd.f32 %v5988_v26, %v5958_v6  ;;  %v7257_v59 = vadd.f32 %v5770_v18, %v9633_v52 }
 0x29a   : > { %5893 = vst [vmem:[%s9640_s23 + $0x78] sm:$0xff] %v7256_v14  ;;  %v5962_v53 = vmul.f32 %v7256_v14, %v7256_v14 }
 0x29b   : > { %v7020_v1 = vpop.f32.mrb[16].mxu1  ;;  %v5990_v21 = vadd.f32 %v5989_v44, %v5959_v45  ;;  %5891 = vst [vmem:[%s9640_s23 + $0x68] sm:$0xff] %v7257_v59  ;;  %v5922_v49 = vadd.f32 %v7257_v59, %v5921_v25  ;;  %v5960_v29 = vmul.f32 %v7257_v59, %v7257_v59 }
 0x29c   : > { %v3646_v20 = vpop.f32.mrb[17].mxu1 }
 0x29d   : > { %v7021_v24 = vpop.f32.mrb[18].mxu1  ;;  %v5923_v57 = vadd.f32 %v7254_v60, %v5922_v49  ;;  %v5991_v12 = vadd.f32 %v5990_v21, %v5960_v29  ;;  %v7212_v37 = vpop.f32.mrb[16].mxu0 }
 0x29e   : > { %v3649_v4 = vpop.f32.mrb[19].mxu1  ;;  %v7258_v34 = vadd.f32 %v7212_v37, %v7020_v1  ;;  %v5783_v35 = vpop.f32.mrb[17].mxu0 }
 0x29f   : > { %v5992_v52 = vadd.f32 %v5991_v12, %v5961_v56  ;;  %v7259_v36 = vadd.f32 %v5783_v35, %v3646_v20  ;;  %v5924_v11 = vadd.f32 %v7256_v14, %v5923_v57  ;;  %v7213_v3 = vpop.f32.mrb[18].mxu0 }
 0x2a0   : > { %5896 = vst [vmem:[%s9640_s23 + $0x90] sm:$0xff] %v7258_v34  ;;  %v7260_v42 = vadd.f32 %v7213_v3, %v7021_v24  ;;  %v5786_v2 = vpop.f32.mrb[19].mxu0  ;;  %v5965_v5 = vmul.f32 %v7258_v34, %v7258_v34 }
 0x2a1   : > { %5894 = vst [vmem:[%s9640_s23 + $0x80] sm:$0xff] %v7259_v36  ;;  %v5925_v47 = vadd.f32 %v7259_v36, %v5924_v11  ;;  %v5963_v7 = vmul.f32 %v7259_v36, %v7259_v36  ;;  %v5993_v48 = vadd.f32 %v5992_v52, %v5962_v53  ;;  %v7261_v10 = vadd.f32 %v5786_v2, %v3649_v4 }
 0x2a2   : > { %5897 = vst [vmem:[%s9640_s23 + $0x98] sm:$0xff] %v7260_v42  ;;  %v5966_v38 = vmul.f32 %v7260_v42, %v7260_v42 }
 0x2a3   : > { %v7024_v40 = vpop.f32.mrb[20].mxu1  ;;  %v5994_v55 = vadd.f32 %v5993_v48, %v5963_v7  ;;  %5895 = vst [vmem:[%s9640_s23 + $0x88] sm:$0xff] %v7261_v10  ;;  %v5926_v50 = vadd.f32 %v7261_v10, %v5925_v47  ;;  %v5964_v15 = vmul.f32 %v7261_v10, %v7261_v10 }
 0x2a4   : > { %v3662_v62 = vpop.f32.mrb[21].mxu1 }
 0x2a5   : > { %v7025_v31 = vpop.f32.mrb[22].mxu1  ;;  %v5927_v13 = vadd.f32 %v7258_v34, %v5926_v50  ;;  %v5995_v28 = vadd.f32 %v5994_v55, %v5964_v15  ;;  %v7216_v8 = vpop.f32.mrb[20].mxu0 }
 0x2a6   : > { %v3665_v33 = vpop.f32.mrb[23].mxu1  ;;  %v7262_v43 = vadd.f32 %v7216_v8, %v7024_v40  ;;  %v5799_v9 = vpop.f32.mrb[21].mxu0 }
 0x2a7   : > { %v5996_v46 = vadd.f32 %v5995_v28, %v5965_v5  ;;  %v7263_v54 = vadd.f32 %v5799_v9, %v3662_v62  ;;  %v5928_v58 = vadd.f32 %v7260_v42, %v5927_v13  ;;  %v7217_v30 = vpop.f32.mrb[22].mxu0 }
 0x2a8   : > { %5900 = vst [vmem:[%s9640_s23 + $0xb0] sm:$0xff] %v7262_v43  ;;  %v7264_v63 = vadd.f32 %v7217_v30, %v7025_v31  ;;  %v5802_v17 = vpop.f32.mrb[23].mxu0  ;;  %v5969_v16 = vmul.f32 %v7262_v43, %v7262_v43 }
 0x2a9   : > { %5898 = vst [vmem:[%s9640_s23 + $0xa0] sm:$0xff] %v7263_v54  ;;  %v5929_v61 = vadd.f32 %v7263_v54, %v5928_v58  ;;  %v5967_v27 = vmul.f32 %v7263_v54, %v7263_v54  ;;  %v5997_v23 = vadd.f32 %v5996_v46, %v5966_v38  ;;  %v7265_v0 = vadd.f32 %v5802_v17, %v3665_v33 }
 0x2aa   : > { %5901 = vst [vmem:[%s9640_s23 + $0xb8] sm:$0xff] %v7264_v63  ;;  %v5970_v45 = vmul.f32 %v7264_v63, %v7264_v63 }
 0x2ab   : > { %v7028_v41 = vpop.f32.mrb[24].mxu1  ;;  %v5998_v32 = vadd.f32 %v5997_v23, %v5967_v27  ;;  %5899 = vst [vmem:[%s9640_s23 + $0xa8] sm:$0xff] %v7265_v0  ;;  %v5930_v60 = vadd.f32 %v7265_v0, %v5929_v61  ;;  %v5968_v22 = vmul.f32 %v7265_v0, %v7265_v0 }
 0x2ac   : > { %v3678_v51 = vpop.f32.mrb[25].mxu1 }
 0x2ad   : > { %v7029_v6 = vpop.f32.mrb[26].mxu1  ;;  %v5931_v39 = vadd.f32 %v7262_v43, %v5930_v60  ;;  %v5999_v19 = vadd.f32 %v5998_v32, %v5968_v22  ;;  %v7220_v14 = vpop.f32.mrb[24].mxu0 }
 0x2ae   : > { %v3681_v26 = vpop.f32.mrb[27].mxu1  ;;  %v7266_v18 = vadd.f32 %v7220_v14, %v7028_v41  ;;  %v5815_v25 = vpop.f32.mrb[25].mxu0 }
 0x2af   : > { %v6000_v44 = vadd.f32 %v5999_v19, %v5969_v16  ;;  %v7267_v59 = vadd.f32 %v5815_v25, %v3678_v51  ;;  %v5932_v1 = vadd.f32 %v7264_v63, %v5931_v39  ;;  %v7221_v20 = vpop.f32.mrb[26].mxu0 }
 0x2b0   : > { %5904 = vst [vmem:[%s9640_s23 + $0xd0] sm:$0xff] %v7266_v18  ;;  %v7268_v21 = vadd.f32 %v7221_v20, %v7029_v6  ;;  %v5818_v49 = vpop.f32.mrb[27].mxu0  ;;  %v5973_v36 = vmul.f32 %v7266_v18, %v7266_v18 }
 0x2b1   : > { %5902 = vst [vmem:[%s9640_s23 + $0xc0] sm:$0xff] %v7267_v59  ;;  %v5933_v29 = vadd.f32 %v7267_v59, %v5932_v1  ;;  %v5971_v24 = vmul.f32 %v7267_v59, %v7267_v59  ;;  %v6001_v4 = vadd.f32 %v6000_v44, %v5970_v45  ;;  %v7269_v56 = vadd.f32 %v5818_v49, %v3681_v26 }
 0x2b2   : > { %5905 = vst [vmem:[%s9640_s23 + $0xd8] sm:$0xff] %v7268_v21  ;;  %v5974_v7 = vmul.f32 %v7268_v21, %v7268_v21 }
 0x2b3   : > { %v7032_v57 = vpop.f32.mrb[28].mxu1  ;;  %v6002_v37 = vadd.f32 %v6001_v4, %v5971_v24  ;;  %5903 = vst [vmem:[%s9640_s23 + $0xc8] sm:$0xff] %v7269_v56  ;;  %v5934_v34 = vadd.f32 %v7269_v56, %v5933_v29  ;;  %v5972_v35 = vmul.f32 %v7269_v56, %v7269_v56 }
 0x2b4   : > { %v3694_v12 = vpop.f32.mrb[29].mxu1 }
 0x2b5   : > { %v7033_v53 = vpop.f32.mrb[30].mxu1  ;;  %v5935_v11 = vadd.f32 %v7266_v18, %v5934_v34  ;;  %v6003_v3 = vadd.f32 %v6002_v37, %v5972_v35  ;;  %v7224_v42 = vpop.f32.mrb[28].mxu0 }
 0x2b6   : > { %v3697_v52 = vpop.f32.mrb[31].mxu1  ;;  %v7270_v2 = vadd.f32 %v7224_v42, %v7032_v57  ;;  %v5831_v47 = vpop.f32.mrb[29].mxu0 }
 0x2b7   : > { %v6004_v48 = vadd.f32 %v6003_v3, %v5973_v36  ;;  %v7271_v10 = vadd.f32 %v5831_v47, %v3694_v12  ;;  %v5936_v40 = vadd.f32 %v7268_v21, %v5935_v11  ;;  %v7225_v62 = vpop.f32.mrb[30].mxu0 }
 0x2b8   : > { %5908 = vst [vmem:[%s9640_s23 + $0xf0] sm:$0xff] %v7270_v2  ;;  %v7272_v55 = vadd.f32 %v7225_v62, %v7033_v53  ;;  %v5834_v50 = vpop.f32.mrb[31].mxu0  ;;  %v5977_v43 = vmul.f32 %v7270_v2, %v7270_v2 }
 0x2b9   : > { %5906 = vst [vmem:[%s9640_s23 + $0xe0] sm:$0xff] %v7271_v10  ;;  %v5937_v15 = vadd.f32 %v7271_v10, %v5936_v40  ;;  %v5975_v31 = vmul.f32 %v7271_v10, %v7271_v10  ;;  %v6005_v33 = vadd.f32 %v6004_v48, %v5974_v7  ;;  %v7273_v5 = vadd.f32 %v5834_v50, %v3697_v52 }
 0x2ba   : > { %5909 = vst [vmem:[%s9640_s23 + $0xf8] sm:$0xff] %v7272_v55  ;;  %v5978_v46 = vmul.f32 %v7272_v55, %v7272_v55 }
 0x2bb   : > { %v6006_v13 = vadd.f32 %v6005_v33, %v5975_v31  ;;  %5907 = vst [vmem:[%s9640_s23 + $0xe8] sm:$0xff] %v7273_v5  ;;  %v5938_v28 = vadd.f32 %v7273_v5, %v5937_v15  ;;  %v5976_v8 = vmul.f32 %v7273_v5, %v7273_v5 }
 0x2bd   : > { %v5939_v9 = vadd.f32 %v7270_v2, %v5938_v28  ;;  %v6007_v38 = vadd.f32 %v6006_v13, %v5976_v8 }
 0x2bf   : > { %v5940_v54 = vadd.f32 %v7272_v55, %v5939_v9  ;;  %v6008_v58 = vadd.f32 %v6007_v38, %v5977_v43 }
 0x2c1   : > { %v5941_v30 = vrot.slane %v5940_v54, 4  ;;  %v6009_v63 = vadd.f32 %v6008_v58, %v5978_v46 }
 0x2c3   : > { %v5942_v17 = vadd.f32 %v5941_v30, %v5940_v54  ;;  %v6010_v61 = vrot.slane %v6009_v63, 4 }
 0x2c5   : > { %v5943_v27 = vrot.slane %v5942_v17, 2  ;;  %v6011_v23 = vadd.f32 %v6010_v61, %v6009_v63 }
 0x2c7   : > { %v5944_v0 = vadd.f32 %v5943_v27, %v5942_v17  ;;  %v6012_v41 = vrot.slane %v6011_v23, 2 }
 0x2c9   : > { %v5945_v51 = vrot.slane %v5944_v0, 1  ;;  %v6013_v32 = vadd.f32 %v6012_v41, %v6011_v23 }
 0x2cb   : > { %v6014_v60 = vrot.slane %v6013_v32, 1  ;;  %v5946_v22 = vadd.f32 %v5945_v51, %v5944_v0 }
 0x2cd   : > { %v6015_v6 = vadd.f32 %v6014_v60, %v6013_v32 }
 0x2cf   : > { %v6017_v26 = vsel %vm424_vm0, %v5946_v22, %v6015_v6 }
 0x2d0   : > { %6018 = vst [vmem:[%s208_s26] sm:$0x3] %v6017_v26 }
 0x2d1 PF: > { %s15_s15 = sadd.s32 1, %s7725_s15  }
 0x2d2   : > { %p12_p4 = scmp.ge.s32.totalorder %s15_s15, 4  }
 0x2d4   :  { %14 = sbr.rel (!%p12_p4) target bundleno = 1 (0x1), region = 85 }

</bundles_post_ra>
